<compile_context>
chip_gen: v7x
topology: tpu7x:2x2x1
jax: 0.10.0
libtpu: 0.0.40
codegen_flags: <defaults>
</compile_context>

<pallas_src>
import numpy as np
import jax
import jax.numpy as jnp
from jax.experimental import pallas as pl
from jax.experimental.pallas import tpu as pltpu

# ----------------------------- config (small, synthetic) ---------------------
B = 2            # batch
T = 64           # seq len == mixer sequence_length (orig module uses 512)
T_PAD = 128      # sequence axis padded to a full lane width inside the kernel
D = 128          # embedding_size (lane-dense)
F = 256          # ffn_size
H_MIX = D        # mixer hidden_dim == embedding_size (per MixerEncoderLayer)
L = 2            # n_layers
VOCAB = 50
PAD_IDX = 0
EPS = 1e-5       # LAYER_NORM_EPS
OUTPUT_SCALING = 1.0


# ----------------------------- shared math ------------------------------------
def _layer_norm(x, g, b):
    mu = jnp.mean(x, axis=-1, keepdims=True)
    var = jnp.mean(jnp.square(x - mu), axis=-1, keepdims=True)
    return (x - mu) * jax.lax.rsqrt(var + EPS) * g + b


# ----------------------------- Pallas kernel ----------------------------------
def mixer_encoder_kernel(x_ref, mask_ref,
                         mw1t_ref, mb1_ref, mw2t_ref, mb2_ref,
                         n1g_ref, n1b_ref,
                         fw1_ref, fb1_ref, fw2_ref, fb2_ref,
                         n2g_ref, n2b_ref,
                         out_ref):
    # mask column for this batch row: [T_PAD, 1] (1 = token, 0 = pad; pad rows
    # beyond the original T are 0 as well).
    mcol = mask_ref[0]
    # Hoisted lane-splat of the mask (computed once, reused in every layer).
    m2d = jnp.broadcast_to(mcol, (T_PAD, D))

    # encoder-level masking before the layer stack
    x = x_ref[0] * m2d                                           # [T_PAD, D] f32

    # Static unrolled layer loop: all layer weights are VMEM-resident, so each
    # ref[l] below is a zero-cost static slice.
    for l in range(L):
        # ---- MIXER "attention": token-mixing MLP over the sequence axis -----
        # Weights were pre-transposed + zero-padded host-side, so both
        # contractions are canonical lane-dense MXU dots on the [T_PAD, D]
        # activation (no in-kernel transpose / reshape relayouts).
        h = jnp.dot(mw1t_ref[l], x.astype(jnp.bfloat16),
                    preferred_element_type=jnp.float32)          # [H_MIX, D]
        h = jax.nn.gelu(h + mb1_ref[l], approximate=True)        # bias lane-dense
        att = jnp.dot(mw2t_ref[l], h.astype(jnp.bfloat16),
                      preferred_element_type=jnp.float32)        # [T_PAD, D]
        att = att + mb2_ref[l]                                   # bias lane-dense
        x = x + att                                              # dropout = identity
        x = _layer_norm(x, n1g_ref[l], n1b_ref[l])               # post-LN ('aiayn')

        # ---- FFN (relu) ------------------------------------------------------
        hh = jnp.dot(x.astype(jnp.bfloat16), fw1_ref[l],
                     preferred_element_type=jnp.float32) + fb1_ref[l]   # [T_PAD, F]
        hh = jnp.maximum(hh, 0.0)
        yy = jnp.dot(hh.astype(jnp.bfloat16), fw2_ref[l],
                     preferred_element_type=jnp.float32) + fb2_ref[l]   # [T_PAD, D]
        x = x + yy
        x = _layer_norm(x, n2g_ref[l], n2b_ref[l])

        # per-layer output masking (also re-zeros the padded rows)
        x = x * m2d

    # ---- reduce_output('mean') with output_scaling ---------------------------
    xs = x * OUTPUT_SCALING
    denom = jnp.maximum(jnp.sum(mcol), 1.0)          # exact divide (scalar)
    out_ref[0] = jnp.sum(xs, axis=0, keepdims=True) / denom


def run_encoder_pallas(x_emb, mask_f, params):
    (mw1, mb1, mw2, mb2, n1g, n1b, fw1, fb1, fw2, fb2, n2g, n2b) = params

    # Kernel-friendly repack (host side, once):
    #  * transpose mixer weights so both token-mixing matmuls are canonical MXU
    #    dots, zero-pad the sequence axis T -> T_PAD=128 so both operands are
    #    fully lane/sublane dense, cast matmul weights to bf16,
    #  * pre-broadcast mixer biases to lane-dense [*, D] blocks,
    #  * reshape FFN biases / LN params to broadcast-ready [L, 1, *] blocks,
    #  * zero-pad activations / mask along the sequence axis.
    pad_t = T_PAD - T
    mw1t = jnp.transpose(mw1, (0, 2, 1))                          # [L, H_MIX, T]
    mw1t = jnp.pad(mw1t, ((0, 0), (0, 0), (0, pad_t))).astype(jnp.bfloat16)
    mw2t = jnp.transpose(mw2, (0, 2, 1))                          # [L, T, H_MIX]
    mw2t = jnp.pad(mw2t, ((0, 0), (0, pad_t), (0, 0))).astype(jnp.bfloat16)
    fw1b = fw1.astype(jnp.bfloat16)                               # [L, D, F]
    fw2b = fw2.astype(jnp.bfloat16)                               # [L, F, D]

    mb1r = jnp.broadcast_to(mb1[:, :, None], (L, H_MIX, D))       # [L, H_MIX, D]
    mb2p = jnp.pad(mb2, ((0, 0), (0, pad_t)))                     # [L, T_PAD]
    mb2r = jnp.broadcast_to(mb2p[:, :, None], (L, T_PAD, D))      # [L, T_PAD, D]
    fb1r = fb1[:, None, :]                                        # [L, 1, F]
    fb2r = fb2[:, None, :]                                        # [L, 1, D]
    n1gr = n1g[:, None, :]; n1br = n1b[:, None, :]                # [L, 1, D]
    n2gr = n2g[:, None, :]; n2br = n2b[:, None, :]                # [L, 1, D]

    x_pad = jnp.pad(x_emb, ((0, 0), (0, pad_t), (0, 0)))          # [B, T_PAD, D]
    mask3 = jnp.pad(mask_f, ((0, 0), (0, pad_t)))[:, :, None]     # [B, T_PAD, 1]

    def resident_spec(arr):
        # Full-array block with a constant index: DMA'd into VMEM once and
        # kept resident across the batch grid axis (no per-step re-fetch).
        zeros = (0,) * arr.ndim
        return pl.BlockSpec(arr.shape, lambda b, z=zeros: z)

    x_spec = pl.BlockSpec((1, T_PAD, D), lambda b: (b, 0, 0))
    m_spec = pl.BlockSpec((1, T_PAD, 1), lambda b: (b, 0, 0))
    out_spec = pl.BlockSpec((1, 1, D), lambda b: (b, 0, 0))

    in_specs = [x_spec, m_spec,
                resident_spec(mw1t), resident_spec(mb1r),
                resident_spec(mw2t), resident_spec(mb2r),
                resident_spec(n1gr), resident_spec(n1br),
                resident_spec(fw1b), resident_spec(fb1r),
                resident_spec(fw2b), resident_spec(fb2r),
                resident_spec(n2gr), resident_spec(n2br)]

    out = pl.pallas_call(
        mixer_encoder_kernel,
        out_shape=jax.ShapeDtypeStruct((B, 1, D), jnp.float32),
        grid_spec=pltpu.PrefetchScalarGridSpec(
            num_scalar_prefetch=0,
            grid=(B,),
            in_specs=in_specs,
            out_specs=out_spec,
            scratch_shapes=[]),
        compiler_params=pltpu.CompilerParams(
            dimension_semantics=("parallel",)),   # feeds both TCs on v7x
    )(x_pad, mask3,
      mw1t, mb1r, mw2t, mb2r, n1gr, n1br,
      fw1b, fb1r, fw2b, fb2r, n2gr, n2br)
    return out[:, 0, :]


# ----------------------------- glue (plain JAX) -------------------------------
def create_position_codes(n_pos, dim):
    position_enc = np.array(
        [[p / np.power(10000.0, 2.0 * j / dim) for j in range(dim // 2)]
         for p in range(n_pos)], dtype=np.float64)
    pe = np.zeros((n_pos, dim), dtype=np.float32)
    pe[:, 0::2] = np.sin(position_enc)
    pe[:, 1::2] = np.cos(position_enc)
    return jnp.asarray(pe)


def forward_embedding(ids, tok_emb, pos_emb):
    # token/position embedding gathers are host-side JAX (not in the kernel)
    mask = ids != PAD_IDX
    positions = jnp.clip(jnp.cumsum(mask.astype(jnp.int32), axis=1) - 1, 0, None)
    t = tok_emb[ids]                      # embeddings_scale=False -> no sqrt(D) scale
    t = t + pos_emb[positions]
    # n_segments = 0 -> no segment embeddings
    return t.astype(jnp.float32), mask.astype(jnp.float32)


# ----------------------------- pure-JAX reference -----------------------------
def _mm(a, b):
    # same math as the kernel: bf16 MXU operands, f32 accumulation
    return jnp.dot(a.astype(jnp.bfloat16), b.astype(jnp.bfloat16),
                   preferred_element_type=jnp.float32)


def reference_forward(x, m, p):
    (mw1, mb1, mw2, mb2, n1g, n1b, fw1, fb1, fw2, fb2, n2g, n2b) = p
    mcol = m[:, :, None]
    x = x * mcol
    for l in range(L):
        residual = x
        xt = jnp.transpose(x, (0, 2, 1)).reshape(B * D, T)
        h = jax.nn.gelu(_mm(xt, mw1[l]) + mb1[l], approximate=True)
        att = jnp.transpose((_mm(h, mw2[l]) + mb2[l]).reshape(B, D, T), (0, 2, 1))
        x = residual + att
        x = _layer_norm(x, n1g[l], n1b[l])
        residual = x
        xr = x.reshape(B * T, D)
        yy = _mm(jnp.maximum(_mm(xr, fw1[l]) + fb1[l], 0.0), fw2[l]) + fb2[l]
        x = residual + yy.reshape(B, T, D)
        x = _layer_norm(x, n2g[l], n2b[l])
        x = x * mcol
    x = x * OUTPUT_SCALING
    denom = jnp.maximum(jnp.sum(m, axis=1, keepdims=True), 1.0)
    return jnp.sum(x, axis=1) / denom


# ----------------------------- main -------------------------------------------
if __name__ == "__main__":
    key = jax.random.PRNGKey(0)
    ks = jax.random.split(key, 8)

    def nrm(k, shape, scale):
        return scale * jax.random.normal(k, shape, dtype=jnp.float32)

    # embeddings (nn.Embedding init ~ N(0, D^-0.5); sinusoidal positions)
    tok_emb = nrm(ks[0], (VOCAB, D), D ** -0.5).at[PAD_IDX].set(0.0)
    pos_emb = create_position_codes(T, D)

    # per-layer parameters, stacked over layers (original math orientation)
    mw1 = nrm(ks[1], (L, T, H_MIX), 0.05)
    mb1 = jnp.zeros((L, H_MIX), jnp.float32)
    mw2 = nrm(ks[2], (L, H_MIX, T), 0.05)
    mb2 = jnp.zeros((L, T), jnp.float32)
    n1g = jnp.ones((L, D), jnp.float32)
    n1b = jnp.zeros((L, D), jnp.float32)
    fw1 = nrm(ks[3], (L, D, F), 0.05)
    fb1 = jnp.zeros((L, F), jnp.float32)
    fw2 = nrm(ks[4], (L, F, D), 0.05)
    fb2 = jnp.zeros((L, D), jnp.float32)
    n2g = jnp.ones((L, D), jnp.float32)
    n2b = jnp.zeros((L, D), jnp.float32)
    params = (mw1, mb1, mw2, mb2, n1g, n1b, fw1, fb1, fw2, fb2, n2g, n2b)

    # deterministic token ids with some padding (padding_idx=0)
    ids = jax.random.randint(ks[5], (B, T), 1, VOCAB)
    ids = ids.at[1, T - 9:].set(PAD_IDX)

    x_emb, mask_f = forward_embedding(ids, tok_emb, pos_emb)

    out = run_encoder_pallas(x_emb, mask_f, params)
    out = jax.block_until_ready(out)

    ref = jax.block_until_ready(reference_forward(x_emb, mask_f, params))
    np.testing.assert_allclose(np.asarray(out), np.asarray(ref), rtol=2e-2, atol=2e-2)

    print("KERNEL_OK")
</pallas_src>

<mosaic_0001>
module attributes {stable_mosaic.version = 11 : i64} {
  func.func @mixer_encoder_kernel(%arg0: i32, %arg1: memref<1x128x128xf32, #tpu.memory_space<vmem>>, %arg2: memref<1x128x1xf32, #tpu.memory_space<vmem>>, %arg3: memref<2x128x128xbf16, #tpu.memory_space<vmem>>, %arg4: memref<2x128x128xf32, #tpu.memory_space<vmem>>, %arg5: memref<2x128x128xbf16, #tpu.memory_space<vmem>>, %arg6: memref<2x128x128xf32, #tpu.memory_space<vmem>>, %arg7: memref<2x1x128xf32, #tpu.memory_space<vmem>>, %arg8: memref<2x1x128xf32, #tpu.memory_space<vmem>>, %arg9: memref<2x128x256xbf16, #tpu.memory_space<vmem>>, %arg10: memref<2x1x256xf32, #tpu.memory_space<vmem>>, %arg11: memref<2x256x128xbf16, #tpu.memory_space<vmem>>, %arg12: memref<2x1x128xf32, #tpu.memory_space<vmem>>, %arg13: memref<2x1x128xf32, #tpu.memory_space<vmem>>, %arg14: memref<2x1x128xf32, #tpu.memory_space<vmem>>, %arg15: memref<1x1x128xf32, #tpu.memory_space<vmem>>) attributes {dimension_semantics = [#tpu.dimension_semantics<parallel>], iteration_bounds = array<i64: 2>, scalar_prefetch = 0 : i64, scratch_operands = 0 : i64, tpu.core_type = #tpu.core_type<tc>, window_params = [{transform_indices = @transform_0, window_bounds = array<i64: 1, 128, 128>}, {transform_indices = @transform_1, window_bounds = array<i64: 1, 128, 1>}, {pipeline_mode = #tpu.pipeline_mode<synchronous>, transform_indices = @transform_2, window_bounds = array<i64: 2, 128, 128>}, {pipeline_mode = #tpu.pipeline_mode<synchronous>, transform_indices = @transform_3, window_bounds = array<i64: 2, 128, 128>}, {pipeline_mode = #tpu.pipeline_mode<synchronous>, transform_indices = @transform_4, window_bounds = array<i64: 2, 128, 128>}, {pipeline_mode = #tpu.pipeline_mode<synchronous>, transform_indices = @transform_5, window_bounds = array<i64: 2, 128, 128>}, {pipeline_mode = #tpu.pipeline_mode<synchronous>, transform_indices = @transform_6, window_bounds = array<i64: 2, 1, 128>}, {pipeline_mode = #tpu.pipeline_mode<synchronous>, transform_indices = @transform_7, window_bounds = array<i64: 2, 1, 128>}, {pipeline_mode = #tpu.pipeline_mode<synchronous>, transform_indices = @transform_8, window_bounds = array<i64: 2, 128, 256>}, {pipeline_mode = #tpu.pipeline_mode<synchronous>, transform_indices = @transform_9, window_bounds = array<i64: 2, 1, 256>}, {pipeline_mode = #tpu.pipeline_mode<synchronous>, transform_indices = @transform_10, window_bounds = array<i64: 2, 256, 128>}, {pipeline_mode = #tpu.pipeline_mode<synchronous>, transform_indices = @transform_11, window_bounds = array<i64: 2, 1, 128>}, {pipeline_mode = #tpu.pipeline_mode<synchronous>, transform_indices = @transform_12, window_bounds = array<i64: 2, 1, 128>}, {pipeline_mode = #tpu.pipeline_mode<synchronous>, transform_indices = @transform_13, window_bounds = array<i64: 2, 1, 128>}, {transform_indices = @transform_14, window_bounds = array<i64: 1, 1, 128>}]} {
    %c0 = arith.constant 0 : index
    %c0_0 = arith.constant 0 : index
    %c0_1 = arith.constant 0 : index
    %0 = vector.load %arg2[%c0, %c0_0, %c0_1] : memref<1x128x1xf32, #tpu.memory_space<vmem>>, vector<1x128x1xf32>
    %1 = vector.shape_cast %0 : vector<1x128x1xf32> to vector<128x1xf32>
    %2 = vector.shape_cast %1 : vector<128x1xf32> to vector<128x1xf32>
    %3 = vector.broadcast %2 : vector<128x1xf32> to vector<128x128xf32>
    %c0_2 = arith.constant 0 : index
    %c0_3 = arith.constant 0 : index
    %c0_4 = arith.constant 0 : index
    %4 = vector.load %arg1[%c0_2, %c0_3, %c0_4] : memref<1x128x128xf32, #tpu.memory_space<vmem>>, vector<1x128x128xf32>
    %5 = vector.shape_cast %4 : vector<1x128x128xf32> to vector<128x128xf32>
    %6 = arith.mulf %5, %3 : vector<128x128xf32>
    %c0_5 = arith.constant 0 : index
    %c0_6 = arith.constant 0 : index
    %c0_7 = arith.constant 0 : index
    %7 = vector.load %arg3[%c0_5, %c0_6, %c0_7] : memref<2x128x128xbf16, #tpu.memory_space<vmem>>, vector<1x128x128xbf16>
    %8 = vector.shape_cast %7 : vector<1x128x128xbf16> to vector<128x128xbf16>
    %9 = arith.truncf %6 : vector<128x128xf32> to vector<128x128xbf16>
    %cst = arith.constant dense<0.000000e+00> : vector<128x128xf32>
    %10 = tpu.matmul %8, %9, %cst {dimension_numbers = #tpu.dot_dimension_numbers<[1], [0], [0], [1], [0, 0, 1, 1], [], []>} : vector<128x128xbf16>, vector<128x128xbf16>, vector<128x128xf32> -> vector<128x128xf32>
    %c0_8 = arith.constant 0 : index
    %c0_9 = arith.constant 0 : index
    %c0_10 = arith.constant 0 : index
    %11 = vector.load %arg4[%c0_8, %c0_9, %c0_10] : memref<2x128x128xf32, #tpu.memory_space<vmem>>, vector<1x128x128xf32>
    %12 = vector.shape_cast %11 : vector<1x128x128xf32> to vector<128x128xf32>
    %13 = arith.addf %10, %12 : vector<128x128xf32>
    %14 = arith.mulf %13, %13 : vector<128x128xf32>
    %15 = arith.mulf %13, %14 : vector<128x128xf32>
    %cst_11 = arith.constant 4.471500e-02 : f32
    %16 = vector.broadcast %cst_11 : f32 to vector<128x128xf32>
    %17 = arith.mulf %16, %15 : vector<128x128xf32>
    %18 = arith.addf %13, %17 : vector<128x128xf32>
    %cst_12 = arith.constant 0.797884583 : f32
    %19 = vector.broadcast %cst_12 : f32 to vector<128x128xf32>
    %20 = arith.mulf %19, %18 : vector<128x128xf32>
    %21 = math.tanh %20 : vector<128x128xf32>
    %cst_13 = arith.constant 1.000000e+00 : f32
    %22 = vector.broadcast %cst_13 : f32 to vector<128x128xf32>
    %23 = arith.addf %22, %21 : vector<128x128xf32>
    %cst_14 = arith.constant 5.000000e-01 : f32
    %24 = vector.broadcast %cst_14 : f32 to vector<128x128xf32>
    %25 = arith.mulf %24, %23 : vector<128x128xf32>
    %26 = arith.mulf %13, %25 : vector<128x128xf32>
    %c0_15 = arith.constant 0 : index
    %c0_16 = arith.constant 0 : index
    %c0_17 = arith.constant 0 : index
    %27 = vector.load %arg5[%c0_15, %c0_16, %c0_17] : memref<2x128x128xbf16, #tpu.memory_space<vmem>>, vector<1x128x128xbf16>
    %28 = vector.shape_cast %27 : vector<1x128x128xbf16> to vector<128x128xbf16>
    %29 = arith.truncf %26 : vector<128x128xf32> to vector<128x128xbf16>
    %cst_18 = arith.constant dense<0.000000e+00> : vector<128x128xf32>
    %30 = tpu.matmul %28, %29, %cst_18 {dimension_numbers = #tpu.dot_dimension_numbers<[1], [0], [0], [1], [0, 0, 1, 1], [], []>} : vector<128x128xbf16>, vector<128x128xbf16>, vector<128x128xf32> -> vector<128x128xf32>
    %c0_19 = arith.constant 0 : index
    %c0_20 = arith.constant 0 : index
    %c0_21 = arith.constant 0 : index
    %31 = vector.load %arg6[%c0_19, %c0_20, %c0_21] : memref<2x128x128xf32, #tpu.memory_space<vmem>>, vector<1x128x128xf32>
    %32 = vector.shape_cast %31 : vector<1x128x128xf32> to vector<128x128xf32>
    %33 = arith.addf %30, %32 : vector<128x128xf32>
    %34 = arith.addf %6, %33 : vector<128x128xf32>
    %c0_22 = arith.constant 0 : index
    %c0_23 = arith.constant 0 : index
    %c0_24 = arith.constant 0 : index
    %35 = vector.load %arg7[%c0_22, %c0_23, %c0_24] : memref<2x1x128xf32, #tpu.memory_space<vmem>>, vector<1x1x128xf32>
    %36 = vector.shape_cast %35 : vector<1x1x128xf32> to vector<1x128xf32>
    %c0_25 = arith.constant 0 : index
    %c0_26 = arith.constant 0 : index
    %c0_27 = arith.constant 0 : index
    %37 = vector.load %arg8[%c0_25, %c0_26, %c0_27] : memref<2x1x128xf32, #tpu.memory_space<vmem>>, vector<1x1x128xf32>
    %38 = vector.shape_cast %37 : vector<1x1x128xf32> to vector<1x128xf32>
    %cst_28 = arith.constant dense<0.000000e+00> : vector<128xf32>
    %39 = vector.multi_reduction <add>, %34, %cst_28 [1] : vector<128x128xf32> to vector<128xf32>
    %40 = vector.shape_cast %39 : vector<128xf32> to vector<128x1xf32>
    %cst_29 = arith.constant 1.280000e+02 : f32
    %41 = vector.broadcast %cst_29 : f32 to vector<128x1xf32>
    %42 = arith.divf %40, %41 : vector<128x1xf32>
    %43 = vector.broadcast %42 : vector<128x1xf32> to vector<128x128xf32>
    %44 = arith.subf %34, %43 : vector<128x128xf32>
    %45 = arith.mulf %44, %44 : vector<128x128xf32>
    %cst_30 = arith.constant dense<0.000000e+00> : vector<128xf32>
    %46 = vector.multi_reduction <add>, %45, %cst_30 [1] : vector<128x128xf32> to vector<128xf32>
    %47 = vector.shape_cast %46 : vector<128xf32> to vector<128x1xf32>
    %cst_31 = arith.constant 1.280000e+02 : f32
    %48 = vector.broadcast %cst_31 : f32 to vector<128x1xf32>
    %49 = arith.divf %47, %48 : vector<128x1xf32>
    %50 = vector.broadcast %42 : vector<128x1xf32> to vector<128x128xf32>
    %51 = arith.subf %34, %50 : vector<128x128xf32>
    %cst_32 = arith.constant 9.99999974E-6 : f32
    %52 = vector.broadcast %cst_32 : f32 to vector<128x1xf32>
    %53 = arith.addf %49, %52 : vector<128x1xf32>
    %54 = math.rsqrt %53 : vector<128x1xf32>
    %55 = vector.broadcast %54 : vector<128x1xf32> to vector<128x128xf32>
    %56 = arith.mulf %51, %55 : vector<128x128xf32>
    %57 = vector.broadcast %36 : vector<1x128xf32> to vector<128x128xf32>
    %58 = arith.mulf %56, %57 : vector<128x128xf32>
    %59 = vector.broadcast %38 : vector<1x128xf32> to vector<128x128xf32>
    %60 = arith.addf %58, %59 : vector<128x128xf32>
    %61 = arith.truncf %60 : vector<128x128xf32> to vector<128x128xbf16>
    %c0_33 = arith.constant 0 : index
    %c0_34 = arith.constant 0 : index
    %c0_35 = arith.constant 0 : index
    %62 = vector.load %arg9[%c0_33, %c0_34, %c0_35] : memref<2x128x256xbf16, #tpu.memory_space<vmem>>, vector<1x128x256xbf16>
    %63 = vector.shape_cast %62 : vector<1x128x256xbf16> to vector<128x256xbf16>
    %cst_36 = arith.constant dense<0.000000e+00> : vector<128x256xf32>
    %64 = tpu.matmul %61, %63, %cst_36 {dimension_numbers = #tpu.dot_dimension_numbers<[1], [0], [0], [1], [0, 0, 1, 1], [], []>} : vector<128x128xbf16>, vector<128x256xbf16>, vector<128x256xf32> -> vector<128x256xf32>
    %c0_37 = arith.constant 0 : index
    %c0_38 = arith.constant 0 : index
    %c0_39 = arith.constant 0 : index
    %65 = vector.load %arg10[%c0_37, %c0_38, %c0_39] : memref<2x1x256xf32, #tpu.memory_space<vmem>>, vector<1x1x256xf32>
    %66 = vector.shape_cast %65 : vector<1x1x256xf32> to vector<1x256xf32>
    %67 = vector.broadcast %66 : vector<1x256xf32> to vector<128x256xf32>
    %68 = arith.addf %64, %67 : vector<128x256xf32>
    %cst_40 = arith.constant 0.000000e+00 : f32
    %69 = vector.broadcast %cst_40 : f32 to vector<128x256xf32>
    %70 = arith.maximumf %68, %69 : vector<128x256xf32>
    %71 = arith.truncf %70 : vector<128x256xf32> to vector<128x256xbf16>
    %c0_41 = arith.constant 0 : index
    %c0_42 = arith.constant 0 : index
    %c0_43 = arith.constant 0 : index
    %72 = vector.load %arg11[%c0_41, %c0_42, %c0_43] : memref<2x256x128xbf16, #tpu.memory_space<vmem>>, vector<1x256x128xbf16>
    %73 = vector.shape_cast %72 : vector<1x256x128xbf16> to vector<256x128xbf16>
    %cst_44 = arith.constant dense<0.000000e+00> : vector<128x128xf32>
    %74 = tpu.matmul %71, %73, %cst_44 {dimension_numbers = #tpu.dot_dimension_numbers<[1], [0], [0], [1], [0, 0, 1, 1], [], []>} : vector<128x256xbf16>, vector<256x128xbf16>, vector<128x128xf32> -> vector<128x128xf32>
    %c0_45 = arith.constant 0 : index
    %c0_46 = arith.constant 0 : index
    %c0_47 = arith.constant 0 : index
    %75 = vector.load %arg12[%c0_45, %c0_46, %c0_47] : memref<2x1x128xf32, #tpu.memory_space<vmem>>, vector<1x1x128xf32>
    %76 = vector.shape_cast %75 : vector<1x1x128xf32> to vector<1x128xf32>
    %77 = vector.broadcast %76 : vector<1x128xf32> to vector<128x128xf32>
    %78 = arith.addf %74, %77 : vector<128x128xf32>
    %79 = arith.addf %60, %78 : vector<128x128xf32>
    %c0_48 = arith.constant 0 : index
    %c0_49 = arith.constant 0 : index
    %c0_50 = arith.constant 0 : index
    %80 = vector.load %arg13[%c0_48, %c0_49, %c0_50] : memref<2x1x128xf32, #tpu.memory_space<vmem>>, vector<1x1x128xf32>
    %81 = vector.shape_cast %80 : vector<1x1x128xf32> to vector<1x128xf32>
    %c0_51 = arith.constant 0 : index
    %c0_52 = arith.constant 0 : index
    %c0_53 = arith.constant 0 : index
    %82 = vector.load %arg14[%c0_51, %c0_52, %c0_53] : memref<2x1x128xf32, #tpu.memory_space<vmem>>, vector<1x1x128xf32>
    %83 = vector.shape_cast %82 : vector<1x1x128xf32> to vector<1x128xf32>
    %cst_54 = arith.constant dense<0.000000e+00> : vector<128xf32>
    %84 = vector.multi_reduction <add>, %79, %cst_54 [1] : vector<128x128xf32> to vector<128xf32>
    %85 = vector.shape_cast %84 : vector<128xf32> to vector<128x1xf32>
    %cst_55 = arith.constant 1.280000e+02 : f32
    %86 = vector.broadcast %cst_55 : f32 to vector<128x1xf32>
    %87 = arith.divf %85, %86 : vector<128x1xf32>
    %88 = vector.broadcast %87 : vector<128x1xf32> to vector<128x128xf32>
    %89 = arith.subf %79, %88 : vector<128x128xf32>
    %90 = arith.mulf %89, %89 : vector<128x128xf32>
    %cst_56 = arith.constant dense<0.000000e+00> : vector<128xf32>
    %91 = vector.multi_reduction <add>, %90, %cst_56 [1] : vector<128x128xf32> to vector<128xf32>
    %92 = vector.shape_cast %91 : vector<128xf32> to vector<128x1xf32>
    %cst_57 = arith.constant 1.280000e+02 : f32
    %93 = vector.broadcast %cst_57 : f32 to vector<128x1xf32>
    %94 = arith.divf %92, %93 : vector<128x1xf32>
    %95 = vector.broadcast %87 : vector<128x1xf32> to vector<128x128xf32>
    %96 = arith.subf %79, %95 : vector<128x128xf32>
    %cst_58 = arith.constant 9.99999974E-6 : f32
    %97 = vector.broadcast %cst_58 : f32 to vector<128x1xf32>
    %98 = arith.addf %94, %97 : vector<128x1xf32>
    %99 = math.rsqrt %98 : vector<128x1xf32>
    %100 = vector.broadcast %99 : vector<128x1xf32> to vector<128x128xf32>
    %101 = arith.mulf %96, %100 : vector<128x128xf32>
    %102 = vector.broadcast %81 : vector<1x128xf32> to vector<128x128xf32>
    %103 = arith.mulf %101, %102 : vector<128x128xf32>
    %104 = vector.broadcast %83 : vector<1x128xf32> to vector<128x128xf32>
    %105 = arith.addf %103, %104 : vector<128x128xf32>
    %106 = arith.mulf %105, %3 : vector<128x128xf32>
    %c1 = arith.constant 1 : index
    %c0_59 = arith.constant 0 : index
    %c0_60 = arith.constant 0 : index
    %107 = vector.load %arg3[%c1, %c0_59, %c0_60] : memref<2x128x128xbf16, #tpu.memory_space<vmem>>, vector<1x128x128xbf16>
    %108 = vector.shape_cast %107 : vector<1x128x128xbf16> to vector<128x128xbf16>
    %109 = arith.truncf %106 : vector<128x128xf32> to vector<128x128xbf16>
    %cst_61 = arith.constant dense<0.000000e+00> : vector<128x128xf32>
    %110 = tpu.matmul %108, %109, %cst_61 {dimension_numbers = #tpu.dot_dimension_numbers<[1], [0], [0], [1], [0, 0, 1, 1], [], []>} : vector<128x128xbf16>, vector<128x128xbf16>, vector<128x128xf32> -> vector<128x128xf32>
    %c1_62 = arith.constant 1 : index
    %c0_63 = arith.constant 0 : index
    %c0_64 = arith.constant 0 : index
    %111 = vector.load %arg4[%c1_62, %c0_63, %c0_64] : memref<2x128x128xf32, #tpu.memory_space<vmem>>, vector<1x128x128xf32>
    %112 = vector.shape_cast %111 : vector<1x128x128xf32> to vector<128x128xf32>
    %113 = arith.addf %110, %112 : vector<128x128xf32>
    %114 = arith.mulf %113, %113 : vector<128x128xf32>
    %115 = arith.mulf %113, %114 : vector<128x128xf32>
    %cst_65 = arith.constant 4.471500e-02 : f32
    %116 = vector.broadcast %cst_65 : f32 to vector<128x128xf32>
    %117 = arith.mulf %116, %115 : vector<128x128xf32>
    %118 = arith.addf %113, %117 : vector<128x128xf32>
    %cst_66 = arith.constant 0.797884583 : f32
    %119 = vector.broadcast %cst_66 : f32 to vector<128x128xf32>
    %120 = arith.mulf %119, %118 : vector<128x128xf32>
    %121 = math.tanh %120 : vector<128x128xf32>
    %cst_67 = arith.constant 1.000000e+00 : f32
    %122 = vector.broadcast %cst_67 : f32 to vector<128x128xf32>
    %123 = arith.addf %122, %121 : vector<128x128xf32>
    %cst_68 = arith.constant 5.000000e-01 : f32
    %124 = vector.broadcast %cst_68 : f32 to vector<128x128xf32>
    %125 = arith.mulf %124, %123 : vector<128x128xf32>
    %126 = arith.mulf %113, %125 : vector<128x128xf32>
    %c1_69 = arith.constant 1 : index
    %c0_70 = arith.constant 0 : index
    %c0_71 = arith.constant 0 : index
    %127 = vector.load %arg5[%c1_69, %c0_70, %c0_71] : memref<2x128x128xbf16, #tpu.memory_space<vmem>>, vector<1x128x128xbf16>
    %128 = vector.shape_cast %127 : vector<1x128x128xbf16> to vector<128x128xbf16>
    %129 = arith.truncf %126 : vector<128x128xf32> to vector<128x128xbf16>
    %cst_72 = arith.constant dense<0.000000e+00> : vector<128x128xf32>
    %130 = tpu.matmul %128, %129, %cst_72 {dimension_numbers = #tpu.dot_dimension_numbers<[1], [0], [0], [1], [0, 0, 1, 1], [], []>} : vector<128x128xbf16>, vector<128x128xbf16>, vector<128x128xf32> -> vector<128x128xf32>
    %c1_73 = arith.constant 1 : index
    %c0_74 = arith.constant 0 : index
    %c0_75 = arith.constant 0 : index
    %131 = vector.load %arg6[%c1_73, %c0_74, %c0_75] : memref<2x128x128xf32, #tpu.memory_space<vmem>>, vector<1x128x128xf32>
    %132 = vector.shape_cast %131 : vector<1x128x128xf32> to vector<128x128xf32>
    %133 = arith.addf %130, %132 : vector<128x128xf32>
    %134 = arith.addf %106, %133 : vector<128x128xf32>
    %c1_76 = arith.constant 1 : index
    %c0_77 = arith.constant 0 : index
    %c0_78 = arith.constant 0 : index
    %135 = vector.load %arg7[%c1_76, %c0_77, %c0_78] : memref<2x1x128xf32, #tpu.memory_space<vmem>>, vector<1x1x128xf32>
    %136 = vector.shape_cast %135 : vector<1x1x128xf32> to vector<1x128xf32>
    %c1_79 = arith.constant 1 : index
    %c0_80 = arith.constant 0 : index
    %c0_81 = arith.constant 0 : index
    %137 = vector.load %arg8[%c1_79, %c0_80, %c0_81] : memref<2x1x128xf32, #tpu.memory_space<vmem>>, vector<1x1x128xf32>
    %138 = vector.shape_cast %137 : vector<1x1x128xf32> to vector<1x128xf32>
    %cst_82 = arith.constant dense<0.000000e+00> : vector<128xf32>
    %139 = vector.multi_reduction <add>, %134, %cst_82 [1] : vector<128x128xf32> to vector<128xf32>
    %140 = vector.shape_cast %139 : vector<128xf32> to vector<128x1xf32>
    %cst_83 = arith.constant 1.280000e+02 : f32
    %141 = vector.broadcast %cst_83 : f32 to vector<128x1xf32>
    %142 = arith.divf %140, %141 : vector<128x1xf32>
    %143 = vector.broadcast %142 : vector<128x1xf32> to vector<128x128xf32>
    %144 = arith.subf %134, %143 : vector<128x128xf32>
    %145 = arith.mulf %144, %144 : vector<128x128xf32>
    %cst_84 = arith.constant dense<0.000000e+00> : vector<128xf32>
    %146 = vector.multi_reduction <add>, %145, %cst_84 [1] : vector<128x128xf32> to vector<128xf32>
    %147 = vector.shape_cast %146 : vector<128xf32> to vector<128x1xf32>
    %cst_85 = arith.constant 1.280000e+02 : f32
    %148 = vector.broadcast %cst_85 : f32 to vector<128x1xf32>
    %149 = arith.divf %147, %148 : vector<128x1xf32>
    %150 = vector.broadcast %142 : vector<128x1xf32> to vector<128x128xf32>
    %151 = arith.subf %134, %150 : vector<128x128xf32>
    %cst_86 = arith.constant 9.99999974E-6 : f32
    %152 = vector.broadcast %cst_86 : f32 to vector<128x1xf32>
    %153 = arith.addf %149, %152 : vector<128x1xf32>
    %154 = math.rsqrt %153 : vector<128x1xf32>
    %155 = vector.broadcast %154 : vector<128x1xf32> to vector<128x128xf32>
    %156 = arith.mulf %151, %155 : vector<128x128xf32>
    %157 = vector.broadcast %136 : vector<1x128xf32> to vector<128x128xf32>
    %158 = arith.mulf %156, %157 : vector<128x128xf32>
    %159 = vector.broadcast %138 : vector<1x128xf32> to vector<128x128xf32>
    %160 = arith.addf %158, %159 : vector<128x128xf32>
    %161 = arith.truncf %160 : vector<128x128xf32> to vector<128x128xbf16>
    %c1_87 = arith.constant 1 : index
    %c0_88 = arith.constant 0 : index
    %c0_89 = arith.constant 0 : index
    %162 = vector.load %arg9[%c1_87, %c0_88, %c0_89] : memref<2x128x256xbf16, #tpu.memory_space<vmem>>, vector<1x128x256xbf16>
    %163 = vector.shape_cast %162 : vector<1x128x256xbf16> to vector<128x256xbf16>
    %cst_90 = arith.constant dense<0.000000e+00> : vector<128x256xf32>
    %164 = tpu.matmul %161, %163, %cst_90 {dimension_numbers = #tpu.dot_dimension_numbers<[1], [0], [0], [1], [0, 0, 1, 1], [], []>} : vector<128x128xbf16>, vector<128x256xbf16>, vector<128x256xf32> -> vector<128x256xf32>
    %c1_91 = arith.constant 1 : index
    %c0_92 = arith.constant 0 : index
    %c0_93 = arith.constant 0 : index
    %165 = vector.load %arg10[%c1_91, %c0_92, %c0_93] : memref<2x1x256xf32, #tpu.memory_space<vmem>>, vector<1x1x256xf32>
    %166 = vector.shape_cast %165 : vector<1x1x256xf32> to vector<1x256xf32>
    %167 = vector.broadcast %166 : vector<1x256xf32> to vector<128x256xf32>
    %168 = arith.addf %164, %167 : vector<128x256xf32>
    %cst_94 = arith.constant 0.000000e+00 : f32
    %169 = vector.broadcast %cst_94 : f32 to vector<128x256xf32>
    %170 = arith.maximumf %168, %169 : vector<128x256xf32>
    %171 = arith.truncf %170 : vector<128x256xf32> to vector<128x256xbf16>
    %c1_95 = arith.constant 1 : index
    %c0_96 = arith.constant 0 : index
    %c0_97 = arith.constant 0 : index
    %172 = vector.load %arg11[%c1_95, %c0_96, %c0_97] : memref<2x256x128xbf16, #tpu.memory_space<vmem>>, vector<1x256x128xbf16>
    %173 = vector.shape_cast %172 : vector<1x256x128xbf16> to vector<256x128xbf16>
    %cst_98 = arith.constant dense<0.000000e+00> : vector<128x128xf32>
    %174 = tpu.matmul %171, %173, %cst_98 {dimension_numbers = #tpu.dot_dimension_numbers<[1], [0], [0], [1], [0, 0, 1, 1], [], []>} : vector<128x256xbf16>, vector<256x128xbf16>, vector<128x128xf32> -> vector<128x128xf32>
    %c1_99 = arith.constant 1 : index
    %c0_100 = arith.constant 0 : index
    %c0_101 = arith.constant 0 : index
    %175 = vector.load %arg12[%c1_99, %c0_100, %c0_101] : memref<2x1x128xf32, #tpu.memory_space<vmem>>, vector<1x1x128xf32>
    %176 = vector.shape_cast %175 : vector<1x1x128xf32> to vector<1x128xf32>
    %177 = vector.broadcast %176 : vector<1x128xf32> to vector<128x128xf32>
    %178 = arith.addf %174, %177 : vector<128x128xf32>
    %179 = arith.addf %160, %178 : vector<128x128xf32>
    %c1_102 = arith.constant 1 : index
    %c0_103 = arith.constant 0 : index
    %c0_104 = arith.constant 0 : index
    %180 = vector.load %arg13[%c1_102, %c0_103, %c0_104] : memref<2x1x128xf32, #tpu.memory_space<vmem>>, vector<1x1x128xf32>
    %181 = vector.shape_cast %180 : vector<1x1x128xf32> to vector<1x128xf32>
    %c1_105 = arith.constant 1 : index
    %c0_106 = arith.constant 0 : index
    %c0_107 = arith.constant 0 : index
    %182 = vector.load %arg14[%c1_105, %c0_106, %c0_107] : memref<2x1x128xf32, #tpu.memory_space<vmem>>, vector<1x1x128xf32>
    %183 = vector.shape_cast %182 : vector<1x1x128xf32> to vector<1x128xf32>
    %cst_108 = arith.constant dense<0.000000e+00> : vector<128xf32>
    %184 = vector.multi_reduction <add>, %179, %cst_108 [1] : vector<128x128xf32> to vector<128xf32>
    %185 = vector.shape_cast %184 : vector<128xf32> to vector<128x1xf32>
    %cst_109 = arith.constant 1.280000e+02 : f32
    %186 = vector.broadcast %cst_109 : f32 to vector<128x1xf32>
    %187 = arith.divf %185, %186 : vector<128x1xf32>
    %188 = vector.broadcast %187 : vector<128x1xf32> to vector<128x128xf32>
    %189 = arith.subf %179, %188 : vector<128x128xf32>
    %190 = arith.mulf %189, %189 : vector<128x128xf32>
    %cst_110 = arith.constant dense<0.000000e+00> : vector<128xf32>
    %191 = vector.multi_reduction <add>, %190, %cst_110 [1] : vector<128x128xf32> to vector<128xf32>
    %192 = vector.shape_cast %191 : vector<128xf32> to vector<128x1xf32>
    %cst_111 = arith.constant 1.280000e+02 : f32
    %193 = vector.broadcast %cst_111 : f32 to vector<128x1xf32>
    %194 = arith.divf %192, %193 : vector<128x1xf32>
    %195 = vector.broadcast %187 : vector<128x1xf32> to vector<128x128xf32>
    %196 = arith.subf %179, %195 : vector<128x128xf32>
    %cst_112 = arith.constant 9.99999974E-6 : f32
    %197 = vector.broadcast %cst_112 : f32 to vector<128x1xf32>
    %198 = arith.addf %194, %197 : vector<128x1xf32>
    %199 = math.rsqrt %198 : vector<128x1xf32>
    %200 = vector.broadcast %199 : vector<128x1xf32> to vector<128x128xf32>
    %201 = arith.mulf %196, %200 : vector<128x128xf32>
    %202 = vector.broadcast %181 : vector<1x128xf32> to vector<128x128xf32>
    %203 = arith.mulf %201, %202 : vector<128x128xf32>
    %204 = vector.broadcast %183 : vector<1x128xf32> to vector<128x128xf32>
    %205 = arith.addf %203, %204 : vector<128x128xf32>
    %206 = arith.mulf %205, %3 : vector<128x128xf32>
    %cst_113 = arith.constant 1.000000e+00 : f32
    %207 = vector.broadcast %cst_113 : f32 to vector<128x128xf32>
    %208 = arith.mulf %206, %207 : vector<128x128xf32>
    %209 = vector.shape_cast %1 : vector<128x1xf32> to vector<1x128x1xf32>
    %cst_114 = arith.constant dense<0.000000e+00> : vector<1xf32>
    %210 = vector.multi_reduction <add>, %209, %cst_114 [1, 2] : vector<1x128x1xf32> to vector<1xf32>
    %211 = vector.shape_cast %210 : vector<1xf32> to vector<1x1x1xf32>
    %212 = vector.extract %211[0, 0, 0] : f32 from vector<1x1x1xf32>
    %cst_115 = arith.constant 1.000000e+00 : f32
    %213 = arith.maximumf %212, %cst_115 : f32
    %cst_116 = arith.constant dense<0.000000e+00> : vector<128xf32>
    %214 = vector.multi_reduction <add>, %208, %cst_116 [0] : vector<128x128xf32> to vector<128xf32>
    %215 = vector.shape_cast %214 : vector<128xf32> to vector<1x128xf32>
    %216 = vector.broadcast %213 : f32 to vector<1x128xf32>
    %217 = arith.divf %215, %216 : vector<1x128xf32>
    %c0_117 = arith.constant 0 : index
    %c0_118 = arith.constant 0 : index
    %c0_119 = arith.constant 0 : index
    %218 = vector.load %arg15[%c0_117, %c0_118, %c0_119] : memref<1x1x128xf32, #tpu.memory_space<vmem>>, vector<1x1x128xf32>
    %219 = vector.shape_cast %218 : vector<1x1x128xf32> to vector<1x128xf32>
    %220 = vector.shape_cast %217 : vector<1x128xf32> to vector<1x1x128xf32>
    tpu.vector_store %arg15[%c0_117, %c0_118, %c0_119], %220 {strides = array<i32>} : memref<1x1x128xf32, #tpu.memory_space<vmem>>, vector<1x1x128xf32>,
    return
  }
  func.func @transform_0(%arg0: i32) -> (i32, i32, i32) {
    %c0_i32 = arith.constant 0 : i32
    %c0_i32_0 = arith.constant 0 : i32
    %c0_i32_1 = arith.constant 0 : i32
    return %arg0, %c0_i32, %c0_i32_0 : i32, i32, i32
  }
  func.func @transform_1(%arg0: i32) -> (i32, i32, i32) {
    %c0_i32 = arith.constant 0 : i32
    %c0_i32_0 = arith.constant 0 : i32
    %c0_i32_1 = arith.constant 0 : i32
    return %arg0, %c0_i32, %c0_i32_0 : i32, i32, i32
  }
  func.func @transform_2(%arg0: i32) -> (i32, i32, i32) {
    %c0_i32 = arith.constant 0 : i32
    %c0_i32_0 = arith.constant 0 : i32
    %c0_i32_1 = arith.constant 0 : i32
    %c0_i32_2 = arith.constant 0 : i32
    return %c0_i32, %c0_i32_0, %c0_i32_1 : i32, i32, i32
  }
  func.func @transform_3(%arg0: i32) -> (i32, i32, i32) {
    %c0_i32 = arith.constant 0 : i32
    %c0_i32_0 = arith.constant 0 : i32
    %c0_i32_1 = arith.constant 0 : i32
    %c0_i32_2 = arith.constant 0 : i32
    return %c0_i32, %c0_i32_0, %c0_i32_1 : i32, i32, i32
  }
  func.func @transform_4(%arg0: i32) -> (i32, i32, i32) {
    %c0_i32 = arith.constant 0 : i32
    %c0_i32_0 = arith.constant 0 : i32
    %c0_i32_1 = arith.constant 0 : i32
    %c0_i32_2 = arith.constant 0 : i32
    return %c0_i32, %c0_i32_0, %c0_i32_1 : i32, i32, i32
  }
  func.func @transform_5(%arg0: i32) -> (i32, i32, i32) {
    %c0_i32 = arith.constant 0 : i32
    %c0_i32_0 = arith.constant 0 : i32
    %c0_i32_1 = arith.constant 0 : i32
    %c0_i32_2 = arith.constant 0 : i32
    return %c0_i32, %c0_i32_0, %c0_i32_1 : i32, i32, i32
  }
  func.func @transform_6(%arg0: i32) -> (i32, i32, i32) {
    %c0_i32 = arith.constant 0 : i32
    %c0_i32_0 = arith.constant 0 : i32
    %c0_i32_1 = arith.constant 0 : i32
    %c0_i32_2 = arith.constant 0 : i32
    return %c0_i32, %c0_i32_0, %c0_i32_1 : i32, i32, i32
  }
  func.func @transform_7(%arg0: i32) -> (i32, i32, i32) {
    %c0_i32 = arith.constant 0 : i32
    %c0_i32_0 = arith.constant 0 : i32
    %c0_i32_1 = arith.constant 0 : i32
    %c0_i32_2 = arith.constant 0 : i32
    return %c0_i32, %c0_i32_0, %c0_i32_1 : i32, i32, i32
  }
  func.func @transform_8(%arg0: i32) -> (i32, i32, i32) {
    %c0_i32 = arith.constant 0 : i32
    %c0_i32_0 = arith.constant 0 : i32
    %c0_i32_1 = arith.constant 0 : i32
    %c0_i32_2 = arith.constant 0 : i32
    return %c0_i32, %c0_i32_0, %c0_i32_1 : i32, i32, i32
  }
  func.func @transform_9(%arg0: i32) -> (i32, i32, i32) {
    %c0_i32 = arith.constant 0 : i32
    %c0_i32_0 = arith.constant 0 : i32
    %c0_i32_1 = arith.constant 0 : i32
    %c0_i32_2 = arith.constant 0 : i32
    return %c0_i32, %c0_i32_0, %c0_i32_1 : i32, i32, i32
  }
  func.func @transform_10(%arg0: i32) -> (i32, i32, i32) {
    %c0_i32 = arith.constant 0 : i32
    %c0_i32_0 = arith.constant 0 : i32
    %c0_i32_1 = arith.constant 0 : i32
    %c0_i32_2 = arith.constant 0 : i32
    return %c0_i32, %c0_i32_0, %c0_i32_1 : i32, i32, i32
  }
  func.func @transform_11(%arg0: i32) -> (i32, i32, i32) {
    %c0_i32 = arith.constant 0 : i32
    %c0_i32_0 = arith.constant 0 : i32
    %c0_i32_1 = arith.constant 0 : i32
    %c0_i32_2 = arith.constant 0 : i32
    return %c0_i32, %c0_i32_0, %c0_i32_1 : i32, i32, i32
  }
  func.func @transform_12(%arg0: i32) -> (i32, i32, i32) {
    %c0_i32 = arith.constant 0 : i32
    %c0_i32_0 = arith.constant 0 : i32
    %c0_i32_1 = arith.constant 0 : i32
    %c0_i32_2 = arith.constant 0 : i32
    return %c0_i32, %c0_i32_0, %c0_i32_1 : i32, i32, i32
  }
  func.func @transform_13(%arg0: i32) -> (i32, i32, i32) {
    %c0_i32 = arith.constant 0 : i32
    %c0_i32_0 = arith.constant 0 : i32
    %c0_i32_1 = arith.constant 0 : i32
    %c0_i32_2 = arith.constant 0 : i32
    return %c0_i32, %c0_i32_0, %c0_i32_1 : i32, i32, i32
  }
  func.func @transform_14(%arg0: i32) -> (i32, i32, i32) {
    %c0_i32 = arith.constant 0 : i32
    %c0_i32_0 = arith.constant 0 : i32
    %c0_i32_1 = arith.constant 0 : i32
    return %arg0, %c0_i32, %c0_i32_0 : i32, i32, i32
  }
}

</mosaic_0001>

<bundles_post_ra>
// kernel: tpu_custom_call.1
= control target key start
LH: loop header
LB: loop body
LE: loop exit
PB: predicated region body
PF: predicated region fallthrough
CT: control target
= control target key end

     0   :  { %s6962_s0 = inlined_call_operand.vmem [shape: f32[2,128,128], index: 0, kind: input, shape index: {}]   ;;  %s6963_s1 = inlined_call_operand.vmem [shape: f32[2,128,1], index: 1, kind: input, shape index: {}]   ;;  %s6964_s2 = inlined_call_operand.hbm [shape: bf16[2,128,128], index: 2, kind: input, shape index: {}]   ;;  %s6965_s3 = inlined_call_operand.hbm [shape: f32[2,128,128], index: 3, kind: input, shape index: {}]   ;;  %s6966_s4 = inlined_call_operand.hbm [shape: bf16[2,128,128], index: 4, kind: input, shape index: {}]   ;;  %s6967_s5 = inlined_call_operand.hbm [shape: f32[2,128,128], index: 5, kind: input, shape index: {}]   ;;  %s6968_s6 = inlined_call_operand.vmem [shape: f32[2,1,128], index: 6, kind: input, shape index: {}]   ;;  %s6969_s7 = inlined_call_operand.vmem [shape: f32[2,1,128], index: 7, kind: input, shape index: {}]   ;;  %s6970_s8 = inlined_call_operand.hbm [shape: bf16[2,128,256], index: 8, kind: input, shape index: {}]   ;;  %s6971_s9 = inlined_call_operand.vmem [shape: f32[2,1,256], index: 9, kind: input, shape index: {}]   ;;  %s6972_s10 = inlined_call_operand.hbm [shape: bf16[2,256,128], index: 10, kind: input, shape index: {}]   ;;  %s6973_s11 = inlined_call_operand.vmem [shape: f32[2,1,128], index: 11, kind: input, shape index: {}]   ;;  %s6974_s12 = inlined_call_operand.vmem [shape: f32[2,1,128], index: 12, kind: input, shape index: {}]   ;;  %s6975_s13 = inlined_call_operand.vmem [shape: f32[2,1,128], index: 13, kind: input, shape index: {}]   ;;  %s6976_s14 = inlined_call_operand.hbm [shape: f32[2,1,128], index: 14, kind: output, shape index: {}]  }
   0x1   :  { %7017 = sst [smem:[#allocation39_spill]] %s6965_s3 }
   0x2   :  { %7018 = sst [smem:[#allocation40_spill]] %s6967_s5 }
   0x3   :  { %7019 = sst [smem:[#allocation41_spill]] %s6975_s13 }
   0x4   :  { %7020 = sst [smem:[#allocation42_spill]] %s6976_s14 }
   0x5   :  { %19 = vsyncpa [#allocation3], 0 }
   0x6   :  { %20 = vsyncpa [#allocation6], 0 }
   0x7   :  { %21 = vsyncpa [#allocation9], 0 }
   0x8   :  { %22 = vsyncpa [#allocation12], 0 }
   0x9   :  { %23 = vsyncpa [#allocation4], 0 }
   0xa   :  { %25 = vsyncpa [#allocation4 + $0x1], 0  ;;  %s5162_s29 = smov 0   ;;  %s5164_s30 = smov 0  }
   0xb   :  { %s5166_s15 = smov 0   ;;  %s5168_s16 = smov 0  }
   0xc LB: > { %7021 = sst [smem:[#allocation19_spill]] %s5060_s29  ;;  %s5183_s17 = sadd.s32 4294967295, %s5072_s16   ;;  %s5072_s16 = sphi %s5168_s16, %s7093_s16   ;;  %s5068_s15 = sphi %s5166_s15, %s7096_s15   ;;  %s5064_s30 = sphi %s5164_s30, %s7095_s30   ;;  %s5060_s29 = sphi %s5162_s29, %s7094_s29  }
   0xd   : > { %7022 = sst [smem:[#allocation20_spill]] %s5064_s30  ;;  %s3952_s18 = sadd.s32 4294967294, %s5072_s16  }
   0xe   : > { %7023 = sst [smem:[#allocation21_spill]] %s5068_s15  ;;  %s5187_s19 = sadd.s32 1, %s5072_s16  }
   0xf   : > { %7024 = sst [smem:[#allocation22_spill]] %s5072_s16  ;;  %s342_s20 = sadd.s32 1, %s5068_s15 }
  0x10   : > { %7025 = sst [smem:[#allocation23_spill]] %s5187_s19  ;;  %s339_s21 = ssub.s32 %s5072_s16, %s5187_s19 }
  0x11   : > { %p352_p0 = scmp.ne.s32.totalorder %s5068_s15, %s5064_s30  ;;  %p340_p1 = scmp.eq.s32.totalorder %s339_s21, 0 }
  0x12   : > { %p353_p2 = scmp.eq.s32.totalorder %s5183_s17, 1  ;;  %p358_p3 = scmp.ne.s32.totalorder %s5064_s30, %s5060_s29 }
  0x13   : > { %p359_p4 = scmp.eq.s32.totalorder %s3952_s18, 1  ;;  %p3953_p7 = scmp.ge.s32.totalorder %s5072_s16, 1 }
  0x14   : > { %s5198_s22 = scalar_select %p340_p1, %s5068_s15, %s342_s20  }
  0x15   : > { %p5200_p5 = por %p353_p2, %p352_p0  ;;  %p5204_p6 = por %p359_p4, %p358_p3 }
  0x16   : > { %7026 = sst [smem:[#allocation24_spill]] %s5198_s22  ;;  %p366_p8 = scmp.lt.s32.totalorder %s5072_s16, 3 }
  0x17   : > { %s7027_s23 = scalar_select %p5200_p5, 1, 0 }
  0x18   : > { %s7029_s24 = scalar_select %p5204_p6, 1, 0 }
  0x19   : > { %7028 = sst [smem:[#allocation25_spill]] %s7027_s23  ;;  %p6983_p9 = scmp.eq.s32.totalorder %s5183_s17, 0 }
  0x1a   : > { %7030 = sst [smem:[#allocation26_spill]] %s7029_s24  ;;  %p5211_p10 = pnand %p3953_p7, %p366_p8 }
  0x1b   : > { %s5074_s26 = smov [#allocation5]   ;;  %s5075_s18 = smov [#allocation8]  }
  0x1c   : > { %s7031_s25 = scalar_select %p5211_p10, 1, 0 }
  0x1d   : > { %s391_s27 = sshll.u32 %s5074_s26, 4  ;;  %p4437_p11 = pneg %p5211_p10  ;;  %s5217_s27 = int_to_ptr.vmem [resolvable:$true] %s391_s27 }
  0x1e   : > { %s417_s20 = sshll.u32 %s5075_s18, 4  ;;  %s5076_s21 = smov [#allocation2]   ;;  %s5225_s20 = int_to_ptr.vmem [resolvable:$true] %s417_s20 }
  0x1f   : > { %p5221_p12 = pnand %p6983_p9, %p4437_p11  ;;  %s5227_s22 = sshll.u32 %s5076_s21, 4  ;;  %s379_s22 = int_to_ptr.vmem [resolvable:$true] %s5227_s22 }
  0x20   : > { %s7033_s3 = sld [smem:[#allocation39_spill]] }
  0x21   : > { %p5237_p0 = pneg %p5221_p12 }
  0x26   : > { %s4826_s26 = scalar_lea.hbm %s7033_s3, 4096 }
  0x27   : > { %p4827_p13 = scmp.ne.s32.totalorder %s7033_s3, %s4826_s26  ;;  %p4833_p3 = scmp.lt.u32.totalorder %s4826_s26, %s7033_s3 }
  0x29   : > { %p4829_p1 = pnand %p5237_p0, %p4827_p13 }
  0x2b   : > { %p4830_p2 = pneg %p4829_p1 }
  0x2d   : > { %p4835_p4 = pnand %p4833_p3, %p4830_p2 }
  0x2f   : > { %4838 = shalt.err (!%p4835_p4)
}
  0x30   : > { %s4839_s29 = scalar_lea.vmem %s5217_s27, 4096  ;;  %p4847_p9 = scmp.lt.s32.totalorder %s5217_s27, %s5217_s27 }
  0x31   : > { %p4840_p7 = scmp.ne.s32.totalorder %s5217_s27, %s4839_s29  ;;  %p4848_p6 = scmp.lt.s32.totalorder %s4839_s29, %s4839_s29 }
  0x33   : > { %p4842_p8 = pnand %p4840_p7, %p5237_p0  ;;  %p4849_p13 = por %p4848_p6, %p4847_p9 }
  0x35   : > { %p4843_p11 = pneg %p4842_p8 }
  0x37   : > { %p4850_p1 = pnand %p4849_p13, %p4843_p11 }
  0x39   : > { %4853 = shalt.err (!%p4850_p1)
}
  0x3a   : > { %s6991_s15 = smov 128   ;;  %s6992_s19 = smov 8  }
  0x3b   : > { %4443 = dma.hbm_to_vmem [thread:$0]  (!%p5221_p12), %s7033_s3, 4096, %s5217_s27, [#allocation6], %s6991_s15, %s6991_s15, %s6992_s19  }
  0x3c   : > { %s7035_s5 = sld [smem:[#allocation40_spill]] }
  0x42   : > { %s4854_s29 = scalar_lea.hbm %s7035_s5, 4096 }
  0x43   : > { %p4855_p6 = scmp.ne.s32.totalorder %s7035_s5, %s4854_s29  ;;  %p4861_p3 = scmp.lt.u32.totalorder %s4854_s29, %s7035_s5 }
  0x45   : > { %p4857_p9 = pnand %p4855_p6, %p5237_p0 }
  0x47   : > { %p4858_p2 = pneg %p4857_p9 }
  0x49   : > { %p4863_p4 = pnand %p4861_p3, %p4858_p2 }
  0x4b   : > { %4866 = shalt.err (!%p4863_p4)
}
  0x4c   : > { %s4867_s27 = scalar_lea.vmem %s5225_s20, 4096  ;;  %p4875_p13 = scmp.lt.s32.totalorder %s5225_s20, %s5225_s20 }
  0x4d   : > { %p4868_p7 = scmp.ne.s32.totalorder %s5225_s20, %s4867_s27  ;;  %p4876_p1 = scmp.lt.s32.totalorder %s4867_s27, %s4867_s27 }
  0x4f   : > { %p4870_p8 = pnand %p4868_p7, %p5237_p0  ;;  %p4877_p6 = por %p4876_p1, %p4875_p13 }
  0x51   : > { %p4871_p11 = pneg %p4870_p8 }
  0x53   : > { %p4878_p9 = pnand %p4877_p6, %p4871_p11 }
  0x55   : > { %4881 = shalt.err (!%p4878_p9)
}
  0x56   : > { %4449 = dma.hbm_to_vmem [thread:$0]  (!%p5221_p12), %s7035_s5, 4096, %s5225_s20, [#allocation9], %s6991_s15, %s6991_s15, %s6992_s19  }
  0x57   : > { %s4882_s24 = scalar_lea.hbm %s6964_s2, 2048 }
  0x58   : > { %p4883_p2 = scmp.ne.s32.totalorder %s6964_s2, %s4882_s24  ;;  %p4889_p7 = scmp.lt.u32.totalorder %s4882_s24, %s6964_s2 }
  0x5a   : > { %p4885_p3 = pnand %p4883_p2, %p5237_p0 }
  0x5c   : > { %p4886_p4 = pneg %p4885_p3 }
  0x5e   : > { %p4891_p8 = pnand %p4889_p7, %p4886_p4 }
  0x60   : > { %4894 = shalt.err (!%p4891_p8)
}
  0x61   : > { %s4895_s27 = scalar_lea.vmem %s379_s22, 2048  ;;  %p4903_p6 = scmp.lt.s32.totalorder %s379_s22, %s379_s22 }
  0x62   : > { %p4896_p11 = scmp.ne.s32.totalorder %s379_s22, %s4895_s27  ;;  %p4904_p9 = scmp.lt.s32.totalorder %s4895_s27, %s4895_s27 }
  0x64   : > { %p4898_p13 = pnand %p4896_p11, %p5237_p0  ;;  %p4905_p5 = por %p4904_p9, %p4903_p6 }
  0x66   : > { %p4899_p1 = pneg %p4898_p13 }
  0x68   : > { %p4906_p10 = pnand %p4905_p5, %p4899_p1 }
  0x6a   : > { %4909 = shalt.err (!%p4906_p10)
}
  0x6b   : > { %s5079_s20 = smov 64   ;;  %s5080_s13 = smov 4  }
  0x6c   : > { %4440 = dma.hbm_to_vmem [thread:$0]  (!%p5221_p12), %s6964_s2, 2048, %s379_s22, [#allocation3], %s5079_s20, %s5079_s20, %s5080_s13  }
  0x6d   : > { %s5081_s23 = smov [#allocation7]   ;;  %s5082_s26 = smov [#allocation10]  }
  0x6e   : > { %s404_s24 = sshll.u32 %s5081_s23, 4  ;;  %s436_s18 = sshll.u32 %s5082_s26, 4  ;;  %s405_s24 = int_to_ptr.vmem [resolvable:$true] %s404_s24  ;;  %s437_s18 = int_to_ptr.vmem [resolvable:$true] %s436_s18 }
  0x6f   : > { %s4910_s27 = scalar_lea.hbm %s6966_s4, 2048 }
  0x70   : > { %p4911_p5 = scmp.ne.s32.totalorder %s6966_s4, %s4910_s27  ;;  %p4917_p3 = scmp.lt.u32.totalorder %s4910_s27, %s6966_s4 }
  0x72   : > { %p4913_p10 = pnand %p4911_p5, %p5237_p0 }
  0x74   : > { %p4914_p2 = pneg %p4913_p10 }
  0x76   : > { %p4919_p4 = pnand %p4917_p3, %p4914_p2 }
  0x78   : > { %4922 = shalt.err (!%p4919_p4)
}
  0x79   : > { %s4923_s22 = scalar_lea.vmem %s405_s24, 2048  ;;  %p4931_p13 = scmp.lt.s32.totalorder %s405_s24, %s405_s24 }
  0x7a   : > { %p4924_p7 = scmp.ne.s32.totalorder %s405_s24, %s4923_s22  ;;  %p4932_p1 = scmp.lt.s32.totalorder %s4923_s22, %s4923_s22 }
  0x7c   : > { %p4926_p8 = pnand %p4924_p7, %p5237_p0  ;;  %p4933_p6 = por %p4932_p1, %p4931_p13 }
  0x7e   : > { %p4927_p11 = pneg %p4926_p8 }
  0x80   : > { %p4934_p9 = pnand %p4933_p6, %p4927_p11 }
  0x82   : > { %4937 = shalt.err (!%p4934_p9)
}
  0x83   : > { %4446 = dma.hbm_to_vmem [thread:$0]  (!%p5221_p12), %s6966_s4, 2048, %s405_s24, [#allocation6], %s5079_s20, %s5079_s20, %s5080_s13  }
  0x84   : > { %s4938_s14 = scalar_lea.hbm %s6970_s8, 4096 }
  0x85   : > { %p4939_p5 = scmp.ne.s32.totalorder %s6970_s8, %s4938_s14  ;;  %p4945_p3 = scmp.lt.u32.totalorder %s4938_s14, %s6970_s8 }
  0x87   : > { %p4941_p10 = pnand %p4939_p5, %p5237_p0 }
  0x89   : > { %p4942_p2 = pneg %p4941_p10 }
  0x8b   : > { %p4947_p4 = pnand %p4945_p3, %p4942_p2 }
  0x8d   : > { %4950 = shalt.err (!%p4947_p4)
}
  0x8e   : > { %s4951_s29 = scalar_lea.vmem %s437_s18, 4096  ;;  %p4959_p13 = scmp.lt.s32.totalorder %s437_s18, %s437_s18 }
  0x8f   : > { %p4952_p7 = scmp.ne.s32.totalorder %s437_s18, %s4951_s29  ;;  %p4960_p1 = scmp.lt.s32.totalorder %s4951_s29, %s4951_s29 }
  0x91   : > { %p4954_p8 = pnand %p4952_p7, %p5237_p0  ;;  %p4961_p6 = por %p4960_p1, %p4959_p13 }
  0x93   : > { %p4955_p11 = pneg %p4954_p8 }
  0x95   : > { %p4962_p9 = pnand %p4961_p6, %p4955_p11 }
  0x97   : > { %4965 = shalt.err (!%p4962_p9)
}
  0x98   : > { %s7036_s24 = smov 8   ;;  %s7037_s27 = smov 128  }
  0x99   : > { %4452 = dma.hbm_to_vmem [thread:$0]  (!%p5221_p12), %s6970_s8, 4096, %s437_s18, [#allocation9], %s7037_s27, %s7037_s27, %s7036_s24  }
  0x9a   : > { %s5083_s5 = smov [#allocation11]   ;;  %s4966_s30 = scalar_lea.hbm %s6972_s10, 4096 }
  0x9b   : > { %s452_s15 = sshll.u32 %s5083_s5, 4  ;;  %p4967_p5 = scmp.ne.s32.totalorder %s6972_s10, %s4966_s30  ;;  %s453_s15 = int_to_ptr.vmem [resolvable:$true] %s452_s15 }
  0x9c   : > { %p4973_p3 = scmp.lt.u32.totalorder %s4966_s30, %s6972_s10 }
  0x9d   : > { %p4969_p10 = pnand %p4967_p5, %p5237_p0 }
  0x9f   : > { %p4970_p2 = pneg %p4969_p10 }
  0xa1   : > { %p4975_p4 = pnand %p4973_p3, %p4970_p2 }
  0xa3   : > { %4978 = shalt.err (!%p4975_p4)
}
  0xa4   : > { %s4979_s18 = scalar_lea.vmem %s453_s15, 4096  ;;  %p4987_p13 = scmp.lt.s32.totalorder %s453_s15, %s453_s15 }
  0xa5   : > { %p4980_p7 = scmp.ne.s32.totalorder %s453_s15, %s4979_s18  ;;  %p4988_p1 = scmp.lt.s32.totalorder %s4979_s18, %s4979_s18 }
  0xa7   : > { %p4982_p8 = pnand %p4980_p7, %p5237_p0  ;;  %p4989_p6 = por %p4988_p1, %p4987_p13 }
  0xa9   : > { %p4983_p11 = pneg %p4982_p8 }
  0xab   : > { %p4990_p9 = pnand %p4989_p6, %p4983_p11 }
  0xad   : > { %4993 = shalt.err (!%p4990_p9)
}
  0xae   : > { %4455 = dma.hbm_to_vmem [thread:$0]  (!%p5221_p12), %s6972_s10, 4096, %s453_s15, [#allocation12], %s5079_s20, %s5079_s20, %s5080_s13  }
  0xaf   : > { %p7038_p5 = scmp.ne.s32.totalorder %s7031_s25, 0 }
  0xb1   : > { %493 = sbr.rel (%p7038_p5) target bundleno = 3659 (0xe4b), region = 76 }
  0xb8   : > { %p7039_p0 = scmp.eq.s32.totalorder %s5183_s17, 0 }
  0xba   : > { %5039 = dma.done.wait (%p7039_p0), [#allocation3], 2048   ;;  %p7040_p10 = pmov %p7039_p0 }
  0xbb   : > { %p7041_p2 = pmov %p7039_p0 }
  0xbc   : > { %5041 = vsyncadd (%p7040_p10), [#allocation3], 4294965248 }
  0xbd   : > { %5043 = dma.done.wait (%p7041_p2), [#allocation6], 6144   ;;  %p7042_p3 = pmov %p7039_p0 }
  0xbe   : > { %p7043_p4 = pmov %p7039_p0 }
  0xbf   : > { %5045 = vsyncadd (%p7042_p3), [#allocation6], 4294961152 }
  0xc0   : > { %5047 = dma.done.wait (%p7043_p4), [#allocation9], 8192   ;;  %p7044_p12 = pmov %p7039_p0 }
  0xc1   : > { %p7045_p7 = pmov %p7039_p0 }
  0xc2   : > { %5049 = vsyncadd (%p7044_p12), [#allocation9], 4294959104 }
  0xc3   : > { %5051 = dma.done.wait (%p7045_p7), [#allocation12], 4096   ;;  %p7046_p8 = pmov %p7039_p0 }
  0xc4   : > { %p563_p11 = scmp.lt.s32.totalorder %s5183_s17, 1  ;;  %v6993_v0 = vmov 0   ;;  %vm3745_vm0 = vcmask 7168   ;;  %v4519_v46 = vld [vmem:[#allocation2] sm:$0xff]   ;;  %s7082_s21 = sld [smem:[#allocation20_spill]] }
  0xc5   : > { %5053 = vsyncadd (%p7046_p8), [#allocation12], 4294963200  ;;  %4518 = vset.pattern.permute.xlu1 %v6993_v0  ;;  %4517 = vset.pattern.permute.xlu0 %v6993_v0  ;;  %s5085_s18 = smov 1.0   ;;  %s4084_s28 = sshll.u32 %s5183_s17, 4 }
  0xc6   : > { %s5394_s16 = scalar_select %p563_p11, %s5183_s17, 1  ;;  %4297 = vmatprep.mubr.bf16.mxu0 %v4519_v46  ;;  %v4525_v46 = vld [vmem:[#allocation2 + $0x30] sm:$0xff]  }
  0xc7   : > { %s7086_s15 = sld [smem:[#allocation42_spill]]  ;;  %s5086_s17 = smov [#allocation13]  }
  0xc8   : > { %s4087_s25 = sshll.u32 %s5394_s16, 7  ;;  %s7085_s16 = sld [smem:[#allocation25_spill]] }
  0xc9   : > { %s5402_s13 = scalar_lea.vmem %s6963_s1, %s4087_s25  ;;  %s5442_s5 = scalar_lea.vmem %s6962_s0, %s4087_s25 }
  0xca   : > { %v576_v1 = vld [vmem:[%s5402_s13 + $0x10] sm:$0xff]  ;;  %v574_v2 = vld [vmem:[%s5402_s13] sm:$0xff]  ;;  %v575_v4 = vld [vmem:[%s5402_s13 + $0x8] sm:$0xff]  ;;  %s7060_s25 = sld [smem:[#allocation41_spill]]  ;;  %s561_s27 = sand.u32 1, %s7082_s21  }
  0xcb   : > { %602 = vperm.xlu1 %4518, %v576_v1   ;;  %592 = vperm.xlu0 %4517, %v574_v2   ;;  %v3746_v3 = vsel %vm3745_vm0, %v574_v2, 0.0  ;;  %v3749_v5 = vsel %vm3745_vm0, %v576_v1, 0.0  ;;  %v577_v6 = vld [vmem:[%s5402_s13 + $0x18] sm:$0xff]  ;;  %v3747_v7 = vsel %vm3745_vm0, %v575_v4, 0.0  ;;  %v579_v11 = vld [vmem:[%s5402_s13 + $0x28] sm:$0xff]  ;;  %v578_v12 = vld [vmem:[%s5402_s13 + $0x20] sm:$0xff] }
  0xcc   : > { %v3748_v8 = vadd.f32 %v3747_v7, %v3746_v3  ;;  %v3751_v9 = vsel %vm3745_vm0, %v577_v6, 0.0  ;;  %v3755_v13 = vsel %vm3745_vm0, %v579_v11, 0.0  ;;  %v3753_v14 = vsel %vm3745_vm0, %v578_v12, 0.0  ;;  %v580_v15 = vld [vmem:[%s5402_s13 + $0x30] sm:$0xff]  ;;  %v581_v17 = vld [vmem:[%s5402_s13 + $0x38] sm:$0xff]  ;;  %v582_v21 = vld [vmem:[%s5402_s13 + $0x40] sm:$0xff] }
  0xcd   : > { %v3757_v18 = vsel %vm3745_vm0, %v580_v15, 0.0  ;;  %v3759_v22 = vsel %vm3745_vm0, %v581_v17, 0.0  ;;  %v583_v23 = vld [vmem:[%s5402_s13 + $0x48] sm:$0xff]  ;;  %v3761_v24 = vsel %vm3745_vm0, %v582_v21, 0.0  ;;  %v584_v28 = vld [vmem:[%s5402_s13 + $0x50] sm:$0xff]  ;;  %v585_v29 = vld [vmem:[%s5402_s13 + $0x58] sm:$0xff]  ;;  %s7087_s19 = smov %s7086_s15  ;;  %s6920_s14 = scalar_lea.hbm %s7086_s15, %s4084_s28 }
  0xce   : > { %v3750_v10 = vadd.f32 %v3749_v5, %v3748_v8  ;;  %v3763_v26 = vsel %vm3745_vm0, %v583_v23, 0.0  ;;  %v3765_v30 = vsel %vm3745_vm0, %v584_v28, 0.0  ;;  %v3767_v33 = vsel %vm3745_vm0, %v585_v29, 0.0  ;;  %v587_v34 = vld [vmem:[%s5402_s13 + $0x68] sm:$0xff]  ;;  %v586_v35 = vld [vmem:[%s5402_s13 + $0x60] sm:$0xff]  ;;  %v589_v40 = vld [vmem:[%s5402_s13 + $0x78] sm:$0xff] }
  0xcf   : > { %607 = vperm.xlu1 %4518, %v577_v6   ;;  %597 = vperm.xlu0 %4517, %v575_v4   ;;  %v3769_v37 = vsel %vm3745_vm0, %v586_v35, 0.0  ;;  %v3771_v39 = vsel %vm3745_vm0, %v587_v34, 0.0  ;;  %v588_v41 = vld [vmem:[%s5402_s13 + $0x70] sm:$0xff]  ;;  %v673_v50 = vld [vmem:[%s5442_s5 + $0x18] sm:$0xff]  ;;  %v670_v51 = vld [vmem:[%s5442_s5] sm:$0xff]  ;;  %s562_s20 = scalar_lea.vmem [#allocation13], %s561_s27 }
  0xd0   : > { %v3752_v16 = vadd.f32 %v3751_v9, %v3750_v10  ;;  %v3773_v43 = vsel %vm3745_vm0, %v588_v41, 0.0  ;;  %v672_v49 = vld [vmem:[%s5442_s5 + $0x10] sm:$0xff]  ;;  %v671_v52 = vld [vmem:[%s5442_s5 + $0x8] sm:$0xff]  ;;  %v674_v60 = vld [vmem:[%s5442_s5 + $0x20] sm:$0xff]  ;;  %s3825_s22 = sshll.u32 %s562_s20, 4  ;;  %p7088_p1 = scmp.ne.s32.totalorder %s7085_s16, 0  ;;  %s6922_s22 = int_to_ptr.vmem [resolvable:$true] %s3825_s22 }
  0xd1   : > { %v675_v59 = vld [vmem:[%s5442_s5 + $0x28] sm:$0xff]  ;;  %v677_v4 = vld [vmem:[%s5442_s5 + $0x38] sm:$0xff]  ;;  %v676_v5 = vld [vmem:[%s5442_s5 + $0x30] sm:$0xff]  ;;  %s4994_s30 = scalar_lea.vmem %s6922_s22, 16  ;;  %s4998_s23 = sshll.u32 %s5086_s17, 4  ;;  %s4999_s23 = int_to_ptr.vmem [resolvable:$false] %s4998_s23 }
  0xd2   : > { %v3754_v19 = vadd.f32 %v3753_v14, %v3752_v16  ;;  %p4995_p13 = scmp.ne.s32.totalorder %s6922_s22, %s4994_s30  ;;  %s5000_s26 = scalar_lea.vmem %s4999_s23, 32 }
  0xd3   : > { %617 = vperm.xlu1 %4518, %v579_v11   ;;  %612 = vperm.xlu0 %4517, %v578_v12   ;;  %v679_v11 = vld [vmem:[%s5442_s5 + $0x48] sm:$0xff]  ;;  %v678_v12 = vld [vmem:[%s5442_s5 + $0x40] sm:$0xff]  ;;  %p5001_p5 = scmp.lt.s32.totalorder %s6922_s22, %s4999_s23  ;;  %p5002_p0 = scmp.lt.s32.totalorder %s5000_s26, %s4994_s30 }
  0xd4   : > { %v3756_v20 = vadd.f32 %v3755_v13, %v3754_v19  ;;  %v680_v19 = vld [vmem:[%s5442_s5 + $0x50] sm:$0xff]  ;;  %p4996_p6 = pnand %p4995_p13, %p7088_p1 }
  0xd5   : > { %p5003_p10 = por %p5002_p0, %p5001_p5 }
  0xd6   : > { %v3758_v25 = vadd.f32 %v3757_v18, %v3756_v20  ;;  %v681_v18 = vld [vmem:[%s5442_s5 + $0x58] sm:$0xff]  ;;  %p4997_p9 = pneg %p4996_p6 }
  0xd7   : > { %627 = vperm.xlu1 %4518, %v581_v17   ;;  %622 = vperm.xlu0 %4517, %v580_v15  }
  0xd8   : > { %v3760_v27 = vadd.f32 %v3759_v22, %v3758_v25  ;;  %v683_v25 = vld [vmem:[%s5442_s5 + $0x68] sm:$0xff]  ;;  %p5004_p2 = pnand %p5003_p10, %p4997_p9 }
  0xda   : > { %v3762_v31 = vadd.f32 %v3761_v24, %v3760_v27 }
  0xdb   : > { %637 = vperm.xlu1 %4518, %v583_v23   ;;  %632 = vperm.xlu0 %4517, %v582_v21  }
  0xdc   : > { %v3764_v32 = vadd.f32 %v3763_v26, %v3762_v31  ;;  %v682_v26 = vld [vmem:[%s5442_s5 + $0x60] sm:$0xff] }
  0xde   : > { %v3766_v36 = vadd.f32 %v3765_v30, %v3764_v32  ;;  %v685_v32 = vld [vmem:[%s5442_s5 + $0x78] sm:$0xff] }
  0xdf   : > { %647 = vperm.xlu1 %4518, %v585_v29   ;;  %642 = vperm.xlu0 %4517, %v584_v28  }
  0xe0   : > { %v3768_v38 = vadd.f32 %v3767_v33, %v3766_v36  ;;  %v684_v33 = vld [vmem:[%s5442_s5 + $0x70] sm:$0xff] }
  0xe2   : > { %v3770_v42 = vadd.f32 %v3769_v37, %v3768_v38 }
  0xe3   : > { %657 = vperm.xlu1 %4518, %v587_v34   ;;  %652 = vperm.xlu0 %4517, %v586_v35  }
  0xe4   : > { %v3772_v44 = vadd.f32 %v3771_v39, %v3770_v42  ;;  %v4522_v42 = vld [vmem:[#allocation2 + $0x18] sm:$0xff]  }
  0xe6   : > { %v5435_v45 = vadd.f32 %v3773_v43, %v3772_v44  ;;  %v4523_v43 = vld [vmem:[#allocation2 + $0x20] sm:$0xff]   ;;  %v4524_v44 = vld [vmem:[#allocation2 + $0x28] sm:$0xff]  }
  0xe7   : > { %667 = vperm.xlu1 %4518, %v589_v40   ;;  %662 = vperm.xlu0 %4517, %v588_v41   ;;  %v4520_v40 = vld [vmem:[#allocation2 + $0x8] sm:$0xff]   ;;  %v4521_v41 = vld [vmem:[#allocation2 + $0x10] sm:$0xff]  }
  0xe8   : > { %7047 = vst [vmem:[#allocation27_spill] sm:$0xff] %v5435_v45 }
 0x14a   : > { %v5444_v47 = vpop.permute.xlu1 %602  ;;  %v5446_v48 = vpop.permute.xlu0 %592 }
 0x14b   : > { %v5457_v55 = vmul.f32 %v672_v49, %v5444_v47  ;;  %v5463_v57 = vmul.f32 %v670_v51, %v5446_v48  ;;  %v4526_v49 = vld [vmem:[#allocation2 + $0x38] sm:$0xff]   ;;  %v728_v51 = vld [vmem:[#allocation5 + $0x10] sm:$0xff] }
 0x14e   : > { %v5452_v53 = vpop.permute.xlu1 %607  ;;  %v5454_v54 = vpop.permute.xlu0 %597 }
 0x14f   : > { %v5460_v56 = vmul.f32 %v673_v50, %v5452_v53  ;;  %v5466_v58 = vmul.f32 %v671_v52, %v5454_v54  ;;  %v4527_v50 = vld [vmem:[#allocation7] sm:$0xff]  }
 0x150   : > { %4329 = vmatprep.mubr.bf16.mxu1 %v4527_v50  ;;  %v726_v52 = vld [vmem:[#allocation5] sm:$0xff] }
 0x151   : > { %v718_v61 = vpack.c.bf16 %v5466_v58, %v5463_v57  ;;  %v719_v3 = vpack.c.bf16 %v5460_v56, %v5457_v55 }
 0x152   : > { %v5472_v62 = vpop.permute.xlu1 %617  ;;  %v5474_v63 = vpop.permute.xlu0 %612 }
 0x153   : > { %7048 = vst [vmem:[#allocation28_spill] sm:$0xff] %v5472_v62  ;;  %v5477_v1 = vmul.f32 %v675_v59, %v5472_v62  ;;  %v5480_v2 = vmul.f32 %v674_v60, %v5474_v63  ;;  %4281 = vmatprep.subr.bf16.mxu0 %v718_v61  ;;  %v729_v60 = vld [vmem:[#allocation5 + $0x18] sm:$0xff] }
 0x154   : > { %4282 = vmatpush3.bf16.msra.mxu0 %v718_v61 }
 0x155   : > { %4283 = vmatprep.subr.bf16.mxu0 %v719_v3  ;;  %v720_v10 = vpack.c.bf16 %v5477_v1, %v5480_v2 }
 0x156   : > { %v5486_v6 = vpop.permute.xlu1 %627  ;;  %v5488_v7 = vpop.permute.xlu0 %622 }
 0x157   : > { %7049 = vst [vmem:[#allocation29_spill] sm:$0xff] %v5486_v6  ;;  %7050 = vst [vmem:[#allocation30_spill] sm:$0xff] %v5488_v7  ;;  %v5491_v8 = vmul.f32 %v677_v4, %v5486_v6  ;;  %v5494_v9 = vmul.f32 %v676_v5, %v5488_v7  ;;  %v727_v4 = vld [vmem:[#allocation5 + $0x8] sm:$0xff] }
 0x158   : > { %4284 = vmatpush3.bf16.msra.mxu0 %v719_v3 }
 0x159   : > { %4285 = vmatprep.subr.bf16.mxu0 %v720_v10  ;;  %v721_v17 = vpack.c.bf16 %v5491_v8, %v5494_v9 }
 0x15a   : > { %v5500_v13 = vpop.permute.xlu1 %637  ;;  %v5502_v14 = vpop.permute.xlu0 %632 }
 0x15b   : > { %7051 = vst [vmem:[#allocation31_spill] sm:$0xff] %v5500_v13  ;;  %7052 = vst [vmem:[#allocation32_spill] sm:$0xff] %v5502_v14  ;;  %v5505_v15 = vmul.f32 %v679_v11, %v5500_v13  ;;  %v5508_v16 = vmul.f32 %v678_v12, %v5502_v14 }
 0x15c   : > { %4286 = vmatpush3.bf16.msra.mxu0 %v720_v10 }
 0x15d   : > { %4287 = vmatprep.subr.bf16.mxu0 %v721_v17  ;;  %v722_v24 = vpack.c.bf16 %v5505_v15, %v5508_v16 }
 0x15e   : > { %v5514_v20 = vpop.permute.xlu1 %647  ;;  %v5516_v21 = vpop.permute.xlu0 %642 }
 0x15f   : > { %7053 = vst [vmem:[#allocation33_spill] sm:$0xff] %v5514_v20  ;;  %7054 = vst [vmem:[#allocation34_spill] sm:$0xff] %v5516_v21  ;;  %v5519_v22 = vmul.f32 %v681_v18, %v5514_v20  ;;  %v5522_v23 = vmul.f32 %v680_v19, %v5516_v21 }
 0x160   : > { %4288 = vmatpush3.bf16.msra.mxu0 %v721_v17 }
 0x161   : > { %4289 = vmatprep.subr.bf16.mxu0 %v722_v24  ;;  %v723_v31 = vpack.c.bf16 %v5519_v22, %v5522_v23 }
 0x162   : > { %v5528_v27 = vpop.permute.xlu1 %657  ;;  %v5530_v28 = vpop.permute.xlu0 %652 }
 0x163   : > { %7055 = vst [vmem:[#allocation35_spill] sm:$0xff] %v5528_v27  ;;  %7056 = vst [vmem:[#allocation36_spill] sm:$0xff] %v5530_v28  ;;  %v5533_v29 = vmul.f32 %v683_v25, %v5528_v27  ;;  %v5536_v30 = vmul.f32 %v682_v26, %v5530_v28 }
 0x164   : > { %4290 = vmatpush3.bf16.msra.mxu0 %v722_v24 }
 0x165   : > { %4291 = vmatprep.subr.bf16.mxu0 %v723_v31  ;;  %v724_v38 = vpack.c.bf16 %v5533_v29, %v5536_v30 }
 0x166   : > { %v5542_v34 = vpop.permute.xlu1 %667  ;;  %v5544_v35 = vpop.permute.xlu0 %662 }
 0x167   : > { %7057 = vst [vmem:[#allocation37_spill] sm:$0xff] %v5542_v34  ;;  %7058 = vst [vmem:[#allocation38_spill] sm:$0xff] %v5544_v35  ;;  %v5547_v36 = vmul.f32 %v685_v32, %v5542_v34  ;;  %v5550_v37 = vmul.f32 %v684_v33, %v5544_v35  ;;  %v732_v32 = vld [vmem:[#allocation5 + $0x30] sm:$0xff] }
 0x168   : > { %4292 = vmatpush3.bf16.msra.mxu0 %v723_v31 }
 0x169   : > { %4293 = vmatprep.subr.bf16.mxu0 %v724_v38  ;;  %v725_v39 = vpack.c.bf16 %v5547_v36, %v5550_v37 }
 0x16c   : > { %4294 = vmatpush3.bf16.msra.mxu0 %v724_v38 }
 0x16d   : > { %4295 = vmatprep.subr.bf16.mxu0 %v725_v39 }
 0x170   : > { %4296 = vmatpush3.bf16.msra.mxu0 %v725_v39  ;;  %v730_v39 = vld [vmem:[#allocation5 + $0x20] sm:$0xff] }
 0x173   : > { %4298 = vmatmul.mubr.bf16.vlgmr.msra.gmra.mrb[0].mxu0 %v4520_v40 }
 0x174   : > { %4301 = vmatprep.mubr.bf16.mxu0 %v4521_v41 }
 0x17b   : > { %4302 = vmatmul.mubr.bf16.gmra.mrb[4].mxu0 %v4522_v42 }
 0x17c   : > { %4305 = vmatprep.mubr.bf16.mxu0 %v4523_v43  ;;  %v733_v43 = vld [vmem:[#allocation5 + $0x38] sm:$0xff] }
 0x183   : > { %4306 = vmatmul.mubr.bf16.gmra.mrb[8].mxu0 %v4524_v44 }
 0x184   : > { %4309 = vmatprep.mubr.bf16.mxu0 %v4525_v46 }
 0x18b   : > { %4310 = vmatmul.mubr.bf16.gmra.mrb[12].mxu0 %v4526_v49 }
 0x18c   : > { %1603 = vmatprep.mubr.bf16.mxu0 %v6993_v0 }
 0x246   : > { %v4299_v59 = vpop.f32.mrb[0].mxu0 }
 0x247   : > { %v5557_v61 = vadd.f32 %v4299_v59, %v728_v51  ;;  %v824_v3 = vpop.f32.mrb[1].mxu0  ;;  %v731_v51 = vld [vmem:[#allocation5 + $0x28] sm:$0xff] }
 0x248   : > { %v5559_v5 = vadd.f32 %v824_v3, %v726_v52  ;;  %v4300_v10 = vpop.f32.mrb[2].mxu0 }
 0x249   : > { %v889_v11 = vmul.f32 %v5557_v61, %v5557_v61  ;;  %v5563_v12 = vadd.f32 %v4300_v10, %v729_v60  ;;  %v827_v17 = vpop.f32.mrb[3].mxu0 }
 0x24a   : > { %v887_v18 = vmul.f32 %v5559_v5, %v5559_v5  ;;  %v5567_v19 = vadd.f32 %v827_v17, %v727_v4 }
 0x24b   : > { %v905_v24 = vmul.f32 %v889_v11, %v5557_v61  ;;  %v890_v25 = vmul.f32 %v5563_v12, %v5563_v12 }
 0x24c   : > { %v903_v26 = vmul.f32 %v887_v18, %v5559_v5  ;;  %v888_v31 = vmul.f32 %v5567_v19, %v5567_v19 }
 0x24d   : > { %v921_v33 = vmul.f32 0.044715, %v905_v24  ;;  %v906_v38 = vmul.f32 %v890_v25, %v5563_v12 }
 0x24e   : > { %v919_v40 = vmul.f32 0.044715, %v903_v26  ;;  %v904_v41 = vmul.f32 %v888_v31, %v5567_v19  ;;  %v4303_v42 = vpop.f32.mrb[4].mxu0 }
 0x24f   : > { %v937_v44 = vadd.f32 %v921_v33, %v5557_v61  ;;  %v922_v46 = vmul.f32 0.044715, %v906_v38  ;;  %v5578_v49 = vadd.f32 %v4303_v42, %v732_v32  ;;  %v840_v50 = vpop.f32.mrb[5].mxu0  ;;  %v736_v42 = vld [vmem:[#allocation5 + $0x50] sm:$0xff] }
 0x250   : > { %v935_v52 = vadd.f32 %v919_v40, %v5559_v5  ;;  %v920_v59 = vmul.f32 0.044715, %v904_v41  ;;  %v5581_v60 = vadd.f32 %v840_v50, %v730_v39  ;;  %v4304_v3 = vpop.f32.mrb[6].mxu0 }
 0x251   : > { %v953_v4 = vmul.f32 0.7978846, %v937_v44  ;;  %v938_v10 = vadd.f32 %v922_v46, %v5563_v12  ;;  %v893_v11 = vmul.f32 %v5578_v49, %v5578_v49  ;;  %v5586_v17 = vadd.f32 %v4304_v3, %v733_v43  ;;  %v843_v18 = vpop.f32.mrb[7].mxu0  ;;  %v734_v46 = vld [vmem:[#allocation5 + $0x40] sm:$0xff] }
 0x252   : > { %v951_v24 = vmul.f32 0.7978846, %v935_v52  ;;  %v936_v25 = vadd.f32 %v920_v59, %v5567_v19  ;;  %v891_v26 = vmul.f32 %v5581_v60, %v5581_v60  ;;  %v5591_v31 = vadd.f32 %v843_v18, %v731_v51  ;;  %v737_v59 = vld [vmem:[#allocation5 + $0x58] sm:$0xff]  ;;  %v735_v18 = vld [vmem:[#allocation5 + $0x48] sm:$0xff] }
 0x253   : > { %4631 = vtanh.f32 %v953_v4  ;;  %v954_v32 = vmul.f32 0.7978846, %v938_v10  ;;  %v909_v33 = vmul.f32 %v893_v11, %v5578_v49  ;;  %v894_v38 = vmul.f32 %v5586_v17, %v5586_v17 }
 0x254   : > { %v952_v39 = vmul.f32 0.7978846, %v936_v25  ;;  %v907_v40 = vmul.f32 %v891_v26, %v5581_v60  ;;  %v892_v41 = vmul.f32 %v5591_v31, %v5591_v31  ;;  %4633 = vtanh.f32 %v951_v24 }
 0x255   : > { %4635 = vtanh.f32 %v954_v32  ;;  %v925_v43 = vmul.f32 0.044715, %v909_v33  ;;  %v910_v44 = vmul.f32 %v894_v38, %v5586_v17 }
 0x256   : > { %v923_v50 = vmul.f32 0.044715, %v907_v40  ;;  %v908_v51 = vmul.f32 %v892_v41, %v5591_v31  ;;  %v4307_v52 = vpop.f32.mrb[8].mxu0  ;;  %4637 = vtanh.f32 %v952_v39 }
 0x257   : > { %v941_v3 = vadd.f32 %v925_v43, %v5578_v49  ;;  %v926_v4 = vmul.f32 0.044715, %v910_v44  ;;  %v5602_v10 = vadd.f32 %v4307_v52, %v736_v42  ;;  %v856_v11 = vpop.f32.mrb[9].mxu0 }
 0x258   : > { %v939_v25 = vadd.f32 %v923_v50, %v5581_v60  ;;  %v924_v24 = vmul.f32 0.044715, %v908_v51  ;;  %v5605_v26 = vadd.f32 %v856_v11, %v734_v46  ;;  %v4308_v32 = vpop.f32.mrb[10].mxu0  ;;  %v740_v11 = vld [vmem:[#allocation5 + $0x70] sm:$0xff] }
 0x259   : > { %v957_v33 = vmul.f32 0.7978846, %v941_v3  ;;  %v942_v38 = vadd.f32 %v926_v4, %v5586_v17  ;;  %v897_v40 = vmul.f32 %v5602_v10, %v5602_v10  ;;  %v5610_v41 = vadd.f32 %v4308_v32, %v737_v59  ;;  %v859_v43 = vpop.f32.mrb[11].mxu0  ;;  %v738_v32 = vld [vmem:[#allocation5 + $0x60] sm:$0xff] }
 0x25a   : > { %v955_v42 = vmul.f32 0.7978846, %v939_v25  ;;  %v940_v44 = vadd.f32 %v924_v24, %v5591_v31  ;;  %v895_v50 = vmul.f32 %v5605_v26, %v5605_v26  ;;  %v5615_v51 = vadd.f32 %v859_v43, %v735_v18 }
 0x25b   : > { %4639 = vtanh.f32 %v957_v33  ;;  %v958_v46 = vmul.f32 0.7978846, %v942_v38  ;;  %v913_v39 = vmul.f32 %v897_v40, %v5602_v10  ;;  %v898_v52 = vmul.f32 %v5610_v41, %v5610_v41 }
 0x25c   : > { %4641 = vtanh.f32 %v955_v42  ;;  %v956_v3 = vmul.f32 0.7978846, %v940_v44  ;;  %v911_v59 = vmul.f32 %v895_v50, %v5605_v26  ;;  %v896_v4 = vmul.f32 %v5615_v51, %v5615_v51  ;;  %v741_v42 = vld [vmem:[#allocation5 + $0x78] sm:$0xff] }
 0x25d   : > { %v4632_v25 = vpop.eup %4631  ;;  %4643 = vtanh.f32 %v958_v46  ;;  %v929_v24 = vmul.f32 0.044715, %v913_v39  ;;  %v914_v18 = vmul.f32 %v898_v52, %v5610_v41  ;;  %v739_v46 = vld [vmem:[#allocation5 + $0x68] sm:$0xff] }
 0x25e   : > { %v4634_v33 = vpop.eup %4633  ;;  %4645 = vtanh.f32 %v956_v3  ;;  %v927_v38 = vmul.f32 0.044715, %v911_v59  ;;  %v912_v40 = vmul.f32 %v896_v4, %v5615_v51  ;;  %v4311_v43 = vpop.f32.mrb[12].mxu0  ;;  %v985_v44 = vadd.f32 1.0, %v4632_v25 }
 0x25f   : > { %v4636_v0 = vpop.eup %4635  ;;  %v945_v50 = vadd.f32 %v929_v24, %v5602_v10  ;;  %v930_v45 = vmul.f32 0.044715, %v914_v18  ;;  %v5626_v34 = vadd.f32 %v4311_v43, %v740_v11  ;;  %v872_v35 = vpop.f32.mrb[13].mxu0  ;;  %v983_v39 = vadd.f32 1.0, %v4634_v33 }
 0x260   : > { %v943_v52 = vadd.f32 %v927_v38, %v5605_v26  ;;  %v928_v27 = vmul.f32 0.044715, %v912_v40  ;;  %v5629_v28 = vadd.f32 %v872_v35, %v738_v32  ;;  %v4312_v3 = vpop.f32.mrb[14].mxu0  ;;  %v986_v59 = vadd.f32 1.0, %v4636_v0  ;;  %v4638_v18 = vpop.eup %4637 }
 0x261   : > { %v961_v4 = vmul.f32 0.7978846, %v945_v50  ;;  %v946_v20 = vadd.f32 %v930_v45, %v5610_v41  ;;  %v901_v25 = vmul.f32 %v5626_v34, %v5626_v34  ;;  %v5634_v24 = vadd.f32 %v4312_v3, %v741_v42  ;;  %v875_v11 = vpop.f32.mrb[15].mxu0 }
 0x262   : > { %v959_v43 = vmul.f32 0.7978846, %v943_v52  ;;  %v944_v33 = vadd.f32 %v928_v27, %v5615_v51  ;;  %v899_v38 = vmul.f32 %v5629_v28, %v5629_v28  ;;  %v5639_v35 = vadd.f32 %v875_v11, %v739_v46 }
 0x263   : > { %4647 = vtanh.f32 %v961_v4  ;;  %v962_v0 = vmul.f32 0.7978846, %v946_v20  ;;  %v917_v32 = vmul.f32 %v901_v25, %v5626_v34  ;;  %v902_v45 = vmul.f32 %v5634_v24, %v5634_v24 }
 0x264   : > { %4649 = vtanh.f32 %v959_v43  ;;  %v960_v40 = vmul.f32 0.7978846, %v944_v33  ;;  %v915_v42 = vmul.f32 %v899_v38, %v5629_v28  ;;  %v900_v50 = vmul.f32 %v5639_v35, %v5639_v35 }
 0x265   : > { %v4640_v27 = vpop.eup %4639  ;;  %4651 = vtanh.f32 %v962_v0  ;;  %v933_v52 = vmul.f32 0.044715, %v917_v32  ;;  %v918_v46 = vmul.f32 %v902_v45, %v5634_v24  ;;  %v984_v3 = vadd.f32 1.0, %v4638_v18 }
 0x266   : > { %v4642_v4 = vpop.eup %4641  ;;  %4653 = vtanh.f32 %v960_v40  ;;  %v931_v20 = vmul.f32 0.044715, %v915_v42  ;;  %v916_v25 = vmul.f32 %v900_v50, %v5639_v35  ;;  %v999_v11 = vmul.f32 0.5, %v983_v39 }
 0x267   : > { %v4644_v21 = vpop.eup %4643  ;;  %v949_v43 = vadd.f32 %v933_v52, %v5626_v34  ;;  %v934_v33 = vmul.f32 0.044715, %v918_v46  ;;  %v1000_v38 = vmul.f32 0.5, %v984_v3  ;;  %v1001_v13 = vmul.f32 0.5, %v985_v44 }
 0x268   : > { %v4646_v14 = vpop.eup %4645  ;;  %v947_v6 = vadd.f32 %v931_v20, %v5629_v28  ;;  %v932_v0 = vmul.f32 0.044715, %v916_v25  ;;  %v1015_v32 = vmul.f32 %v999_v11, %v5559_v5  ;;  %v1002_v45 = vmul.f32 0.5, %v986_v59 }
 0x269   : > { %v965_v18 = vmul.f32 0.7978846, %v949_v43  ;;  %v950_v40 = vadd.f32 %v934_v33, %v5634_v24  ;;  %v1016_v42 = vmul.f32 %v1000_v38, %v5567_v19  ;;  %v1017_v39 = vmul.f32 %v1001_v13, %v5557_v61 }
 0x26a   : > { %v963_v50 = vmul.f32 0.7978846, %v947_v6  ;;  %v948_v52 = vadd.f32 %v932_v0, %v5639_v35  ;;  %v1018_v46 = vmul.f32 %v1002_v45, %v5563_v12  ;;  %v987_v44 = vadd.f32 1.0, %v4642_v4 }
 0x26b   : > { %4655 = vtanh.f32 %v965_v18  ;;  %v966_v3 = vmul.f32 0.7978846, %v950_v40  ;;  %v1047_v20 = vpack.c.bf16 %v1016_v42, %v1015_v32  ;;  %v988_v25 = vadd.f32 1.0, %v4646_v14 }
 0x26c   : > { %4657 = vtanh.f32 %v963_v50  ;;  %v964_v5 = vmul.f32 0.7978846, %v948_v52  ;;  %v1048_v59 = vpack.c.bf16 %v1018_v46, %v1017_v39  ;;  %v1003_v11 = vmul.f32 0.5, %v987_v44 }
 0x26d   : > { %v4648_v43 = vpop.eup %4647  ;;  %4659 = vtanh.f32 %v966_v3  ;;  %4313 = vmatprep.subr.bf16.mxu1 %v1047_v20  ;;  %v1004_v19 = vmul.f32 0.5, %v988_v25  ;;  %v989_v33 = vadd.f32 1.0, %v4640_v27  ;;  %v990_v13 = vadd.f32 1.0, %v4644_v21 }
 0x26e   : > { %v4650_v6 = vpop.eup %4649  ;;  %4661 = vtanh.f32 %v964_v5  ;;  %4314 = vmatpush3.bf16.msra.mxu1 %v1047_v20  ;;  %v1019_v61 = vmul.f32 %v1003_v11, %v5581_v60  ;;  %v993_v12 = vadd.f32 1.0, %v4648_v43 }
 0x26f   : > { %v4652_v4 = vpop.eup %4651  ;;  %4315 = vmatprep.subr.bf16.mxu1 %v1048_v59  ;;  %v1020_v14 = vmul.f32 %v1004_v19, %v5591_v31  ;;  %v1005_v38 = vmul.f32 0.5, %v989_v33  ;;  %v1006_v0 = vmul.f32 0.5, %v990_v13  ;;  %v991_v32 = vadd.f32 1.0, %v4650_v6 }
 0x270   : > { %v4654_v45 = vpop.eup %4653  ;;  %v994_v18 = vadd.f32 1.0, %v4652_v4  ;;  %v1009_v40 = vmul.f32 0.5, %v993_v12 }
 0x271   : > { %v1049_v42 = vpack.c.bf16 %v1020_v14, %v1019_v61  ;;  %v1021_v27 = vmul.f32 %v1005_v38, %v5578_v49  ;;  %v1022_v21 = vmul.f32 %v1006_v0, %v5586_v17  ;;  %v992_v39 = vadd.f32 1.0, %v4654_v45  ;;  %v4528_v0 = vld [vmem:[#allocation7 + $0x8] sm:$0xff]   ;;  %v4531_v45 = vld [vmem:[#allocation7 + $0x20] sm:$0xff]  }
 0x272   : > { %4316 = vmatpush3.bf16.msra.mxu1 %v1048_v59  ;;  %v1007_v50 = vmul.f32 0.5, %v991_v32  ;;  %v1010_v60 = vmul.f32 0.5, %v994_v18  ;;  %v1025_v31 = vmul.f32 %v1009_v40, %v5602_v10  ;;  %v4529_v32 = vld [vmem:[#allocation7 + $0x10] sm:$0xff]   ;;  %v1055_v18 = vld [vmem:[#allocation8] sm:$0xff] }
 0x273   : > { %4317 = vmatprep.subr.bf16.mxu1 %v1049_v42  ;;  %v1050_v52 = vpack.c.bf16 %v1022_v21, %v1021_v27  ;;  %v1008_v46 = vmul.f32 0.5, %v992_v39  ;;  %v1056_v21 = vld [vmem:[#allocation8 + $0x8] sm:$0xff] }
 0x274   : > { %v1026_v44 = vmul.f32 %v1010_v60, %v5610_v41  ;;  %v1023_v20 = vmul.f32 %v1007_v50, %v5605_v26 }
 0x275   : > { %v4656_v3 = vpop.eup %4655  ;;  %v1024_v25 = vmul.f32 %v1008_v46, %v5615_v51 }
 0x276   : > { %v4658_v5 = vpop.eup %4657  ;;  %4318 = vmatpush3.bf16.msra.mxu1 %v1049_v42  ;;  %v1052_v49 = vpack.c.bf16 %v1026_v44, %v1025_v31  ;;  %v997_v17 = vadd.f32 1.0, %v4656_v3  ;;  %v1057_v42 = vld [vmem:[#allocation8 + $0x10] sm:$0xff]  ;;  %v1058_v44 = vld [vmem:[#allocation8 + $0x18] sm:$0xff] }
 0x277   : > { %v4660_v11 = vpop.eup %4659  ;;  %4319 = vmatprep.subr.bf16.mxu1 %v1050_v52  ;;  %v1051_v59 = vpack.c.bf16 %v1024_v25, %v1023_v20  ;;  %v995_v43 = vadd.f32 1.0, %v4658_v5  ;;  %v1059_v20 = vld [vmem:[#allocation8 + $0x20] sm:$0xff] }
 0x278   : > { %v4662_v19 = vpop.eup %4661  ;;  %v998_v33 = vadd.f32 1.0, %v4660_v11  ;;  %v1013_v13 = vmul.f32 0.5, %v997_v17  ;;  %v1061_v17 = vld [vmem:[#allocation8 + $0x30] sm:$0xff] }
 0x279   : > { %v996_v6 = vadd.f32 1.0, %v4662_v19  ;;  %v1011_v10 = vmul.f32 0.5, %v995_v43 }
 0x27a   : > { %4320 = vmatpush3.bf16.msra.mxu1 %v1050_v52  ;;  %v1014_v41 = vmul.f32 0.5, %v998_v33  ;;  %v1029_v26 = vmul.f32 %v1013_v13, %v5626_v34  ;;  %v4530_v34 = vld [vmem:[#allocation7 + $0x18] sm:$0xff]  }
 0x27b   : > { %4321 = vmatprep.subr.bf16.mxu1 %v1051_v59  ;;  %v1012_v61 = vmul.f32 0.5, %v996_v6  ;;  %v1027_v12 = vmul.f32 %v1011_v10, %v5629_v28  ;;  %v4532_v28 = vld [vmem:[#allocation7 + $0x28] sm:$0xff]   ;;  %v1062_v10 = vld [vmem:[#allocation8 + $0x38] sm:$0xff] }
 0x27c   : > { %v1030_v51 = vmul.f32 %v1014_v41, %v5634_v24  ;;  %v4533_v24 = vld [vmem:[#allocation7 + $0x30] sm:$0xff]  }
 0x27d   : > { %v1028_v4 = vmul.f32 %v1012_v61, %v5639_v35  ;;  %v4534_v35 = vld [vmem:[#allocation7 + $0x38] sm:$0xff]  }
 0x27e   : > { %4322 = vmatpush3.bf16.msra.mxu1 %v1051_v59  ;;  %v1054_v14 = vpack.c.bf16 %v1030_v51, %v1029_v26  ;;  %v1060_v59 = vld [vmem:[#allocation8 + $0x28] sm:$0xff] }
 0x27f   : > { %4323 = vmatprep.subr.bf16.mxu1 %v1052_v49  ;;  %v1053_v38 = vpack.c.bf16 %v1028_v4, %v1027_v12  ;;  %v1065_v12 = vld [vmem:[#allocation8 + $0x50] sm:$0xff]  ;;  %v1064_v4 = vld [vmem:[#allocation8 + $0x48] sm:$0xff] }
 0x282   : > { %4324 = vmatpush3.bf16.msra.mxu1 %v1052_v49 }
 0x283   : > { %4325 = vmatprep.subr.bf16.mxu1 %v1053_v38 }
 0x286   : > { %4326 = vmatpush3.bf16.msra.mxu1 %v1053_v38 }
 0x287   : > { %4327 = vmatprep.subr.bf16.mxu1 %v1054_v14 }
 0x28a   : > { %4328 = vmatpush3.bf16.msra.mxu1 %v1054_v14 }
 0x28d   : > { %4330 = vmatmul.mubr.bf16.vlgmr.msra.gmra.mrb[0].mxu1 %v4528_v0 }
 0x28e   : > { %4333 = vmatprep.mubr.bf16.mxu1 %v4529_v32 }
 0x295   : > { %4334 = vmatmul.mubr.bf16.gmra.mrb[4].mxu1 %v4530_v34 }
 0x296   : > { %4337 = vmatprep.mubr.bf16.mxu1 %v4531_v45  ;;  %v1067_v45 = vld [vmem:[#allocation8 + $0x60] sm:$0xff] }
 0x29d   : > { %4338 = vmatmul.mubr.bf16.gmra.mrb[8].mxu1 %v4532_v28 }
 0x29e   : > { %4341 = vmatprep.mubr.bf16.mxu1 %v4533_v24 }
 0x2a5   : > { %4342 = vmatmul.mubr.bf16.gmra.mrb[12].mxu1 %v4534_v35 }
 0x360   : > { %v4331_v40 = vpop.f32.mrb[0].mxu1 }
 0x361   : > { %v1153_v27 = vpop.f32.mrb[1].mxu1  ;;  %v1162_v52 = vadd.f32 %v4331_v40, %v1057_v42  ;;  %v1069_v40 = vld [vmem:[#allocation8 + $0x70] sm:$0xff]  ;;  %v1068_v42 = vld [vmem:[#allocation8 + $0x68] sm:$0xff] }
 0x362   : > { %v1154_v39 = vadd.f32 %v1153_v27, %v1055_v18  ;;  %v4332_v50 = vpop.f32.mrb[2].mxu1 }
 0x363   : > { %v1156_v60 = vpop.f32.mrb[3].mxu1  ;;  %v1165_v25 = vadd.f32 %v4332_v50, %v1058_v44  ;;  %v5678_v49 = vadd.f32 %v1162_v52, %v5457_v55  ;;  %v1063_v55 = vld [vmem:[#allocation8 + $0x40] sm:$0xff] }
 0x364   : > { %v1157_v46 = vadd.f32 %v1156_v60, %v1056_v21  ;;  %v5670_v31 = vadd.f32 %v1154_v39, %v5463_v57 }
 0x365   : > { %v5685_v6 = vadd.f32 %v1165_v25, %v5460_v56  ;;  %v4540_v25 = vld [vmem:[#allocation10 + $0x14] ss:$8 sps:$4 sm:$0xff]  }
 0x366   : > { %1234 = vadd.xlane.f32.xlu0 %v5670_v31  ;;  %v5674_v3 = vadd.f32 %v1157_v46, %v5466_v58 }
 0x368   : > { %v4335_v5 = vpop.f32.mrb[4].mxu1  ;;  %1236 = vadd.xlane.f32.xlu1 %v5674_v3 }
 0x369   : > { %v1169_v11 = vpop.f32.mrb[5].mxu1  ;;  %v1178_v33 = vadd.f32 %v4335_v5, %v1061_v17  ;;  %v4538_v5 = vld [vmem:[#allocation10 + $0x10] ss:$8 sps:$4 sm:$0xff]  }
 0x36a   : > { %v1170_v43 = vadd.f32 %v1169_v11, %v1059_v20  ;;  %v4336_v57 = vpop.f32.mrb[6].mxu1  ;;  %1238 = vadd.xlane.f32.xlu0 %v5678_v49  ;;  %v4537_v20 = vld [vmem:[#allocation10 + $0x4] ss:$8 sps:$4 sm:$0xff]  }
 0x36b   : > { %v1172_v19 = vpop.f32.mrb[7].mxu1  ;;  %v1181_v41 = vadd.f32 %v4336_v57, %v1062_v10  ;;  %v5690_v26 = vadd.f32 %v1178_v33, %v5494_v9  ;;  %1571 = vmatprep.subr.bf16.mxu0 %v4537_v20 }
 0x36c   : > { %v1173_v13 = vadd.f32 %v1172_v19, %v1060_v59  ;;  %v5682_v58 = vadd.f32 %v1170_v43, %v5480_v2 }
 0x36d   : > { %v5701_v9 = vadd.f32 %v1181_v41, %v5491_v8 }
 0x36e   : > { %1242 = vadd.xlane.f32.xlu1 %v5682_v58  ;;  %1240 = vadd.xlane.f32.xlu0 %v5685_v6  ;;  %v5693_v51 = vadd.f32 %v1173_v13, %v5477_v1  ;;  %v1066_v1 = vld [vmem:[#allocation8 + $0x58] sm:$0xff] }
 0x370   : > { %v4339_v61 = vpop.f32.mrb[8].mxu1 }
 0x371   : > { %v1185_v2 = vpop.f32.mrb[9].mxu1  ;;  %v1194_v0 = vadd.f32 %v4339_v61, %v1065_v12 }
 0x372   : > { %v1186_v14 = vadd.f32 %v1185_v2, %v1063_v55  ;;  %v4340_v56 = vpop.f32.mrb[10].mxu1  ;;  %1246 = vadd.xlane.f32.xlu1 %v5690_v26  ;;  %1244 = vadd.xlane.f32.xlu0 %v5693_v51 }
 0x373   : > { %v1188_v38 = vpop.f32.mrb[11].mxu1  ;;  %v1197_v28 = vadd.f32 %v4340_v56, %v1066_v1  ;;  %v5706_v35 = vadd.f32 %v1194_v0, %v5522_v23 }
 0x374   : > { %v1189_v32 = vadd.f32 %v1188_v38, %v1064_v4  ;;  %v5698_v34 = vadd.f32 %v1186_v14, %v5508_v16 }
 0x375   : > { %v5717_v23 = vadd.f32 %v1197_v28, %v5519_v22  ;;  %v4535_v22 = vld [vmem:[#allocation10] ss:$8 sps:$4 sm:$0xff]  }
 0x376   : > { %1250 = vadd.xlane.f32.xlu1 %v5698_v34  ;;  %1248 = vadd.xlane.f32.xlu0 %v5701_v9  ;;  %v5709_v18 = vadd.f32 %v1189_v32, %v5505_v15  ;;  %v1070_v15 = vld [vmem:[#allocation8 + $0x78] sm:$0xff] }
 0x377   : > { %1572 = vmatpush1.bf16.msra.mxu0 %v4535_v22 }
 0x378   : > { %v4343_v24 = vpop.f32.mrb[12].mxu1  ;;  %1573 = vmatprep.subr.bf16.mxu0 %v4540_v25 }
 0x379   : > { %v1201_v16 = vpop.f32.mrb[13].mxu1  ;;  %v1210_v39 = vadd.f32 %v4343_v24, %v1069_v40 }
 0x37a   : > { %v1202_v27 = vadd.f32 %v1201_v16, %v1067_v45  ;;  %v4344_v8 = vpop.f32.mrb[14].mxu1  ;;  %1254 = vadd.xlane.f32.xlu1 %v5706_v35  ;;  %1252 = vadd.xlane.f32.xlu0 %v5709_v18 }
 0x37b   : > { %v1204_v21 = vpop.f32.mrb[15].mxu1  ;;  %v1213_v52 = vadd.f32 %v4344_v8, %v1070_v15  ;;  %v5722_v46 = vadd.f32 %v1210_v39, %v5550_v37  ;;  %1574 = vmatpush1.bf16.msra.mxu0 %v4538_v5 }
 0x37c   : > { %v1205_v50 = vadd.f32 %v1204_v21, %v1068_v42  ;;  %v5714_v60 = vadd.f32 %v1202_v27, %v5536_v30 }
 0x37d   : > { %v5730_v30 = vadd.f32 %v1213_v52, %v5547_v36  ;;  %v4541_v52 = vld [vmem:[#allocation10 + $0x20] ss:$8 sps:$4 sm:$0xff]  }
 0x37e   : > { %1258 = vadd.xlane.f32.xlu1 %v5714_v60  ;;  %1256 = vadd.xlane.f32.xlu0 %v5717_v23  ;;  %v5725_v44 = vadd.f32 %v1205_v50, %v5533_v29 }
 0x382   : > { %1262 = vadd.xlane.f32.xlu1 %v5722_v46  ;;  %1260 = vadd.xlane.f32.xlu0 %v5725_v44 }
 0x386   : > { %1264 = vadd.xlane.f32.xlu0 %v5730_v30 }
 0x3f3   : > { %v1235_v37 = vpop.xlane.xlu0 %1234 }
 0x3f4   : > { %v1267_v29 = vmul.f32 0.0078125, %v1235_v37  ;;  %v4546_v37 = vld [vmem:[#allocation10 + $0x34] ss:$8 sps:$4 sm:$0xff]  }
 0x3f5   : > { %v1237_v17 = vpop.xlane.xlu1 %1236 }
 0x3f6   : > { %v1268_v11 = vmul.f32 0.0078125, %v1237_v17  ;;  %v5734_v59 = vsub.f32 %v5670_v31, %v1267_v29 }
 0x3f7   : > { %v1239_v43 = vpop.xlane.xlu0 %1238 }
 0x3f8   : > { %v1269_v36 = vmul.f32 0.0078125, %v1239_v43  ;;  %v1299_v57 = vmul.f32 %v5734_v59, %v5734_v59  ;;  %v5739_v19 = vsub.f32 %v5674_v3, %v1268_v11  ;;  %v4544_v11 = vld [vmem:[#allocation10 + $0x30] ss:$8 sps:$4 sm:$0xff]  }
 0x3fa   : > { %1315 = vadd.xlane.f32.xlu1 %v1299_v57  ;;  %v1300_v33 = vmul.f32 %v5739_v19, %v5739_v19  ;;  %v5744_v13 = vsub.f32 %v5678_v49, %v1269_v36 }
 0x3fb   : > { %v1243_v10 = vpop.xlane.xlu1 %1242  ;;  %v1241_v55 = vpop.xlane.xlu0 %1240 }
 0x3fc   : > { %v1271_v41 = vmul.f32 0.0078125, %v1243_v10  ;;  %v1270_v31 = vmul.f32 0.0078125, %v1241_v55  ;;  %1317 = vadd.xlane.f32.xlu0 %v1300_v33  ;;  %v1301_v61 = vmul.f32 %v5744_v13, %v5744_v13  ;;  %v4549_v10 = vld [vmem:[#allocation10 + $0x44] ss:$8 sps:$4 sm:$0xff]  }
 0x3fe   : > { %1319 = vadd.xlane.f32.xlu1 %v1301_v61  ;;  %v5749_v12 = vsub.f32 %v5682_v58, %v1271_v41  ;;  %v5752_v3 = vsub.f32 %v5685_v6, %v1270_v31  ;;  %v4547_v41 = vld [vmem:[#allocation10 + $0x40] ss:$8 sps:$4 sm:$0xff]  }
 0x3ff   : > { %v1247_v2 = vpop.xlane.xlu1 %1246  ;;  %v1245_v4 = vpop.xlane.xlu0 %1244 }
 0x400   : > { %v1273_v14 = vmul.f32 0.0078125, %v1247_v2  ;;  %v1272_v49 = vmul.f32 0.0078125, %v1245_v4  ;;  %v1303_v56 = vmul.f32 %v5749_v12, %v5749_v12  ;;  %v1302_v38 = vmul.f32 %v5752_v3, %v5752_v3  ;;  %v4552_v4 = vld [vmem:[#allocation10 + $0x54] ss:$8 sps:$4 sm:$0xff]  }
 0x402   : > { %1323 = vadd.xlane.f32.xlu1 %v1303_v56  ;;  %1321 = vadd.xlane.f32.xlu0 %v1302_v38  ;;  %v5759_v0 = vsub.f32 %v5690_v26, %v1273_v14  ;;  %v5762_v58 = vsub.f32 %v5693_v51, %v1272_v49  ;;  %v4555_v49 = vld [vmem:[#allocation10 + $0x64] ss:$8 sps:$4 sm:$0xff]   ;;  %v4553_v56 = vld [vmem:[#allocation10 + $0x60] ss:$8 sps:$4 sm:$0xff]   ;;  %v4558_v38 = vld [vmem:[#allocation10 + $0x74] ss:$8 sps:$4 sm:$0xff]  }
 0x403   : > { %v1251_v6 = vpop.xlane.xlu1 %1250  ;;  %v1249_v32 = vpop.xlane.xlu0 %1248 }
 0x404   : > { %v1275_v1 = vmul.f32 0.0078125, %v1251_v6  ;;  %v1274_v45 = vmul.f32 0.0078125, %v1249_v32  ;;  %v1305_v28 = vmul.f32 %v5759_v0, %v5759_v0  ;;  %v1304_v24 = vmul.f32 %v5762_v58, %v5762_v58  ;;  %v4556_v6 = vld [vmem:[#allocation10 + $0x70] ss:$8 sps:$4 sm:$0xff]   ;;  %v4559_v32 = vld [vmem:[#allocation11 + $0x40] sm:$0xff]  }
 0x405   : > { %4121 = vmatprep.subr.bf16.mxu1 %v4559_v32  ;;  %v5824_v32 = vld [vmem:[%s6969_s7] ss:$0 sm:$0xff] }
 0x406   : > { %1327 = vadd.xlane.f32.xlu1 %v1305_v28  ;;  %1325 = vadd.xlane.f32.xlu0 %v1304_v24  ;;  %v5769_v40 = vsub.f32 %v5698_v34, %v1275_v1  ;;  %v5772_v26 = vsub.f32 %v5701_v9, %v1274_v45  ;;  %v4543_v9 = vld [vmem:[#allocation10 + $0x24] ss:$8 sps:$4 sm:$0xff]   ;;  %v4563_v28 = vld [vmem:[#allocation11 + $0x50] sm:$0xff]  }
 0x407   : > { %v1255_v51 = vpop.xlane.xlu1 %1254  ;;  %v1253_v16 = vpop.xlane.xlu0 %1252  ;;  %1575 = vmatprep.subr.bf16.mxu0 %v4543_v9  ;;  %v4560_v1 = vld [vmem:[#allocation11] sm:$0xff]   ;;  %v4562_v45 = vld [vmem:[#allocation11 + $0x8] sm:$0xff]   ;;  %v4564_v24 = vld [vmem:[#allocation11 + $0x10] sm:$0xff]  }
 0x408   : > { %v1277_v42 = vmul.f32 0.0078125, %v1255_v51  ;;  %v1276_v27 = vmul.f32 0.0078125, %v1253_v16  ;;  %v1307_v8 = vmul.f32 %v5769_v40, %v5769_v40  ;;  %v1306_v21 = vmul.f32 %v5772_v26, %v5772_v26  ;;  %1576 = vmatpush1.bf16.msra.mxu0 %v4541_v52  ;;  %4122 = vmatpush3.bf16.msra.mxu1 %v4560_v1  ;;  %v4565_v51 = vld [vmem:[#allocation11 + $0x58] sm:$0xff]  }
 0x409   : > { %1577 = vmatprep.subr.bf16.mxu0 %v4546_v37  ;;  %v4566_v16 = vld [vmem:[#allocation11 + $0x18] sm:$0xff]  }
 0x40a   : > { %1331 = vadd.xlane.f32.xlu1 %v1307_v8  ;;  %1329 = vadd.xlane.f32.xlu0 %v1306_v21  ;;  %v5779_v39 = vsub.f32 %v5706_v35, %v1277_v42  ;;  %v5782_v34 = vsub.f32 %v5709_v18, %v1276_v27  ;;  %v4567_v42 = vld [vmem:[#allocation11 + $0x60] sm:$0xff]   ;;  %v4569_v8 = vld [vmem:[#allocation11 + $0x68] sm:$0xff]  }
 0x40b   : > { %v1259_v50 = vpop.xlane.xlu1 %1258  ;;  %v1257_v15 = vpop.xlane.xlu0 %1256  ;;  %v4568_v27 = vld [vmem:[#allocation11 + $0x20] sm:$0xff]  }
 0x40c   : > { %v1279_v22 = vmul.f32 0.0078125, %v1259_v50  ;;  %v1278_v20 = vmul.f32 0.0078125, %v1257_v15  ;;  %v1309_v25 = vmul.f32 %v5779_v39, %v5779_v39  ;;  %v1308_v5 = vmul.f32 %v5782_v34, %v5782_v34  ;;  %1578 = vmatpush1.bf16.msra.mxu0 %v4544_v11 }
 0x40d   : > { %1579 = vmatprep.subr.bf16.mxu0 %v4549_v10 }
 0x40e   : > { %1335 = vadd.xlane.f32.xlu1 %v1309_v25  ;;  %1333 = vadd.xlane.f32.xlu0 %v1308_v5  ;;  %v5789_v35 = vsub.f32 %v5714_v60, %v1279_v22  ;;  %v5792_v18 = vsub.f32 %v5717_v23, %v1278_v20 }
 0x40f   : > { %v1263_v29 = vpop.xlane.xlu1 %1262  ;;  %v1261_v17 = vpop.xlane.xlu0 %1260 }
 0x410   : > { %v1281_v43 = vmul.f32 0.0078125, %v1263_v29  ;;  %v1280_v36 = vmul.f32 0.0078125, %v1261_v17  ;;  %v1311_v57 = vmul.f32 %v5789_v35, %v5789_v35  ;;  %v1310_v33 = vmul.f32 %v5792_v18, %v5792_v18  ;;  %1580 = vmatpush1.bf16.msra.mxu0 %v4547_v41  ;;  %v5816_v41 = vld [vmem:[%s6968_s6] ss:$0 sm:$0xff] }
 0x411   : > { %1581 = vmatprep.subr.bf16.mxu0 %v4552_v4 }
 0x412   : > { %1339 = vadd.xlane.f32.xlu1 %v1311_v57  ;;  %1337 = vadd.xlane.f32.xlu0 %v1310_v33  ;;  %v5799_v60 = vsub.f32 %v5722_v46, %v1281_v43  ;;  %v5802_v23 = vsub.f32 %v5725_v44, %v1280_v36  ;;  %v4550_v44 = vld [vmem:[#allocation10 + $0x50] ss:$8 sps:$4 sm:$0xff]  }
 0x413   : > { %v1265_v55 = vpop.xlane.xlu0 %1264 }
 0x414   : > { %v1282_v31 = vmul.f32 0.0078125, %v1265_v55  ;;  %v1313_v61 = vmul.f32 %v5799_v60, %v5799_v60  ;;  %v1312_v2 = vmul.f32 %v5802_v23, %v5802_v23  ;;  %1582 = vmatpush1.bf16.msra.mxu0 %v4550_v44 }
 0x415   : > { %1583 = vmatprep.subr.bf16.mxu0 %v4555_v49 }
 0x416   : > { %1343 = vadd.xlane.f32.xlu1 %v1313_v61  ;;  %1341 = vadd.xlane.f32.xlu0 %v1312_v2  ;;  %v5809_v46 = vsub.f32 %v5730_v30, %v1282_v31  ;;  %v4561_v30 = vld [vmem:[#allocation11 + $0x48] sm:$0xff]  }
 0x417   : > { %4123 = vmatprep.subr.bf16.mxu1 %v4561_v30 }
 0x418   : > { %v1314_v14 = vmul.f32 %v5809_v46, %v5809_v46  ;;  %1584 = vmatpush1.bf16.msra.mxu0 %v4553_v56  ;;  %4124 = vmatpush3.bf16.msra.mxu1 %v4562_v45 }
 0x419   : > { %1585 = vmatprep.subr.bf16.mxu0 %v4558_v38  ;;  %4125 = vmatprep.subr.bf16.mxu1 %v4563_v28 }
 0x41a   : > { %1345 = vadd.xlane.f32.xlu0 %v1314_v14 }
 0x41c   : > { %1586 = vmatpush1.bf16.msra.mxu0 %v4556_v6  ;;  %4126 = vmatpush3.bf16.msra.mxu1 %v4564_v24 }
 0x41d   : > { %4127 = vmatprep.subr.bf16.mxu1 %v4565_v51 }
 0x420   : > { %4128 = vmatpush3.bf16.msra.mxu1 %v4566_v16 }
 0x421   : > { %4129 = vmatprep.subr.bf16.mxu1 %v4567_v42 }
 0x424   : > { %4130 = vmatpush3.bf16.msra.mxu1 %v4568_v27 }
 0x425   : > { %4131 = vmatprep.subr.bf16.mxu1 %v4569_v8 }
 0x487   : > { %v1316_v21 = vpop.xlane.xlu1 %1315 }
 0x488   : > { %v1347_v9 = vmul.f32 0.0078125, %v1316_v21 }
 0x489   : > { %v1318_v50 = vpop.xlane.xlu0 %1317 }
 0x48a   : > { %v1363_v15 = vadd.f32 1e-05, %v1347_v9  ;;  %v1348_v52 = vmul.f32 0.0078125, %v1318_v50 }
 0x48b   : > { %v1320_v22 = vpop.xlane.xlu1 %1319 }
 0x48c   : > { %4663 = vrsqrt.f32 %v1363_v15  ;;  %v1364_v20 = vadd.f32 1e-05, %v1348_v52  ;;  %v1349_v25 = vmul.f32 0.0078125, %v1320_v22  ;;  %v7059_v15 = vmov 0  }
 0x48e   : > { %4665 = vrsqrt.f32 %v1364_v20  ;;  %v1365_v5 = vadd.f32 1e-05, %v1349_v25 }
 0x48f   : > { %v1324_v37 = vpop.xlane.xlu1 %1323  ;;  %v1322_v29 = vpop.xlane.xlu0 %1321 }
 0x490   : > { %4667 = vrsqrt.f32 %v1365_v5  ;;  %v1351_v17 = vmul.f32 0.0078125, %v1324_v37  ;;  %v1350_v11 = vmul.f32 0.0078125, %v1322_v29 }
 0x492   : > { %v1366_v43 = vadd.f32 1e-05, %v1350_v11  ;;  %v1367_v57 = vadd.f32 1e-05, %v1351_v17 }
 0x493   : > { %v1326_v36 = vpop.xlane.xlu0 %1325  ;;  %v1328_v10 = vpop.xlane.xlu1 %1327 }
 0x494   : > { %v1352_v33 = vmul.f32 0.0078125, %v1326_v36  ;;  %4669 = vrsqrt.f32 %v1366_v43  ;;  %v1353_v44 = vmul.f32 0.0078125, %v1328_v10 }
 0x495   : > { %4671 = vrsqrt.f32 %v1367_v57 }
 0x496   : > { %v4664_v55 = vpop.eup %4663  ;;  %v1368_v31 = vadd.f32 1e-05, %v1352_v33  ;;  %v1369_v30 = vadd.f32 1e-05, %v1353_v44 }
 0x497   : > { %v1395_v61 = vmul.f32 %v4664_v55, %v5734_v59  ;;  %v1330_v2 = vpop.xlane.xlu0 %1329  ;;  %v1332_v45 = vpop.xlane.xlu1 %1331 }
 0x498   : > { %v4666_v4 = vpop.eup %4665  ;;  %v1354_v14 = vmul.f32 0.0078125, %v1330_v2  ;;  %4673 = vrsqrt.f32 %v1368_v31  ;;  %v1355_v27 = vmul.f32 0.0078125, %v1332_v45 }
 0x499   : > { %v1417_v49 = vmul.f32 %v5816_v41, %v1395_v61  ;;  %v1396_v56 = vmul.f32 %v4666_v4, %v5739_v19 }
 0x49a   : > { %v4668_v38 = vpop.eup %4667  ;;  %v1370_v6 = vadd.f32 1e-05, %v1354_v14  ;;  %v1371_v20 = vadd.f32 1e-05, %v1355_v27 }
 0x49b   : > { %v1418_v1 = vmul.f32 %v5816_v41, %v1396_v56  ;;  %v1334_v59 = vpop.xlane.xlu0 %1333  ;;  %v5828_v28 = vadd.f32 %v5824_v32, %v1417_v49  ;;  %v1397_v19 = vmul.f32 %v4668_v38, %v5744_v13  ;;  %v1336_v5 = vpop.xlane.xlu1 %1335 }
 0x49c   : > { %4675 = vrsqrt.f32 %v1370_v6  ;;  %v1356_v51 = vmul.f32 0.0078125, %v1334_v59  ;;  %v1357_v57 = vmul.f32 0.0078125, %v1336_v5 }
 0x49d   : > { %v5831_v24 = vadd.f32 %v5824_v32, %v1418_v1  ;;  %4677 = vrsqrt.f32 %v1369_v30  ;;  %v1419_v21 = vmul.f32 %v5816_v41, %v1397_v19 }
 0x49e   : > { %v4670_v16 = vpop.eup %4669  ;;  %v1372_v50 = vadd.f32 1e-05, %v1356_v51  ;;  %v1373_v61 = vadd.f32 1e-05, %v1357_v57 }
 0x49f   : > { %v1455_v42 = vpack.c.bf16 %v5831_v24, %v5828_v28  ;;  %v1398_v8 = vmul.f32 %v4670_v16, %v5752_v3  ;;  %v4672_v9 = vpop.eup %4671  ;;  %v1338_v22 = vpop.xlane.xlu0 %1337  ;;  %v5844_v37 = vadd.f32 %v5824_v32, %v1419_v21 }
 0x4a0   : > { %v1399_v3 = vmul.f32 %v4672_v9, %v5749_v12  ;;  %4679 = vrsqrt.f32 %v1372_v50  ;;  %v1358_v17 = vmul.f32 0.0078125, %v1338_v22  ;;  %v1340_v2 = vpop.xlane.xlu1 %1339 }
 0x4a1   : > { %1604 = vmatmul.mubr.bf16.vlgmr.msra.gmra.mrb[16].mxu0 %v1455_v42  ;;  %v1420_v52 = vmul.f32 %v5816_v41, %v1398_v8  ;;  %4681 = vrsqrt.f32 %v1371_v20  ;;  %v1359_v6 = vmul.f32 0.0078125, %v1340_v2 }
 0x4a2   : > { %1613 = vmatprep.mubr.bf16.mxu0 %v7059_v15  ;;  %v4674_v13 = vpop.eup %4673  ;;  %v1421_v33 = vmul.f32 %v5816_v41, %v1399_v3  ;;  %v1374_v55 = vadd.f32 1e-05, %v1358_v17 }
 0x4a3   : > { %v5841_v25 = vadd.f32 %v5824_v32, %v1420_v52  ;;  %v1400_v29 = vmul.f32 %v4674_v13, %v5762_v58  ;;  %v1342_v12 = vpop.xlane.xlu0 %1341  ;;  %v1375_v19 = vadd.f32 1e-05, %v1359_v6 }
 0x4a4   : > { %v5858_v4 = vadd.f32 %v5824_v32, %v1421_v33  ;;  %4683 = vrsqrt.f32 %v1374_v55  ;;  %v1360_v14 = vmul.f32 0.0078125, %v1342_v12  ;;  %v1344_v51 = vpop.xlane.xlu1 %1343 }
 0x4a5   : > { %v1456_v11 = vpack.c.bf16 %v5841_v25, %v5844_v37  ;;  %v1422_v43 = vmul.f32 %v5816_v41, %v1400_v29  ;;  %4685 = vrsqrt.f32 %v1373_v61  ;;  %v1361_v50 = vmul.f32 0.0078125, %v1344_v51 }
 0x4a6   : > { %v4676_v36 = vpop.eup %4675  ;;  %v1376_v59 = vadd.f32 1e-05, %v1360_v14 }
 0x4a7   : > { %v4678_v10 = vpop.eup %4677  ;;  %v5854_v58 = vadd.f32 %v5824_v32, %v1422_v43  ;;  %v1402_v31 = vmul.f32 %v4676_v36, %v5772_v26  ;;  %v1346_v30 = vpop.xlane.xlu0 %1345  ;;  %v1377_v20 = vadd.f32 1e-05, %v1361_v50 }
 0x4a8   : > { %v1401_v44 = vmul.f32 %v4678_v10, %v5759_v0  ;;  %4687 = vrsqrt.f32 %v1376_v59  ;;  %v1362_v27 = vmul.f32 0.0078125, %v1346_v30  ;;  %v4573_v59 = vld [vmem:[#allocation11 + $0x78] sm:$0xff]   ;;  %v1481_v30 = vlaneseq }
 0x4a9   : > { %1614 = vmatmul.mubr.bf16.gmra.mrb[20].mxu0 %v1456_v11  ;;  %v1457_v49 = vpack.c.bf16 %v5854_v58, %v5858_v4  ;;  %v1424_v56 = vmul.f32 %v5816_v41, %v1402_v31  ;;  %4689 = vrsqrt.f32 %v1375_v19  ;;  %v1479_v19 = vld [vmem:[%s6971_s9] sm:$0x3] }
 0x4aa   : > { %1623 = vmatprep.mubr.bf16.mxu0 %v7059_v15  ;;  %v4680_v38 = vpop.eup %4679  ;;  %v1423_v26 = vmul.f32 %v5816_v41, %v1401_v44  ;;  %v1378_v13 = vadd.f32 1e-05, %v1362_v27 }
 0x4ab   : > { %v4682_v1 = vpop.eup %4681  ;;  %v5867_v0 = vadd.f32 %v5824_v32, %v1424_v56  ;;  %v1404_v45 = vmul.f32 %v4680_v38, %v5782_v34 }
 0x4ac   : > { %v5871_v16 = vadd.f32 %v5824_v32, %v1423_v26  ;;  %v1403_v42 = vmul.f32 %v4682_v1, %v5769_v40  ;;  %4691 = vrsqrt.f32 %v1378_v13  ;;  %v4571_v26 = vld [vmem:[#allocation11 + $0x70] sm:$0xff]  }
 0x4ad   : > { %v1426_v21 = vmul.f32 %v5816_v41, %v1404_v45  ;;  %4693 = vrsqrt.f32 %v1377_v20  ;;  %v4572_v1 = vld [vmem:[#allocation11 + $0x30] sm:$0xff]   ;;  %v5926_v45 = vshrl.u32 %v1481_v30, 7 }
 0x4ae   : > { %v1458_v8 = vpack.c.bf16 %v5867_v0, %v5871_v16  ;;  %v4684_v9 = vpop.eup %4683  ;;  %v1425_v34 = vmul.f32 %v5816_v41, %v1403_v42 }
 0x4af   : > { %v4686_v52 = vpop.eup %4685  ;;  %v5880_v22 = vadd.f32 %v5824_v32, %v1426_v21  ;;  %v1406_v40 = vmul.f32 %v4684_v9, %v5792_v18  ;;  %v7013_v51 = vsub.s32 1, %v5926_v45 }
 0x4b0   : > { %v5884_v5 = vadd.f32 %v5824_v32, %v1425_v34  ;;  %v1405_v3 = vmul.f32 %v4686_v52, %v5779_v39 }
 0x4b1   : > { %1624 = vmatmul.mubr.bf16.gmra.mrb[24].mxu0 %v1457_v49  ;;  %v1428_v17 = vmul.f32 %v5816_v41, %v1406_v40  ;;  %v5939_v27 = vrot.slane %v1479_v19, %v7013_v51 }
 0x4b2   : > { %1633 = vmatprep.mubr.bf16.mxu0 %v7059_v15  ;;  %v1459_v29 = vpack.c.bf16 %v5880_v22, %v5884_v5  ;;  %v4688_v11 = vpop.eup %4687  ;;  %v1427_v43 = vmul.f32 %v5816_v41, %v1405_v3 }
 0x4b3   : > { %v4690_v36 = vpop.eup %4689  ;;  %v5893_v18 = vadd.f32 %v5824_v32, %v1428_v17  ;;  %v1408_v57 = vmul.f32 %v4688_v11, %v5802_v23 }
 0x4b4   : > { %v5897_v39 = vadd.f32 %v5824_v32, %v1427_v43  ;;  %v1407_v33 = vmul.f32 %v4690_v36, %v5789_v35 }
 0x4b5   : > { %v1430_v55 = vmul.f32 %v5816_v41, %v1408_v57 }
 0x4b6   : > { %v1460_v10 = vpack.c.bf16 %v5893_v18, %v5897_v39  ;;  %v4692_v12 = vpop.eup %4691  ;;  %v1429_v31 = vmul.f32 %v5816_v41, %v1407_v33 }
 0x4b7   : > { %v4694_v61 = vpop.eup %4693  ;;  %v5906_v2 = vadd.f32 %v5824_v32, %v1430_v55  ;;  %v1410_v23 = vmul.f32 %v4692_v12, %v5809_v46 }
 0x4b8   : > { %v5910_v44 = vadd.f32 %v5824_v32, %v1429_v31  ;;  %v1409_v35 = vmul.f32 %v4694_v61, %v5799_v60  ;;  %v4570_v60 = vld [vmem:[#allocation11 + $0x28] sm:$0xff]  }
 0x4b9   : > { %1634 = vmatmul.mubr.bf16.gmra.mrb[28].mxu0 %v1458_v8  ;;  %v1432_v49 = vmul.f32 %v5816_v41, %v1410_v23  ;;  %4132 = vmatpush3.bf16.msra.mxu1 %v4570_v60 }
 0x4ba   : > { %1643 = vmatprep.mubr.bf16.mxu0 %v7059_v15  ;;  %v1461_v14 = vpack.c.bf16 %v5906_v2, %v5910_v44  ;;  %v1431_v56 = vmul.f32 %v5816_v41, %v1409_v35  ;;  %4133 = vmatprep.subr.bf16.mxu1 %v4571_v26  ;;  %v4574_v41 = vld [vmem:[#allocation11 + $0x38] sm:$0xff]  }
 0x4bb   : > { %v5919_v38 = vadd.f32 %v5824_v32, %v1432_v49 }
 0x4bc   : > { %v5922_v46 = vadd.f32 %v5824_v32, %v1431_v56  ;;  %v7014_v32 = vsub.s32 0, %v5926_v45 }
 0x4bd   : > { %4134 = vmatpush3.bf16.msra.mxu1 %v4572_v1 }
 0x4be   : > { %v1462_v6 = vpack.c.bf16 %v5919_v38, %v5922_v46  ;;  %4135 = vmatprep.subr.bf16.mxu1 %v4573_v59  ;;  %v5935_v42 = vrot.slane %v1479_v19, %v7014_v32 }
 0x4c1   : > { %1644 = vmatmul.mubr.bf16.gmra.mrb[32].mxu0 %v1459_v29  ;;  %4136 = vmatpush3.bf16.msra.mxu1 %v4574_v41 }
 0x4c2   : > { %1653 = vmatprep.mubr.bf16.mxu0 %v7059_v15 }
 0x4c9   : > { %1654 = vmatmul.mubr.bf16.gmra.mrb[36].mxu0 %v1460_v10 }
 0x4ca   : > { %1663 = vmatprep.mubr.bf16.mxu0 %v7059_v15 }
 0x4d1   : > { %1664 = vmatmul.mubr.bf16.gmra.mrb[40].mxu0 %v1461_v14 }
 0x4d2   : > { %1673 = vmatprep.mubr.bf16.mxu0 %v7059_v15 }
 0x4d9   : > { %1674 = vmatmul.mubr.bf16.gmra.mrb[44].mxu0 %v1462_v6 }
 0x574   : > { %v1605_v8 = vpop.f32.mrb[16].mxu0 }
 0x575   : > { %v1606_v21 = vadd.f32 %v1605_v8, %v5935_v42  ;;  %v1607_v9 = vpop.f32.mrb[17].mxu0 }
 0x576   : > { %v1608_v50 = vadd.f32 %v1607_v9, %v5939_v27  ;;  %v1609_v34 = vpop.f32.mrb[18].mxu0 }
 0x577   : > { %v1610_v52 = vadd.f32 %v1609_v34, %v5935_v42  ;;  %v1611_v13 = vpop.f32.mrb[19].mxu0  ;;  %v1684_v20 = vmax.f32 %v1606_v21, 0.0 }
 0x578   : > { %v1612_v40 = vadd.f32 %v1611_v13, %v5939_v27  ;;  %v1685_v29 = vmax.f32 %v1608_v50, 0.0 }
 0x579   : > { %v1686_v3 = vmax.f32 %v1610_v52, 0.0 }
 0x57a   : > { %v1687_v17 = vmax.f32 %v1612_v40, 0.0 }
 0x57b   : > { %v1716_v11 = vpack.c.bf16 %v1686_v3, %v1684_v20 }
 0x57c   : > { %v1717_v43 = vpack.c.bf16 %v1687_v17, %v1685_v29  ;;  %v1615_v36 = vpop.f32.mrb[20].mxu0 }
 0x57d   : > { %v1616_v57 = vadd.f32 %v1615_v36, %v5935_v42  ;;  %v1617_v33 = vpop.f32.mrb[21].mxu0 }
 0x57e   : > { %v1618_v10 = vadd.f32 %v1617_v33, %v5939_v27  ;;  %v1619_v55 = vpop.f32.mrb[22].mxu0  ;;  %1899 = vmatprep.mubr.bf16.mxu1 %v1717_v43 }
 0x57f   : > { %v1620_v12 = vadd.f32 %v1619_v55, %v5935_v42  ;;  %v1621_v31 = vpop.f32.mrb[23].mxu0  ;;  %1900 = vmatmul.mubr.bf16.vlgmr.msra.gmra.mrb[16].mxu1 %v1716_v11  ;;  %v1688_v23 = vmax.f32 %v1616_v57, 0.0 }
 0x580   : > { %v1622_v61 = vadd.f32 %v1621_v31, %v5939_v27  ;;  %v1689_v14 = vmax.f32 %v1618_v10, 0.0 }
 0x581   : > { %v1690_v35 = vmax.f32 %v1620_v12, 0.0 }
 0x582   : > { %v1691_v49 = vmax.f32 %v1622_v61, 0.0 }
 0x583   : > { %v1718_v56 = vpack.c.bf16 %v1690_v35, %v1688_v23 }
 0x584   : > { %v1719_v6 = vpack.c.bf16 %v1691_v49, %v1689_v14  ;;  %v1625_v60 = vpop.f32.mrb[24].mxu0 }
 0x585   : > { %v1626_v26 = vadd.f32 %v1625_v60, %v5935_v42  ;;  %v1627_v1 = vpop.f32.mrb[25].mxu0 }
 0x586   : > { %v1628_v59 = vadd.f32 %v1627_v1, %v5939_v27  ;;  %v1629_v41 = vpop.f32.mrb[26].mxu0  ;;  %1907 = vmatprep.mubr.bf16.mxu1 %v1719_v6 }
 0x587   : > { %v1630_v30 = vadd.f32 %v1629_v41, %v5935_v42  ;;  %v1631_v19 = vpop.f32.mrb[27].mxu0  ;;  %1908 = vmatmul.mubr.bf16.gmra.mrb[20].mxu1 %v1718_v56  ;;  %v1692_v21 = vmax.f32 %v1626_v26, 0.0 }
 0x588   : > { %v1632_v8 = vadd.f32 %v1631_v19, %v5939_v27  ;;  %v1693_v50 = vmax.f32 %v1628_v59, 0.0 }
 0x589   : > { %v1694_v9 = vmax.f32 %v1630_v30, 0.0 }
 0x58a   : > { %v1695_v34 = vmax.f32 %v1632_v8, 0.0 }
 0x58b   : > { %v1720_v52 = vpack.c.bf16 %v1694_v9, %v1692_v21 }
 0x58c   : > { %v1721_v13 = vpack.c.bf16 %v1695_v34, %v1693_v50  ;;  %v1635_v40 = vpop.f32.mrb[28].mxu0 }
 0x58d   : > { %v1636_v20 = vadd.f32 %v1635_v40, %v5935_v42  ;;  %v1637_v3 = vpop.f32.mrb[29].mxu0 }
 0x58e   : > { %v1638_v29 = vadd.f32 %v1637_v3, %v5939_v27  ;;  %v1639_v17 = vpop.f32.mrb[30].mxu0  ;;  %1915 = vmatprep.mubr.bf16.mxu1 %v1721_v13 }
 0x58f   : > { %v1640_v11 = vadd.f32 %v1639_v17, %v5935_v42  ;;  %v1641_v43 = vpop.f32.mrb[31].mxu0  ;;  %1916 = vmatmul.mubr.bf16.gmra.mrb[24].mxu1 %v1720_v52  ;;  %v1696_v57 = vmax.f32 %v1636_v20, 0.0 }
 0x590   : > { %v1642_v36 = vadd.f32 %v1641_v43, %v5939_v27  ;;  %v1697_v10 = vmax.f32 %v1638_v29, 0.0 }
 0x591   : > { %v1698_v33 = vmax.f32 %v1640_v11, 0.0 }
 0x592   : > { %v1699_v55 = vmax.f32 %v1642_v36, 0.0 }
 0x593   : > { %v1722_v12 = vpack.c.bf16 %v1698_v33, %v1696_v57 }
 0x594   : > { %v1723_v31 = vpack.c.bf16 %v1699_v55, %v1697_v10  ;;  %v1645_v61 = vpop.f32.mrb[32].mxu0 }
 0x595   : > { %v1646_v23 = vadd.f32 %v1645_v61, %v5935_v42  ;;  %v1647_v35 = vpop.f32.mrb[33].mxu0 }
 0x596   : > { %v1648_v14 = vadd.f32 %v1647_v35, %v5939_v27  ;;  %v1649_v49 = vpop.f32.mrb[34].mxu0  ;;  %1923 = vmatprep.mubr.bf16.mxu1 %v1723_v31 }
 0x597   : > { %v1650_v56 = vadd.f32 %v1649_v49, %v5935_v42  ;;  %v1651_v6 = vpop.f32.mrb[35].mxu0  ;;  %1924 = vmatmul.mubr.bf16.gmra.mrb[28].mxu1 %v1722_v12  ;;  %v1700_v26 = vmax.f32 %v1646_v23, 0.0 }
 0x598   : > { %v1652_v60 = vadd.f32 %v1651_v6, %v5939_v27  ;;  %v1701_v59 = vmax.f32 %v1648_v14, 0.0 }
 0x599   : > { %v1702_v1 = vmax.f32 %v1650_v56, 0.0 }
 0x59a   : > { %v1703_v41 = vmax.f32 %v1652_v60, 0.0 }
 0x59b   : > { %v1724_v30 = vpack.c.bf16 %v1702_v1, %v1700_v26 }
 0x59c   : > { %v1725_v19 = vpack.c.bf16 %v1703_v41, %v1701_v59  ;;  %v1655_v8 = vpop.f32.mrb[36].mxu0 }
 0x59d   : > { %v1656_v21 = vadd.f32 %v1655_v8, %v5935_v42  ;;  %v1657_v9 = vpop.f32.mrb[37].mxu0 }
 0x59e   : > { %v1658_v50 = vadd.f32 %v1657_v9, %v5939_v27  ;;  %v1659_v34 = vpop.f32.mrb[38].mxu0  ;;  %1931 = vmatprep.mubr.bf16.mxu1 %v1725_v19 }
 0x59f   : > { %v1660_v52 = vadd.f32 %v1659_v34, %v5935_v42  ;;  %v1661_v13 = vpop.f32.mrb[39].mxu0  ;;  %1932 = vmatmul.mubr.bf16.gmra.mrb[32].mxu1 %v1724_v30  ;;  %v1704_v20 = vmax.f32 %v1656_v21, 0.0 }
 0x5a0   : > { %v1662_v40 = vadd.f32 %v1661_v13, %v5939_v27  ;;  %v1705_v29 = vmax.f32 %v1658_v50, 0.0 }
 0x5a1   : > { %v1706_v3 = vmax.f32 %v1660_v52, 0.0 }
 0x5a2   : > { %v1707_v17 = vmax.f32 %v1662_v40, 0.0 }
 0x5a3   : > { %v1726_v11 = vpack.c.bf16 %v1706_v3, %v1704_v20  ;;  %v5976_v20 = vld [vmem:[%s6973_s11] ss:$0 sm:$0xff] }
 0x5a4   : > { %v1727_v43 = vpack.c.bf16 %v1707_v17, %v1705_v29  ;;  %v1665_v36 = vpop.f32.mrb[40].mxu0 }
 0x5a5   : > { %v1666_v57 = vadd.f32 %v1665_v36, %v5935_v42  ;;  %v1667_v33 = vpop.f32.mrb[41].mxu0 }
 0x5a6   : > { %v1668_v10 = vadd.f32 %v1667_v33, %v5939_v27  ;;  %v1669_v55 = vpop.f32.mrb[42].mxu0  ;;  %1939 = vmatprep.mubr.bf16.mxu1 %v1727_v43 }
 0x5a7   : > { %v1670_v12 = vadd.f32 %v1669_v55, %v5935_v42  ;;  %v1671_v31 = vpop.f32.mrb[43].mxu0  ;;  %1940 = vmatmul.mubr.bf16.gmra.mrb[36].mxu1 %v1726_v11  ;;  %v1708_v23 = vmax.f32 %v1666_v57, 0.0 }
 0x5a8   : > { %v1672_v61 = vadd.f32 %v1671_v31, %v5939_v27  ;;  %v1709_v14 = vmax.f32 %v1668_v10, 0.0 }
 0x5a9   : > { %v1710_v35 = vmax.f32 %v1670_v12, 0.0 }
 0x5aa   : > { %v1711_v49 = vmax.f32 %v1672_v61, 0.0 }
 0x5ab   : > { %v1728_v56 = vpack.c.bf16 %v1710_v35, %v1708_v23 }
 0x5ac   : > { %v1729_v6 = vpack.c.bf16 %v1711_v49, %v1709_v14  ;;  %v1675_v60 = vpop.f32.mrb[44].mxu0 }
 0x5ad   : > { %v1676_v26 = vadd.f32 %v1675_v60, %v5935_v42  ;;  %v1677_v1 = vpop.f32.mrb[45].mxu0 }
 0x5ae   : > { %v1678_v59 = vadd.f32 %v1677_v1, %v5939_v27  ;;  %v1679_v41 = vpop.f32.mrb[46].mxu0  ;;  %1947 = vmatprep.mubr.bf16.mxu1 %v1729_v6 }
 0x5af   : > { %v1680_v30 = vadd.f32 %v1679_v41, %v5935_v42  ;;  %v1681_v19 = vpop.f32.mrb[47].mxu0  ;;  %1948 = vmatmul.mubr.bf16.gmra.mrb[40].mxu1 %v1728_v56  ;;  %v1712_v21 = vmax.f32 %v1676_v26, 0.0 }
 0x5b0   : > { %v1682_v8 = vadd.f32 %v1681_v19, %v5939_v27  ;;  %v1713_v50 = vmax.f32 %v1678_v59, 0.0 }
 0x5b1   : > { %v1714_v9 = vmax.f32 %v1680_v30, 0.0 }
 0x5b2   : > { %v1715_v34 = vmax.f32 %v1682_v8, 0.0 }
 0x5b3   : > { %v1730_v52 = vpack.c.bf16 %v1714_v9, %v1712_v21 }
 0x5b4   : > { %v1731_v13 = vpack.c.bf16 %v1715_v34, %v1713_v50 }
 0x5b6   : > { %1955 = vmatprep.mubr.bf16.mxu1 %v1731_v13 }
 0x5b7   : > { %1956 = vmatmul.mubr.bf16.gmra.mrb[44].mxu1 %v1730_v52 }
 0x652   : > { %v4137_v40 = vpop.f32.mrb[16].mxu1 }
 0x653   : > { %v4138_v3 = vpop.f32.mrb[17].mxu1 }
 0x654   : > { %v4139_v42 = vadd.f32 %v4138_v3, %v4137_v40  ;;  %v4140_v29 = vpop.f32.mrb[18].mxu1 }
 0x655   : > { %v4141_v17 = vpop.f32.mrb[19].mxu1 }
 0x656   : > { %v1902_v27 = vadd.f32 %v4139_v42, %v5976_v20  ;;  %v4142_v11 = vadd.f32 %v4141_v17, %v4140_v29 }
 0x658   : > { %v1905_v43 = vadd.f32 %v4142_v11, %v5976_v20  ;;  %v5981_v36 = vadd.f32 %v1902_v27, %v5828_v28 }
 0x65a   : > { %1982 = vadd.xlane.f32.xlu1 %v5981_v36  ;;  %v4143_v57 = vpop.f32.mrb[20].mxu1  ;;  %v5985_v33 = vadd.f32 %v1905_v43, %v5831_v24 }
 0x65b   : > { %v4144_v10 = vpop.f32.mrb[21].mxu1 }
 0x65c   : > { %v4145_v55 = vadd.f32 %v4144_v10, %v4143_v57  ;;  %1984 = vadd.xlane.f32.xlu0 %v5985_v33  ;;  %v4146_v12 = vpop.f32.mrb[22].mxu1 }
 0x65d   : > { %v4147_v31 = vpop.f32.mrb[23].mxu1 }
 0x65e   : > { %v1910_v61 = vadd.f32 %v4145_v55, %v5976_v20  ;;  %v4148_v23 = vadd.f32 %v4147_v31, %v4146_v12 }
 0x660   : > { %v1913_v35 = vadd.f32 %v4148_v23, %v5976_v20  ;;  %v5991_v28 = vadd.f32 %v1910_v61, %v5844_v37 }
 0x662   : > { %1986 = vadd.xlane.f32.xlu1 %v5991_v28  ;;  %v4149_v14 = vpop.f32.mrb[24].mxu1  ;;  %v5995_v24 = vadd.f32 %v1913_v35, %v5841_v25 }
 0x663   : > { %v4150_v49 = vpop.f32.mrb[25].mxu1 }
 0x664   : > { %v4151_v56 = vadd.f32 %v4150_v49, %v4149_v14  ;;  %1988 = vadd.xlane.f32.xlu0 %v5995_v24  ;;  %v4152_v6 = vpop.f32.mrb[26].mxu1 }
 0x665   : > { %v4153_v60 = vpop.f32.mrb[27].mxu1 }
 0x666   : > { %v1918_v26 = vadd.f32 %v4151_v56, %v5976_v20  ;;  %v4154_v1 = vadd.f32 %v4153_v60, %v4152_v6 }
 0x668   : > { %v1921_v59 = vadd.f32 %v4154_v1, %v5976_v20  ;;  %v6001_v37 = vadd.f32 %v1918_v26, %v5858_v4 }
 0x66a   : > { %1990 = vadd.xlane.f32.xlu1 %v6001_v37  ;;  %v4155_v41 = vpop.f32.mrb[28].mxu1  ;;  %v6005_v25 = vadd.f32 %v1921_v59, %v5854_v58 }
 0x66b   : > { %v4156_v30 = vpop.f32.mrb[29].mxu1 }
 0x66c   : > { %v4157_v19 = vadd.f32 %v4156_v30, %v4155_v41  ;;  %1992 = vadd.xlane.f32.xlu0 %v6005_v25  ;;  %v4158_v8 = vpop.f32.mrb[30].mxu1 }
 0x66d   : > { %v4159_v21 = vpop.f32.mrb[31].mxu1 }
 0x66e   : > { %v1926_v9 = vadd.f32 %v4157_v19, %v5976_v20  ;;  %v4160_v50 = vadd.f32 %v4159_v21, %v4158_v8 }
 0x670   : > { %v1929_v34 = vadd.f32 %v4160_v50, %v5976_v20  ;;  %v6011_v4 = vadd.f32 %v1926_v9, %v5871_v16 }
 0x672   : > { %1994 = vadd.xlane.f32.xlu1 %v6011_v4  ;;  %v4161_v52 = vpop.f32.mrb[32].mxu1  ;;  %v6015_v58 = vadd.f32 %v1929_v34, %v5867_v0 }
 0x673   : > { %v4162_v13 = vpop.f32.mrb[33].mxu1 }
 0x674   : > { %v4163_v40 = vadd.f32 %v4162_v13, %v4161_v52  ;;  %1996 = vadd.xlane.f32.xlu0 %v6015_v58  ;;  %v4164_v3 = vpop.f32.mrb[34].mxu1 }
 0x675   : > { %v4165_v42 = vpop.f32.mrb[35].mxu1 }
 0x676   : > { %v1934_v29 = vadd.f32 %v4163_v40, %v5976_v20  ;;  %v4166_v17 = vadd.f32 %v4165_v42, %v4164_v3 }
 0x678   : > { %v1937_v27 = vadd.f32 %v4166_v17, %v5976_v20  ;;  %v6021_v16 = vadd.f32 %v1934_v29, %v5884_v5 }
 0x67a   : > { %1998 = vadd.xlane.f32.xlu1 %v6021_v16  ;;  %v4167_v11 = vpop.f32.mrb[36].mxu1  ;;  %v6025_v0 = vadd.f32 %v1937_v27, %v5880_v22 }
 0x67b   : > { %v4168_v43 = vpop.f32.mrb[37].mxu1 }
 0x67c   : > { %v4169_v57 = vadd.f32 %v4168_v43, %v4167_v11  ;;  %2000 = vadd.xlane.f32.xlu0 %v6025_v0  ;;  %v4170_v10 = vpop.f32.mrb[38].mxu1 }
 0x67d   : > { %v4171_v55 = vpop.f32.mrb[39].mxu1 }
 0x67e   : > { %v1942_v12 = vadd.f32 %v4169_v57, %v5976_v20  ;;  %v4172_v31 = vadd.f32 %v4171_v55, %v4170_v10 }
 0x680   : > { %v1945_v61 = vadd.f32 %v4172_v31, %v5976_v20  ;;  %v6031_v5 = vadd.f32 %v1942_v12, %v5897_v39 }
 0x682   : > { %2002 = vadd.xlane.f32.xlu1 %v6031_v5  ;;  %v4173_v23 = vpop.f32.mrb[40].mxu1  ;;  %v6035_v22 = vadd.f32 %v1945_v61, %v5893_v18 }
 0x683   : > { %v4174_v35 = vpop.f32.mrb[41].mxu1 }
 0x684   : > { %v4175_v14 = vadd.f32 %v4174_v35, %v4173_v23  ;;  %2004 = vadd.xlane.f32.xlu0 %v6035_v22  ;;  %v4176_v49 = vpop.f32.mrb[42].mxu1 }
 0x685   : > { %v4177_v56 = vpop.f32.mrb[43].mxu1 }
 0x686   : > { %v1950_v6 = vadd.f32 %v4175_v14, %v5976_v20  ;;  %v4178_v60 = vadd.f32 %v4177_v56, %v4176_v49 }
 0x688   : > { %v1953_v26 = vadd.f32 %v4178_v60, %v5976_v20  ;;  %v6041_v39 = vadd.f32 %v1950_v6, %v5910_v44 }
 0x68a   : > { %2006 = vadd.xlane.f32.xlu1 %v6041_v39  ;;  %v4179_v1 = vpop.f32.mrb[44].mxu1  ;;  %v6045_v18 = vadd.f32 %v1953_v26, %v5906_v2 }
 0x68b   : > { %v4180_v59 = vpop.f32.mrb[45].mxu1 }
 0x68c   : > { %v4181_v41 = vadd.f32 %v4180_v59, %v4179_v1  ;;  %2008 = vadd.xlane.f32.xlu0 %v6045_v18  ;;  %v4182_v30 = vpop.f32.mrb[46].mxu1 }
 0x68d   : > { %v4183_v19 = vpop.f32.mrb[47].mxu1 }
 0x68e   : > { %v1958_v8 = vadd.f32 %v4181_v41, %v5976_v20  ;;  %v4184_v21 = vadd.f32 %v4183_v19, %v4182_v30 }
 0x690   : > { %v1961_v9 = vadd.f32 %v4184_v21, %v5976_v20  ;;  %v6051_v44 = vadd.f32 %v1958_v8, %v5922_v46 }
 0x692   : > { %2010 = vadd.xlane.f32.xlu1 %v6051_v44  ;;  %v6055_v50 = vadd.f32 %v1961_v9, %v5919_v38 }
 0x694   : > { %2012 = vadd.xlane.f32.xlu0 %v6055_v50 }
 0x6e7   : > { %v1983_v2 = vpop.xlane.xlu1 %1982 }
 0x6e8   : > { %v2014_v34 = vmul.f32 0.0078125, %v1983_v2 }
 0x6e9   : > { %v1985_v52 = vpop.xlane.xlu0 %1984 }
 0x6ea   : > { %v6059_v13 = vsub.f32 %v5981_v36, %v2014_v34  ;;  %v2015_v40 = vmul.f32 0.0078125, %v1985_v52 }
 0x6ec   : > { %v6062_v3 = vsub.f32 %v5985_v33, %v2015_v40  ;;  %v2046_v46 = vmul.f32 %v6059_v13, %v6059_v13 }
 0x6ee   : > { %2062 = vadd.xlane.f32.xlu1 %v2046_v46  ;;  %v2047_v38 = vmul.f32 %v6062_v3, %v6062_v3 }
 0x6ef   : > { %v1987_v20 = vpop.xlane.xlu1 %1986 }
 0x6f0   : > { %v2016_v42 = vmul.f32 0.0078125, %v1987_v20  ;;  %2064 = vadd.xlane.f32.xlu0 %v2047_v38 }
 0x6f1   : > { %v1989_v29 = vpop.xlane.xlu0 %1988 }
 0x6f2   : > { %v6069_v17 = vsub.f32 %v5991_v28, %v2016_v42  ;;  %v2017_v36 = vmul.f32 0.0078125, %v1989_v29 }
 0x6f4   : > { %v6072_v27 = vsub.f32 %v5995_v24, %v2017_v36  ;;  %v2048_v33 = vmul.f32 %v6069_v17, %v6069_v17 }
 0x6f6   : > { %2066 = vadd.xlane.f32.xlu1 %v2048_v33  ;;  %v2049_v11 = vmul.f32 %v6072_v27, %v6072_v27 }
 0x6f7   : > { %v1991_v43 = vpop.xlane.xlu1 %1990 }
 0x6f8   : > { %v2018_v57 = vmul.f32 0.0078125, %v1991_v43  ;;  %2068 = vadd.xlane.f32.xlu0 %v2049_v11 }
 0x6f9   : > { %v1993_v10 = vpop.xlane.xlu0 %1992 }
 0x6fa   : > { %v6079_v55 = vsub.f32 %v6001_v37, %v2018_v57  ;;  %v2019_v28 = vmul.f32 0.0078125, %v1993_v10  ;;  %v4575_v57 = vld [vmem:[#allocation2 + $0x40] sm:$0xff]  }
 0x6fb   : > { %4361 = vmatprep.mubr.bf16.mxu0 %v4575_v57 }
 0x6fc   : > { %v6082_v12 = vsub.f32 %v6005_v25, %v2019_v28  ;;  %v2050_v24 = vmul.f32 %v6079_v55, %v6079_v55 }
 0x6fe   : > { %2070 = vadd.xlane.f32.xlu1 %v2050_v24  ;;  %v2051_v31 = vmul.f32 %v6082_v12, %v6082_v12 }
 0x6ff   : > { %v1995_v61 = vpop.xlane.xlu1 %1994 }
 0x700   : > { %v2020_v23 = vmul.f32 0.0078125, %v1995_v61  ;;  %2072 = vadd.xlane.f32.xlu0 %v2051_v31 }
 0x701   : > { %v1997_v35 = vpop.xlane.xlu0 %1996 }
 0x702   : > { %v6089_v14 = vsub.f32 %v6011_v4, %v2020_v23  ;;  %v2021_v37 = vmul.f32 0.0078125, %v1997_v35 }
 0x704   : > { %v6092_v49 = vsub.f32 %v6015_v58, %v2021_v37  ;;  %v2052_v25 = vmul.f32 %v6089_v14, %v6089_v14 }
 0x706   : > { %2074 = vadd.xlane.f32.xlu1 %v2052_v25  ;;  %v2053_v56 = vmul.f32 %v6092_v49, %v6092_v49 }
 0x707   : > { %v1999_v6 = vpop.xlane.xlu1 %1998 }
 0x708   : > { %v2022_v60 = vmul.f32 0.0078125, %v1999_v6  ;;  %2076 = vadd.xlane.f32.xlu0 %v2053_v56 }
 0x709   : > { %v2001_v26 = vpop.xlane.xlu0 %2000 }
 0x70a   : > { %v6099_v1 = vsub.f32 %v6021_v16, %v2022_v60  ;;  %v2023_v4 = vmul.f32 0.0078125, %v2001_v26  ;;  %v6141_v60 = vld [vmem:[%s6974_s12] ss:$0 sm:$0xff] }
 0x70c   : > { %v6102_v59 = vsub.f32 %v6025_v0, %v2023_v4  ;;  %v2054_v58 = vmul.f32 %v6099_v1, %v6099_v1 }
 0x70e   : > { %2078 = vadd.xlane.f32.xlu1 %v2054_v58  ;;  %v2055_v41 = vmul.f32 %v6102_v59, %v6102_v59 }
 0x70f   : > { %v2003_v30 = vpop.xlane.xlu1 %2002 }
 0x710   : > { %v2024_v19 = vmul.f32 0.0078125, %v2003_v30  ;;  %2080 = vadd.xlane.f32.xlu0 %v2055_v41  ;;  %v6147_v30 = vld [vmem:[%s7060_s25] ss:$0 sm:$0xff] }
 0x711   : > { %v2005_v8 = vpop.xlane.xlu0 %2004 }
 0x712   : > { %v6109_v21 = vsub.f32 %v6031_v5, %v2024_v19  ;;  %v2025_v16 = vmul.f32 0.0078125, %v2005_v8 }
 0x714   : > { %v6112_v9 = vsub.f32 %v6035_v22, %v2025_v16  ;;  %v2056_v0 = vmul.f32 %v6109_v21, %v6109_v21 }
 0x716   : > { %2082 = vadd.xlane.f32.xlu1 %v2056_v0  ;;  %v2057_v2 = vmul.f32 %v6112_v9, %v6112_v9 }
 0x717   : > { %v2007_v34 = vpop.xlane.xlu1 %2006 }
 0x718   : > { %v2026_v52 = vmul.f32 0.0078125, %v2007_v34  ;;  %2084 = vadd.xlane.f32.xlu0 %v2057_v2 }
 0x719   : > { %v2009_v40 = vpop.xlane.xlu0 %2008 }
 0x71a   : > { %v6119_v46 = vsub.f32 %v6041_v39, %v2026_v52  ;;  %v2027_v5 = vmul.f32 0.0078125, %v2009_v40 }
 0x71c   : > { %v6122_v38 = vsub.f32 %v6045_v18, %v2027_v5  ;;  %v2058_v22 = vmul.f32 %v6119_v46, %v6119_v46 }
 0x71e   : > { %2086 = vadd.xlane.f32.xlu1 %v2058_v22  ;;  %v2059_v20 = vmul.f32 %v6122_v38, %v6122_v38 }
 0x71f   : > { %v2011_v42 = vpop.xlane.xlu1 %2010 }
 0x720   : > { %v2028_v29 = vmul.f32 0.0078125, %v2011_v42  ;;  %2088 = vadd.xlane.f32.xlu0 %v2059_v20 }
 0x721   : > { %v2013_v36 = vpop.xlane.xlu0 %2012 }
 0x722   : > { %v6129_v33 = vsub.f32 %v6051_v44, %v2028_v29  ;;  %v2029_v39 = vmul.f32 0.0078125, %v2013_v36 }
 0x724   : > { %v6132_v11 = vsub.f32 %v6055_v50, %v2029_v39  ;;  %v2060_v18 = vmul.f32 %v6129_v33, %v6129_v33 }
 0x726   : > { %2090 = vadd.xlane.f32.xlu1 %v2060_v18  ;;  %v2061_v43 = vmul.f32 %v6132_v11, %v6132_v11 }
 0x728   : > { %2092 = vadd.xlane.f32.xlu0 %v2061_v43 }
 0x77b   : > { %v2063_v10 = vpop.xlane.xlu1 %2062 }
 0x77c   : > { %v2094_v28 = vmul.f32 0.0078125, %v2063_v10 }
 0x77d   : > { %v2065_v24 = vpop.xlane.xlu0 %2064 }
 0x77e   : > { %v2110_v31 = vadd.f32 1e-05, %v2094_v28  ;;  %v2095_v44 = vmul.f32 0.0078125, %v2065_v24 }
 0x780   : > { %4695 = vrsqrt.f32 %v2110_v31  ;;  %v2111_v61 = vadd.f32 1e-05, %v2095_v44 }
 0x782   : > { %4697 = vrsqrt.f32 %v2111_v61 }
 0x783   : > { %v2067_v50 = vpop.xlane.xlu1 %2066 }
 0x784   : > { %v2096_v23 = vmul.f32 0.0078125, %v2067_v50 }
 0x785   : > { %v2069_v35 = vpop.xlane.xlu0 %2068 }
 0x786   : > { %v2112_v37 = vadd.f32 1e-05, %v2096_v23  ;;  %v2097_v25 = vmul.f32 0.0078125, %v2069_v35 }
 0x788   : > { %4699 = vrsqrt.f32 %v2112_v37  ;;  %v2113_v56 = vadd.f32 1e-05, %v2097_v25 }
 0x78a   : > { %v4696_v6 = vpop.eup %4695  ;;  %4701 = vrsqrt.f32 %v2113_v56 }
 0x78b   : > { %v2071_v26 = vpop.xlane.xlu1 %2070  ;;  %v2142_v4 = vmul.f32 %v4696_v6, %v6059_v13 }
 0x78c   : > { %v4698_v58 = vpop.eup %4697  ;;  %v2098_v41 = vmul.f32 0.0078125, %v2071_v26 }
 0x78d   : > { %v2073_v19 = vpop.xlane.xlu0 %2072  ;;  %v2143_v8 = vmul.f32 %v4698_v58, %v6062_v3  ;;  %v2164_v16 = vmul.f32 %v6141_v60, %v2142_v4 }
 0x78e   : > { %v2114_v0 = vadd.f32 1e-05, %v2098_v41  ;;  %v2099_v2 = vmul.f32 0.0078125, %v2073_v19 }
 0x78f   : > { %v2165_v34 = vmul.f32 %v6141_v60, %v2143_v8  ;;  %v2186_v52 = vadd.f32 %v6147_v30, %v2164_v16 }
 0x790   : > { %4703 = vrsqrt.f32 %v2114_v0  ;;  %v2115_v13 = vadd.f32 1e-05, %v2099_v2 }
 0x791   : > { %v2187_v40 = vadd.f32 %v6147_v30, %v2165_v34  ;;  %v6155_v20 = vmul.f32 %v2186_v52, %v5446_v48 }
 0x792   : > { %v4700_v5 = vpop.eup %4699  ;;  %4705 = vrsqrt.f32 %v2115_v13 }
 0x793   : > { %v2075_v22 = vpop.xlane.xlu1 %2074  ;;  %v6158_v3 = vmul.f32 %v2187_v40, %v5454_v54  ;;  %v2144_v42 = vmul.f32 %v4700_v5, %v6069_v17 }
 0x794   : > { %v4702_v29 = vpop.eup %4701  ;;  %v2100_v36 = vmul.f32 0.0078125, %v2075_v22 }
 0x795   : > { %v2077_v39 = vpop.xlane.xlu0 %2076  ;;  %v2235_v18 = vpack.c.bf16 %v6158_v3, %v6155_v20  ;;  %v2145_v43 = vmul.f32 %v4702_v29, %v6072_v27  ;;  %v2166_v57 = vmul.f32 %v6141_v60, %v2144_v42 }
 0x796   : > { %v2116_v10 = vadd.f32 1e-05, %v2100_v36  ;;  %v2101_v28 = vmul.f32 0.0078125, %v2077_v39 }
 0x797   : > { %4345 = vmatprep.subr.bf16.mxu0 %v2235_v18  ;;  %v2167_v24 = vmul.f32 %v6141_v60, %v2145_v43  ;;  %v2188_v31 = vadd.f32 %v6147_v30, %v2166_v57 }
 0x798   : > { %4707 = vrsqrt.f32 %v2116_v10  ;;  %v2117_v44 = vadd.f32 1e-05, %v2101_v28  ;;  %4346 = vmatpush3.bf16.msra.mxu0 %v2235_v18 }
 0x799   : > { %v2189_v17 = vadd.f32 %v6147_v30, %v2167_v24  ;;  %v6169_v23 = vmul.f32 %v2188_v31, %v5444_v47 }
 0x79a   : > { %v4704_v61 = vpop.eup %4703  ;;  %4709 = vrsqrt.f32 %v2117_v44 }
 0x79b   : > { %v2079_v50 = vpop.xlane.xlu1 %2078  ;;  %v6172_v27 = vmul.f32 %v2189_v17, %v5452_v53  ;;  %v2146_v35 = vmul.f32 %v4704_v61, %v6079_v55 }
 0x79c   : > { %v4706_v37 = vpop.eup %4705  ;;  %v2102_v25 = vmul.f32 0.0078125, %v2079_v50 }
 0x79d   : > { %v2081_v56 = vpop.xlane.xlu0 %2080  ;;  %v2236_v6 = vpack.c.bf16 %v6172_v27, %v6169_v23  ;;  %v2147_v26 = vmul.f32 %v4706_v37, %v6082_v12  ;;  %v2168_v4 = vmul.f32 %v6141_v60, %v2146_v35 }
 0x79e   : > { %v2118_v58 = vadd.f32 1e-05, %v2102_v25  ;;  %v2103_v41 = vmul.f32 0.0078125, %v2081_v56 }
 0x79f   : > { %4347 = vmatprep.subr.bf16.mxu0 %v2236_v6  ;;  %v2169_v19 = vmul.f32 %v6141_v60, %v2147_v26  ;;  %v2190_v8 = vadd.f32 %v6147_v30, %v2168_v4 }
 0x7a0   : > { %4711 = vrsqrt.f32 %v2118_v58  ;;  %v2119_v16 = vadd.f32 1e-05, %v2103_v41  ;;  %4348 = vmatpush3.bf16.msra.mxu0 %v2236_v6 }
 0x7a1   : > { %v2191_v55 = vadd.f32 %v6147_v30, %v2169_v19  ;;  %v6183_v34 = vmul.f32 %v2190_v8, %v5474_v63  ;;  %v7062_v8 = vld [vmem:[#allocation32_spill] sm:$0xff] }
 0x7a2   : > { %v4708_v0 = vpop.eup %4707  ;;  %4713 = vrsqrt.f32 %v2119_v16 }
 0x7a3   : > { %v2083_v2 = vpop.xlane.xlu1 %2082  ;;  %v6186_v12 = vmul.f32 %v2191_v55, %v5472_v62  ;;  %v2148_v52 = vmul.f32 %v4708_v0, %v6089_v14 }
 0x7a4   : > { %v4710_v13 = vpop.eup %4709  ;;  %v2104_v40 = vmul.f32 0.0078125, %v2083_v2 }
 0x7a5   : > { %v2085_v5 = vpop.xlane.xlu0 %2084  ;;  %v2237_v22 = vpack.c.bf16 %v6186_v12, %v6183_v34  ;;  %v2149_v42 = vmul.f32 %v4710_v13, %v6092_v49  ;;  %v2170_v29 = vmul.f32 %v6141_v60, %v2148_v52  ;;  %v7061_v49 = vld [vmem:[#allocation29_spill] sm:$0xff] }
 0x7a6   : > { %v2120_v36 = vadd.f32 1e-05, %v2104_v40  ;;  %v2105_v39 = vmul.f32 0.0078125, %v2085_v5 }
 0x7a7   : > { %4349 = vmatprep.subr.bf16.mxu0 %v2237_v22  ;;  %v2171_v18 = vmul.f32 %v6141_v60, %v2149_v42  ;;  %v2192_v43 = vadd.f32 %v6147_v30, %v2170_v29 }
 0x7a8   : > { %4715 = vrsqrt.f32 %v2120_v36  ;;  %v2121_v57 = vadd.f32 1e-05, %v2105_v39  ;;  %4350 = vmatpush3.bf16.msra.mxu0 %v2237_v22 }
 0x7a9   : > { %v2193_v14 = vadd.f32 %v6147_v30, %v2171_v18  ;;  %v6197_v24 = vmul.f32 %v2192_v43, %v5488_v7 }
 0x7aa   : > { %v4712_v10 = vpop.eup %4711  ;;  %4717 = vrsqrt.f32 %v2121_v57  ;;  %v7064_v57 = vld [vmem:[#allocation34_spill] sm:$0xff] }
 0x7ab   : > { %v2087_v28 = vpop.xlane.xlu1 %2086  ;;  %v6200_v31 = vmul.f32 %v2193_v14, %v7061_v49  ;;  %v2150_v44 = vmul.f32 %v4712_v10, %v6099_v1 }
 0x7ac   : > { %v4714_v17 = vpop.eup %4713  ;;  %v2106_v61 = vmul.f32 0.0078125, %v2087_v28 }
 0x7ad   : > { %v2089_v50 = vpop.xlane.xlu0 %2088  ;;  %v2238_v35 = vpack.c.bf16 %v6200_v31, %v6197_v24  ;;  %v2151_v37 = vmul.f32 %v4714_v17, %v6102_v59  ;;  %v2172_v25 = vmul.f32 %v6141_v60, %v2150_v44  ;;  %v7063_v59 = vld [vmem:[#allocation31_spill] sm:$0xff] }
 0x7ae   : > { %v2122_v56 = vadd.f32 1e-05, %v2106_v61  ;;  %v2107_v6 = vmul.f32 0.0078125, %v2089_v50 }
 0x7af   : > { %4351 = vmatprep.subr.bf16.mxu0 %v2238_v35  ;;  %v2173_v26 = vmul.f32 %v6141_v60, %v2151_v37  ;;  %v2194_v4 = vadd.f32 %v6147_v30, %v2172_v25 }
 0x7b0   : > { %4719 = vrsqrt.f32 %v2122_v56  ;;  %v2123_v58 = vadd.f32 1e-05, %v2107_v6  ;;  %4352 = vmatpush3.bf16.msra.mxu0 %v2238_v35  ;;  %v7066_v6 = vld [vmem:[#allocation36_spill] sm:$0xff] }
 0x7b1   : > { %v2195_v1 = vadd.f32 %v6147_v30, %v2173_v26  ;;  %v6211_v16 = vmul.f32 %v2194_v4, %v7062_v8 }
 0x7b2   : > { %v4716_v41 = vpop.eup %4715  ;;  %4721 = vrsqrt.f32 %v2123_v58 }
 0x7b3   : > { %v2091_v19 = vpop.xlane.xlu1 %2090  ;;  %v6214_v55 = vmul.f32 %v2195_v1, %v7063_v59  ;;  %v2152_v0 = vmul.f32 %v4716_v41, %v6109_v21 }
 0x7b4   : > { %v4718_v2 = vpop.eup %4717  ;;  %v2108_v52 = vmul.f32 0.0078125, %v2091_v19 }
 0x7b5   : > { %v2093_v13 = vpop.xlane.xlu0 %2092  ;;  %v2239_v40 = vpack.c.bf16 %v6214_v55, %v6211_v16  ;;  %v2153_v5 = vmul.f32 %v4718_v2, %v6112_v9  ;;  %v2174_v22 = vmul.f32 %v6141_v60, %v2152_v0  ;;  %v7065_v9 = vld [vmem:[#allocation33_spill] sm:$0xff] }
 0x7b6   : > { %v2124_v42 = vadd.f32 1e-05, %v2108_v52  ;;  %v2109_v29 = vmul.f32 0.0078125, %v2093_v13  ;;  %v7068_v13 = vld [vmem:[#allocation38_spill] sm:$0xff] }
 0x7b7   : > { %4353 = vmatprep.subr.bf16.mxu0 %v2239_v40  ;;  %v2175_v36 = vmul.f32 %v6141_v60, %v2153_v5  ;;  %v2196_v39 = vadd.f32 %v6147_v30, %v2174_v22 }
 0x7b8   : > { %4723 = vrsqrt.f32 %v2124_v42  ;;  %v2125_v18 = vadd.f32 1e-05, %v2109_v29  ;;  %4354 = vmatpush3.bf16.msra.mxu0 %v2239_v40  ;;  %v4577_v42 = vld [vmem:[#allocation2 + $0x50] sm:$0xff]   ;;  %v4579_v29 = vld [vmem:[#allocation2 + $0x60] sm:$0xff]  }
 0x7b9   : > { %v2197_v21 = vadd.f32 %v6147_v30, %v2175_v36  ;;  %v6225_v14 = vmul.f32 %v2196_v39, %v7064_v57  ;;  %v4581_v36 = vld [vmem:[#allocation2 + $0x70] sm:$0xff]   ;;  %v4582_v39 = vld [vmem:[#allocation2 + $0x78] sm:$0xff]  }
 0x7ba   : > { %v4720_v43 = vpop.eup %4719  ;;  %4725 = vrsqrt.f32 %v2125_v18  ;;  %v4583_v18 = vld [vmem:[#allocation7 + $0x40] sm:$0xff]  }
 0x7bb   : > { %v6228_v10 = vmul.f32 %v2197_v21, %v7065_v9  ;;  %v2154_v28 = vmul.f32 %v4720_v43, %v6119_v46  ;;  %v7067_v46 = vld [vmem:[#allocation35_spill] sm:$0xff]  ;;  %4393 = vmatprep.mubr.bf16.mxu1 %v4583_v18  ;;  %v2246_v21 = vld [vmem:[#allocation5 + $0x90] sm:$0xff] }
 0x7bc   : > { %v4722_v44 = vpop.eup %4721  ;;  %v2244_v43 = vld [vmem:[#allocation5 + $0x80] sm:$0xff] }
 0x7bd   : > { %v2240_v17 = vpack.c.bf16 %v6228_v10, %v6225_v14  ;;  %v2155_v61 = vmul.f32 %v4722_v44, %v6122_v38  ;;  %v2176_v50 = vmul.f32 %v6141_v60, %v2154_v28  ;;  %v2247_v44 = vld [vmem:[#allocation5 + $0x98] sm:$0xff] }
 0x7bf   : > { %4355 = vmatprep.subr.bf16.mxu0 %v2240_v17  ;;  %v2177_v35 = vmul.f32 %v6141_v60, %v2155_v61  ;;  %v2198_v37 = vadd.f32 %v6147_v30, %v2176_v50  ;;  %v2245_v50 = vld [vmem:[#allocation5 + $0x88] sm:$0xff] }
 0x7c0   : > { %4356 = vmatpush3.bf16.msra.mxu0 %v2240_v17 }
 0x7c1   : > { %v2199_v25 = vadd.f32 %v6147_v30, %v2177_v35  ;;  %v6239_v26 = vmul.f32 %v2198_v37, %v7066_v6 }
 0x7c2   : > { %v4724_v56 = vpop.eup %4723 }
 0x7c3   : > { %v6242_v4 = vmul.f32 %v2199_v25, %v7067_v46  ;;  %v2156_v58 = vmul.f32 %v4724_v56, %v6129_v33  ;;  %v7069_v33 = vld [vmem:[#allocation37_spill] sm:$0xff] }
 0x7c4   : > { %v4726_v38 = vpop.eup %4725 }
 0x7c5   : > { %v2241_v1 = vpack.c.bf16 %v6242_v4, %v6239_v26  ;;  %v2157_v41 = vmul.f32 %v4726_v38, %v6132_v11  ;;  %v2178_v19 = vmul.f32 %v6141_v60, %v2156_v58  ;;  %v4576_v11 = vld [vmem:[#allocation2 + $0x48] sm:$0xff]  }
 0x7c7   : > { %4357 = vmatprep.subr.bf16.mxu0 %v2241_v1  ;;  %v2179_v0 = vmul.f32 %v6141_v60, %v2157_v41  ;;  %v2200_v2 = vadd.f32 %v6147_v30, %v2178_v19  ;;  %v4578_v60 = vld [vmem:[#allocation2 + $0x58] sm:$0xff]  }
 0x7c8   : > { %4358 = vmatpush3.bf16.msra.mxu0 %v2241_v1 }
 0x7c9   : > { %v2201_v52 = vadd.f32 %v6147_v30, %v2179_v0  ;;  %v6253_v40 = vmul.f32 %v2200_v2, %v7068_v13  ;;  %v4580_v30 = vld [vmem:[#allocation2 + $0x68] sm:$0xff]  }
 0x7cb   : > { %v6256_v5 = vmul.f32 %v2201_v52, %v7069_v33  ;;  %v2250_v52 = vld [vmem:[#allocation5 + $0xb0] sm:$0xff] }
 0x7cd   : > { %v2242_v22 = vpack.c.bf16 %v6256_v5, %v6253_v40 }
 0x7cf   : > { %4359 = vmatprep.subr.bf16.mxu0 %v2242_v22 }
 0x7d0   : > { %4360 = vmatpush3.bf16.msra.mxu0 %v2242_v22 }
 0x7d3   : > { %4362 = vmatmul.mubr.bf16.vlgmr.msra.gmra.mrb[48].mxu0 %v4576_v11 }
 0x7d4   : > { %4365 = vmatprep.mubr.bf16.mxu0 %v4577_v42  ;;  %v2248_v42 = vld [vmem:[#allocation5 + $0xa0] sm:$0xff] }
 0x7db   : > { %4366 = vmatmul.mubr.bf16.gmra.mrb[52].mxu0 %v4578_v60 }
 0x7dc   : > { %4369 = vmatprep.mubr.bf16.mxu0 %v4579_v29 }
 0x7e3   : > { %4370 = vmatmul.mubr.bf16.gmra.mrb[56].mxu0 %v4580_v30 }
 0x7e4   : > { %4373 = vmatprep.mubr.bf16.mxu0 %v4581_v36  ;;  %v2251_v36 = vld [vmem:[#allocation5 + $0xb8] sm:$0xff] }
 0x7eb   : > { %4374 = vmatmul.mubr.bf16.gmra.mrb[60].mxu0 %v4582_v39 }
 0x7ec   : > { %3126 = vmatprep.mubr.bf16.mxu0 %v7059_v15 }
 0x8a6   : > { %v4363_v28 = vpop.f32.mrb[48].mxu0 }
 0x8a7   : > { %v6261_v17 = vadd.f32 %v4363_v28, %v2246_v21  ;;  %v2342_v61 = vpop.f32.mrb[49].mxu0  ;;  %v2249_v28 = vld [vmem:[#allocation5 + $0xa8] sm:$0xff] }
 0x8a8   : > { %v6263_v35 = vadd.f32 %v2342_v61, %v2244_v43  ;;  %v4364_v37 = vpop.f32.mrb[50].mxu0 }
 0x8a9   : > { %v2407_v25 = vmul.f32 %v6261_v17, %v6261_v17  ;;  %v6267_v56 = vadd.f32 %v4364_v37, %v2247_v44  ;;  %v2345_v58 = vpop.f32.mrb[51].mxu0 }
 0x8aa   : > { %v2405_v38 = vmul.f32 %v6263_v35, %v6263_v35  ;;  %v6271_v1 = vadd.f32 %v2345_v58, %v2245_v50 }
 0x8ab   : > { %v2423_v41 = vmul.f32 %v2407_v25, %v6261_v17  ;;  %v2408_v19 = vmul.f32 %v6267_v56, %v6267_v56 }
 0x8ac   : > { %v2421_v0 = vmul.f32 %v2405_v38, %v6263_v35  ;;  %v2406_v2 = vmul.f32 %v6271_v1, %v6271_v1 }
 0x8ad   : > { %v2439_v22 = vmul.f32 0.044715, %v2423_v41  ;;  %v2424_v11 = vmul.f32 %v2408_v19, %v6267_v56 }
 0x8ae   : > { %v2437_v60 = vmul.f32 0.044715, %v2421_v0  ;;  %v2422_v29 = vmul.f32 %v2406_v2, %v6271_v1  ;;  %v4367_v30 = vpop.f32.mrb[52].mxu0 }
 0x8af   : > { %v2455_v39 = vadd.f32 %v2439_v22, %v6261_v17  ;;  %v2440_v18 = vmul.f32 0.044715, %v2424_v11  ;;  %v6282_v21 = vadd.f32 %v4367_v30, %v2250_v52  ;;  %v2358_v43 = vpop.f32.mrb[53].mxu0 }
 0x8b0   : > { %v2453_v44 = vadd.f32 %v2437_v60, %v6263_v35  ;;  %v2438_v61 = vmul.f32 0.044715, %v2422_v29  ;;  %v6285_v50 = vadd.f32 %v2358_v43, %v2248_v42  ;;  %v4368_v37 = vpop.f32.mrb[54].mxu0 }
 0x8b1   : > { %v2471_v25 = vmul.f32 0.7978846, %v2455_v39  ;;  %v2456_v58 = vadd.f32 %v2440_v18, %v6267_v56  ;;  %v2411_v38 = vmul.f32 %v6282_v21, %v6282_v21  ;;  %v6290_v41 = vadd.f32 %v4368_v37, %v2251_v36  ;;  %v2361_v19 = vpop.f32.mrb[55].mxu0  ;;  %v2254_v39 = vld [vmem:[#allocation5 + $0xd0] sm:$0xff] }
 0x8b2   : > { %v2469_v0 = vmul.f32 0.7978846, %v2453_v44  ;;  %v2454_v2 = vadd.f32 %v2438_v61, %v6271_v1  ;;  %v2409_v52 = vmul.f32 %v6285_v50, %v6285_v50  ;;  %v6295_v22 = vadd.f32 %v2361_v19, %v2249_v28  ;;  %v2252_v28 = vld [vmem:[#allocation5 + $0xc0] sm:$0xff] }
 0x8b3   : > { %4727 = vtanh.f32 %v2471_v25  ;;  %v2472_v11 = vmul.f32 0.7978846, %v2456_v58  ;;  %v2427_v42 = vmul.f32 %v2411_v38, %v6282_v21  ;;  %v2412_v60 = vmul.f32 %v6290_v41, %v6290_v41  ;;  %v2255_v25 = vld [vmem:[#allocation5 + $0xd8] sm:$0xff] }
 0x8b4   : > { %4729 = vtanh.f32 %v2469_v0  ;;  %v2470_v29 = vmul.f32 0.7978846, %v2454_v2  ;;  %v2425_v30 = vmul.f32 %v2409_v52, %v6285_v50  ;;  %v2410_v36 = vmul.f32 %v6295_v22, %v6295_v22  ;;  %v2253_v2 = vld [vmem:[#allocation5 + $0xc8] sm:$0xff] }
 0x8b5   : > { %4731 = vtanh.f32 %v2472_v11  ;;  %v2443_v18 = vmul.f32 0.044715, %v2427_v42  ;;  %v2428_v43 = vmul.f32 %v2412_v60, %v6290_v41 }
 0x8b6   : > { %v2441_v44 = vmul.f32 0.044715, %v2425_v30  ;;  %v2426_v61 = vmul.f32 %v2410_v36, %v6295_v22  ;;  %v4371_v37 = vpop.f32.mrb[56].mxu0  ;;  %4733 = vtanh.f32 %v2470_v29 }
 0x8b7   : > { %v2459_v58 = vadd.f32 %v2443_v18, %v6282_v21  ;;  %v2444_v38 = vmul.f32 0.044715, %v2428_v43  ;;  %v6306_v19 = vadd.f32 %v4371_v37, %v2254_v39  ;;  %v2374_v0 = vpop.f32.mrb[57].mxu0 }
 0x8b8   : > { %v2457_v52 = vadd.f32 %v2441_v44, %v6285_v50  ;;  %v2442_v11 = vmul.f32 0.044715, %v2426_v61  ;;  %v6309_v42 = vadd.f32 %v2374_v0, %v2252_v28  ;;  %v4372_v60 = vpop.f32.mrb[58].mxu0  ;;  %v2258_v0 = vld [vmem:[#allocation5 + $0xf0] sm:$0xff] }
 0x8b9   : > { %v2475_v51 = vmul.f32 0.7978846, %v2459_v58  ;;  %v2460_v30 = vadd.f32 %v2444_v38, %v6290_v41  ;;  %v2415_v36 = vmul.f32 %v6306_v19, %v6306_v19  ;;  %v6314_v32 = vadd.f32 %v4372_v60, %v2255_v25  ;;  %v2377_v18 = vpop.f32.mrb[59].mxu0 }
 0x8ba   : > { %v2473_v39 = vmul.f32 0.7978846, %v2457_v52  ;;  %v2458_v43 = vadd.f32 %v2442_v11, %v6295_v22  ;;  %v2413_v29 = vmul.f32 %v6309_v42, %v6309_v42  ;;  %v6319_v44 = vadd.f32 %v2377_v18, %v2253_v2 }
 0x8bb   : > { %4735 = vtanh.f32 %v2475_v51  ;;  %v2476_v28 = vmul.f32 0.7978846, %v2460_v30  ;;  %v2431_v61 = vmul.f32 %v2415_v36, %v6306_v19  ;;  %v2416_v37 = vmul.f32 %v6314_v32, %v6314_v32  ;;  %v2256_v51 = vld [vmem:[#allocation5 + $0xe0] sm:$0xff] }
 0x8bc   : > { %4737 = vtanh.f32 %v2473_v39  ;;  %v2474_v58 = vmul.f32 0.7978846, %v2458_v43  ;;  %v2429_v25 = vmul.f32 %v2413_v29, %v6309_v42  ;;  %v2414_v38 = vmul.f32 %v6319_v44, %v6319_v44  ;;  %v2259_v39 = vld [vmem:[#allocation5 + $0xf8] sm:$0xff] }
 0x8bd   : > { %v4728_v52 = vpop.eup %4727  ;;  %4739 = vtanh.f32 %v2476_v28  ;;  %v2447_v11 = vmul.f32 0.044715, %v2431_v61  ;;  %v2432_v2 = vmul.f32 %v2416_v37, %v6314_v32  ;;  %v2257_v28 = vld [vmem:[#allocation5 + $0xe8] sm:$0xff] }
 0x8be   : > { %v4730_v60 = vpop.eup %4729  ;;  %4741 = vtanh.f32 %v2474_v58  ;;  %v2445_v30 = vmul.f32 0.044715, %v2429_v25  ;;  %v2430_v36 = vmul.f32 %v2414_v38, %v6319_v44  ;;  %v4375_v18 = vpop.f32.mrb[60].mxu0  ;;  %v2503_v43 = vadd.f32 1.0, %v4728_v52 }
 0x8bf   : > { %v4732_v33 = vpop.eup %4731  ;;  %v2463_v29 = vadd.f32 %v2447_v11, %v6306_v19  ;;  %v2448_v13 = vmul.f32 0.044715, %v2432_v2  ;;  %v6330_v46 = vadd.f32 %v4375_v18, %v2258_v0  ;;  %v2390_v6 = vpop.f32.mrb[61].mxu0  ;;  %v2501_v61 = vadd.f32 1.0, %v4730_v60 }
 0x8c0   : > { %v2461_v37 = vadd.f32 %v2445_v30, %v6309_v42  ;;  %v2446_v9 = vmul.f32 0.044715, %v2430_v36  ;;  %v6333_v57 = vadd.f32 %v2390_v6, %v2256_v51  ;;  %v4376_v58 = vpop.f32.mrb[62].mxu0  ;;  %v2504_v25 = vadd.f32 1.0, %v4732_v33  ;;  %v4734_v2 = vpop.eup %4733 }
 0x8c1   : > { %v2479_v38 = vmul.f32 0.7978846, %v2463_v29  ;;  %v2464_v59 = vadd.f32 %v2448_v13, %v6314_v32  ;;  %v2419_v52 = vmul.f32 %v6330_v46, %v6330_v46  ;;  %v6338_v11 = vadd.f32 %v4376_v58, %v2259_v39  ;;  %v2393_v0 = vpop.f32.mrb[63].mxu0 }
 0x8c2   : > { %v2477_v18 = vmul.f32 0.7978846, %v2461_v37  ;;  %v2462_v60 = vadd.f32 %v2446_v9, %v6319_v44  ;;  %v2417_v30 = vmul.f32 %v6333_v57, %v6333_v57  ;;  %v6343_v6 = vadd.f32 %v2393_v0, %v2257_v28 }
 0x8c3   : > { %4743 = vtanh.f32 %v2479_v38  ;;  %v2480_v33 = vmul.f32 0.7978846, %v2464_v59  ;;  %v2435_v51 = vmul.f32 %v2419_v52, %v6330_v46  ;;  %v2420_v13 = vmul.f32 %v6338_v11, %v6338_v11 }
 0x8c4   : > { %4745 = vtanh.f32 %v2477_v18  ;;  %v2478_v36 = vmul.f32 0.7978846, %v2462_v60  ;;  %v2433_v39 = vmul.f32 %v2417_v30, %v6333_v57  ;;  %v2418_v29 = vmul.f32 %v6343_v6, %v6343_v6 }
 0x8c5   : > { %v4736_v9 = vpop.eup %4735  ;;  %4747 = vtanh.f32 %v2480_v33  ;;  %v2451_v37 = vmul.f32 0.044715, %v2435_v51  ;;  %v2436_v28 = vmul.f32 %v2420_v13, %v6338_v11  ;;  %v2502_v58 = vadd.f32 1.0, %v4734_v2 }
 0x8c6   : > { %v4738_v38 = vpop.eup %4737  ;;  %4749 = vtanh.f32 %v2478_v36  ;;  %v2449_v59 = vmul.f32 0.044715, %v2433_v39  ;;  %v2434_v52 = vmul.f32 %v2418_v29, %v6343_v6  ;;  %v2517_v0 = vmul.f32 0.5, %v2501_v61 }
 0x8c7   : > { %v4740_v8 = vpop.eup %4739  ;;  %v2467_v18 = vadd.f32 %v2451_v37, %v6330_v46  ;;  %v2452_v60 = vmul.f32 0.044715, %v2436_v28  ;;  %v2518_v30 = vmul.f32 0.5, %v2502_v58  ;;  %v2519_v49 = vmul.f32 0.5, %v2503_v43 }
 0x8c8   : > { %v4742_v7 = vpop.eup %4741  ;;  %v2465_v62 = vadd.f32 %v2449_v59, %v6333_v57  ;;  %v2450_v33 = vmul.f32 0.044715, %v2434_v52  ;;  %v2533_v51 = vmul.f32 %v2517_v0, %v6263_v35  ;;  %v2520_v13 = vmul.f32 0.5, %v2504_v25 }
 0x8c9   : > { %v2483_v2 = vmul.f32 0.7978846, %v2467_v18  ;;  %v2468_v36 = vadd.f32 %v2452_v60, %v6338_v11  ;;  %v2534_v39 = vmul.f32 %v2518_v30, %v6271_v1  ;;  %v2535_v61 = vmul.f32 %v2519_v49, %v6261_v17 }
 0x8ca   : > { %v2481_v29 = vmul.f32 0.7978846, %v2465_v62  ;;  %v2466_v37 = vadd.f32 %v2450_v33, %v6343_v6  ;;  %v2536_v28 = vmul.f32 %v2520_v13, %v6267_v56  ;;  %v2505_v43 = vadd.f32 1.0, %v4738_v38 }
 0x8cb   : > { %4751 = vtanh.f32 %v2483_v2  ;;  %v2484_v58 = vmul.f32 0.7978846, %v2468_v36  ;;  %v2566_v59 = vpack.c.bf16 %v2534_v39, %v2533_v51  ;;  %v2506_v52 = vadd.f32 1.0, %v4742_v7 }
 0x8cc   : > { %4753 = vtanh.f32 %v2481_v29  ;;  %v2482_v35 = vmul.f32 0.7978846, %v2466_v37  ;;  %v2567_v25 = vpack.c.bf16 %v2536_v28, %v2535_v61  ;;  %v2521_v0 = vmul.f32 0.5, %v2505_v43 }
 0x8cd   : > { %v4744_v18 = vpop.eup %4743  ;;  %4755 = vtanh.f32 %v2484_v58  ;;  %4377 = vmatprep.subr.bf16.mxu1 %v2566_v59  ;;  %v2522_v1 = vmul.f32 0.5, %v2506_v52  ;;  %v2507_v60 = vadd.f32 1.0, %v4736_v9  ;;  %v2508_v49 = vadd.f32 1.0, %v4740_v8 }
 0x8ce   : > { %v4746_v62 = vpop.eup %4745  ;;  %4757 = vtanh.f32 %v2482_v35  ;;  %4378 = vmatpush3.bf16.msra.mxu1 %v2566_v59  ;;  %v2537_v17 = vmul.f32 %v2521_v0, %v6285_v50  ;;  %v2511_v56 = vadd.f32 1.0, %v4744_v18 }
 0x8cf   : > { %v4748_v38 = vpop.eup %4747  ;;  %4379 = vmatprep.subr.bf16.mxu1 %v2567_v25  ;;  %v2538_v7 = vmul.f32 %v2522_v1, %v6295_v22  ;;  %v2523_v30 = vmul.f32 0.5, %v2507_v60  ;;  %v2524_v33 = vmul.f32 0.5, %v2508_v49  ;;  %v2509_v51 = vadd.f32 1.0, %v4746_v62 }
 0x8d0   : > { %v4750_v13 = vpop.eup %4749  ;;  %v2512_v2 = vadd.f32 1.0, %v4748_v38  ;;  %v2527_v36 = vmul.f32 0.5, %v2511_v56 }
 0x8d1   : > { %v2568_v39 = vpack.c.bf16 %v2538_v7, %v2537_v17  ;;  %v2539_v9 = vmul.f32 %v2523_v30, %v6282_v21  ;;  %v2540_v8 = vmul.f32 %v2524_v33, %v6290_v41  ;;  %v2510_v61 = vadd.f32 1.0, %v4750_v13  ;;  %v4584_v33 = vld [vmem:[#allocation7 + $0x48] sm:$0xff]   ;;  %v4587_v13 = vld [vmem:[#allocation7 + $0x60] sm:$0xff]  }
 0x8d2   : > { %4380 = vmatpush3.bf16.msra.mxu1 %v2567_v25  ;;  %v2525_v29 = vmul.f32 0.5, %v2509_v51  ;;  %v2528_v50 = vmul.f32 0.5, %v2512_v2  ;;  %v2543_v22 = vmul.f32 %v2527_v36, %v6306_v19  ;;  %v4585_v51 = vld [vmem:[#allocation7 + $0x50] sm:$0xff]   ;;  %v2575_v2 = vld [vmem:[#allocation8 + $0x80] sm:$0xff] }
 0x8d3   : > { %4381 = vmatprep.subr.bf16.mxu1 %v2568_v39  ;;  %v2569_v37 = vpack.c.bf16 %v2540_v8, %v2539_v9  ;;  %v2526_v28 = vmul.f32 0.5, %v2510_v61  ;;  %v2576_v8 = vld [vmem:[#allocation8 + $0x88] sm:$0xff] }
 0x8d4   : > { %v2544_v43 = vmul.f32 %v2528_v50, %v6314_v32  ;;  %v2541_v59 = vmul.f32 %v2525_v29, %v6309_v42  ;;  %v2578_v50 = vld [vmem:[#allocation8 + $0x98] sm:$0xff] }
 0x8d5   : > { %v4752_v58 = vpop.eup %4751  ;;  %v2542_v52 = vmul.f32 %v2526_v28, %v6319_v44 }
 0x8d6   : > { %v4754_v35 = vpop.eup %4753  ;;  %4382 = vmatpush3.bf16.msra.mxu1 %v2568_v39  ;;  %v2571_v21 = vpack.c.bf16 %v2544_v43, %v2543_v22  ;;  %v2515_v41 = vadd.f32 1.0, %v4752_v58  ;;  %v2577_v39 = vld [vmem:[#allocation8 + $0x90] sm:$0xff] }
 0x8d7   : > { %v4756_v0 = vpop.eup %4755  ;;  %4383 = vmatprep.subr.bf16.mxu1 %v2569_v37  ;;  %v2570_v25 = vpack.c.bf16 %v2542_v52, %v2541_v59  ;;  %v2513_v18 = vadd.f32 1.0, %v4754_v35  ;;  %v2579_v52 = vld [vmem:[#allocation8 + $0xa0] sm:$0xff] }
 0x8d8   : > { %v4758_v1 = vpop.eup %4757  ;;  %v2516_v60 = vadd.f32 1.0, %v4756_v0  ;;  %v2531_v49 = vmul.f32 0.5, %v2515_v41  ;;  %v2581_v41 = vld [vmem:[#allocation8 + $0xb0] sm:$0xff] }
 0x8d9   : > { %v2514_v62 = vadd.f32 1.0, %v4758_v1  ;;  %v2529_v19 = vmul.f32 0.5, %v2513_v18 }
 0x8da   : > { %4384 = vmatpush3.bf16.msra.mxu1 %v2569_v37  ;;  %v2532_v32 = vmul.f32 0.5, %v2516_v60  ;;  %v2547_v42 = vmul.f32 %v2531_v49, %v6330_v46  ;;  %v4586_v46 = vld [vmem:[#allocation7 + $0x58] sm:$0xff]  }
 0x8db   : > { %4385 = vmatprep.subr.bf16.mxu1 %v2570_v25  ;;  %v2530_v17 = vmul.f32 0.5, %v2514_v62  ;;  %v2545_v56 = vmul.f32 %v2529_v19, %v6333_v57  ;;  %v4588_v57 = vld [vmem:[#allocation7 + $0x68] sm:$0xff]   ;;  %v2582_v60 = vld [vmem:[#allocation8 + $0xb8] sm:$0xff] }
 0x8dc   : > { %v2548_v44 = vmul.f32 %v2532_v32, %v6338_v11  ;;  %v4589_v11 = vld [vmem:[#allocation7 + $0x70] sm:$0xff]  }
 0x8dd   : > { %v2546_v38 = vmul.f32 %v2530_v17, %v6343_v6  ;;  %v4590_v6 = vld [vmem:[#allocation7 + $0x78] sm:$0xff]   ;;  %v2583_v17 = vld [vmem:[#allocation8 + $0xc0] sm:$0xff] }
 0x8de   : > { %4386 = vmatpush3.bf16.msra.mxu1 %v2570_v25  ;;  %v2573_v7 = vpack.c.bf16 %v2548_v44, %v2547_v42  ;;  %v2580_v25 = vld [vmem:[#allocation8 + $0xa8] sm:$0xff]  ;;  %v2585_v44 = vld [vmem:[#allocation8 + $0xd0] sm:$0xff] }
 0x8df   : > { %4387 = vmatprep.subr.bf16.mxu1 %v2571_v21  ;;  %v2572_v30 = vpack.c.bf16 %v2546_v38, %v2545_v56  ;;  %v2584_v38 = vld [vmem:[#allocation8 + $0xc8] sm:$0xff] }
 0x8e2   : > { %4388 = vmatpush3.bf16.msra.mxu1 %v2571_v21 }
 0x8e3   : > { %4389 = vmatprep.subr.bf16.mxu1 %v2572_v30 }
 0x8e6   : > { %4390 = vmatpush3.bf16.msra.mxu1 %v2572_v30 }
 0x8e7   : > { %4391 = vmatprep.subr.bf16.mxu1 %v2573_v7 }
 0x8ea   : > { %4392 = vmatpush3.bf16.msra.mxu1 %v2573_v7 }
 0x8ed   : > { %4394 = vmatmul.mubr.bf16.vlgmr.msra.gmra.mrb[48].mxu1 %v4584_v33  ;;  %v2586_v33 = vld [vmem:[#allocation8 + $0xd8] sm:$0xff] }
 0x8ee   : > { %4397 = vmatprep.mubr.bf16.mxu1 %v4585_v51 }
 0x8f5   : > { %4398 = vmatmul.mubr.bf16.gmra.mrb[52].mxu1 %v4586_v46 }
 0x8f6   : > { %4401 = vmatprep.mubr.bf16.mxu1 %v4587_v13 }
 0x8fd   : > { %4402 = vmatmul.mubr.bf16.gmra.mrb[56].mxu1 %v4588_v57 }
 0x8fe   : > { %4405 = vmatprep.mubr.bf16.mxu1 %v4589_v11  ;;  %v2587_v11 = vld [vmem:[#allocation8 + $0xe0] sm:$0xff] }
 0x905   : > { %4406 = vmatmul.mubr.bf16.gmra.mrb[60].mxu1 %v4590_v6 }
 0x9c0   : > { %v4395_v36 = vpop.f32.mrb[48].mxu1 }
 0x9c1   : > { %v2673_v9 = vpop.f32.mrb[49].mxu1  ;;  %v2682_v28 = vadd.f32 %v4395_v36, %v2577_v39  ;;  %v2588_v39 = vld [vmem:[#allocation8 + $0xe8] sm:$0xff] }
 0x9c2   : > { %v2674_v61 = vadd.f32 %v2673_v9, %v2575_v2  ;;  %v4396_v29 = vpop.f32.mrb[50].mxu1  ;;  %v2589_v2 = vld [vmem:[#allocation8 + $0xf0] sm:$0xff] }
 0x9c3   : > { %v2676_v37 = vpop.f32.mrb[51].mxu1  ;;  %v2685_v58 = vadd.f32 %v4396_v29, %v2578_v50  ;;  %v6382_v21 = vadd.f32 %v2682_v28, %v6169_v23 }
 0x9c4   : > { %v2677_v22 = vadd.f32 %v2676_v37, %v2576_v8  ;;  %v6374_v43 = vadd.f32 %v2674_v61, %v6155_v20  ;;  %v2590_v61 = vld [vmem:[#allocation8 + $0xf8] sm:$0xff] }
 0x9c5   : > { %v6386_v20 = vadd.f32 %v2685_v58, %v6172_v27  ;;  %v4593_v58 = vld [vmem:[#allocation10 + $0x84] ss:$8 sps:$4 sm:$0xff]  }
 0x9c6   : > { %2756 = vadd.xlane.f32.xlu1 %v6374_v43  ;;  %v6378_v59 = vadd.f32 %v2677_v22, %v6158_v3  ;;  %3094 = vmatprep.subr.bf16.mxu0 %v4593_v58  ;;  %v4597_v58 = vld [vmem:[#allocation10 + $0xa0] ss:$8 sps:$4 sm:$0xff]  }
 0x9c8   : > { %v4399_v35 = vpop.f32.mrb[52].mxu1  ;;  %2758 = vadd.xlane.f32.xlu0 %v6378_v59 }
 0x9c9   : > { %v2689_v0 = vpop.f32.mrb[53].mxu1  ;;  %v2698_v49 = vadd.f32 %v4399_v35, %v2581_v41  ;;  %v4594_v35 = vld [vmem:[#allocation10 + $0x90] ss:$8 sps:$4 sm:$0xff]  }
 0x9ca   : > { %v2690_v18 = vadd.f32 %v2689_v0, %v2579_v52  ;;  %v4400_v1 = vpop.f32.mrb[54].mxu1  ;;  %2760 = vadd.xlane.f32.xlu1 %v6382_v21  ;;  %v4596_v52 = vld [vmem:[#allocation10 + $0x94] ss:$8 sps:$4 sm:$0xff]  }
 0x9cb   : > { %v2692_v3 = vpop.f32.mrb[55].mxu1  ;;  %v2701_v23 = vadd.f32 %v4400_v1, %v2582_v60  ;;  %v6398_v27 = vadd.f32 %v2698_v49, %v6197_v24 }
 0x9cc   : > { %v2693_v62 = vadd.f32 %v2692_v3, %v2580_v25  ;;  %2762 = vadd.xlane.f32.xlu0 %v6386_v20  ;;  %v6390_v19 = vadd.f32 %v2690_v18, %v6183_v34 }
 0x9cd   : > { %v6402_v34 = vadd.f32 %v2701_v23, %v6200_v31 }
 0x9ce   : > { %2764 = vadd.xlane.f32.xlu1 %v6390_v19  ;;  %v6394_v32 = vadd.f32 %v2693_v62, %v6186_v12 }
 0x9d0   : > { %v4403_v42 = vpop.f32.mrb[56].mxu1  ;;  %2766 = vadd.xlane.f32.xlu0 %v6394_v32 }
 0x9d1   : > { %v2705_v56 = vpop.f32.mrb[57].mxu1  ;;  %v2714_v51 = vadd.f32 %v4403_v42, %v2585_v44 }
 0x9d2   : > { %v2706_v7 = vadd.f32 %v2705_v56, %v2583_v17  ;;  %v4404_v30 = vpop.f32.mrb[58].mxu1  ;;  %2768 = vadd.xlane.f32.xlu1 %v6398_v27 }
 0x9d3   : > { %v2708_v12 = vpop.f32.mrb[59].mxu1  ;;  %v2717_v24 = vadd.f32 %v4404_v30, %v2586_v33  ;;  %v6414_v31 = vadd.f32 %v2714_v51, %v6225_v14 }
 0x9d4   : > { %v2709_v46 = vadd.f32 %v2708_v12, %v2584_v38  ;;  %2770 = vadd.xlane.f32.xlu0 %v6402_v34  ;;  %v6406_v13 = vadd.f32 %v2706_v7, %v6211_v16 }
 0x9d5   : > { %v6418_v16 = vadd.f32 %v2717_v24, %v6228_v10 }
 0x9d6   : > { %2772 = vadd.xlane.f32.xlu1 %v6406_v13  ;;  %v6410_v57 = vadd.f32 %v2709_v46, %v6214_v55 }
 0x9d8   : > { %v4407_v6 = vpop.f32.mrb[60].mxu1  ;;  %2774 = vadd.xlane.f32.xlu0 %v6410_v57 }
 0x9d9   : > { %v2721_v36 = vpop.f32.mrb[61].mxu1  ;;  %v2730_v29 = vadd.f32 %v4407_v6, %v2589_v2 }
 0x9da   : > { %v2722_v9 = vadd.f32 %v2721_v36, %v2587_v11  ;;  %v4408_v8 = vpop.f32.mrb[62].mxu1  ;;  %2776 = vadd.xlane.f32.xlu1 %v6414_v31 }
 0x9db   : > { %v2724_v55 = vpop.f32.mrb[63].mxu1  ;;  %v2733_v14 = vadd.f32 %v4408_v8, %v2590_v61  ;;  %v6430_v10 = vadd.f32 %v2730_v29, %v6253_v40 }
 0x9dc   : > { %v2725_v50 = vadd.f32 %v2724_v55, %v2588_v39  ;;  %2778 = vadd.xlane.f32.xlu0 %v6418_v16  ;;  %v6422_v37 = vadd.f32 %v2722_v9, %v6239_v26  ;;  %v4591_v26 = vld [vmem:[#allocation10 + $0x80] ss:$8 sps:$4 sm:$0xff]  }
 0x9dd   : > { %v6434_v22 = vadd.f32 %v2733_v14, %v6256_v5  ;;  %3095 = vmatpush1.bf16.msra.mxu0 %v4591_v26  ;;  %v4599_v14 = vld [vmem:[#allocation10 + $0xa4] ss:$8 sps:$4 sm:$0xff]  }
 0x9de   : > { %2780 = vadd.xlane.f32.xlu1 %v6422_v37  ;;  %v6426_v28 = vadd.f32 %v2725_v50, %v6242_v4  ;;  %3096 = vmatprep.subr.bf16.mxu0 %v4596_v52 }
 0x9e0   : > { %2782 = vadd.xlane.f32.xlu0 %v6426_v28 }
 0x9e1   : > { %3097 = vmatpush1.bf16.msra.mxu0 %v4594_v35 }
 0x9e2   : > { %2784 = vadd.xlane.f32.xlu1 %v6430_v10  ;;  %3098 = vmatprep.subr.bf16.mxu0 %v4599_v14 }
 0x9e4   : > { %2786 = vadd.xlane.f32.xlu0 %v6434_v22 }
 0x9e5   : > { %3099 = vmatpush1.bf16.msra.mxu0 %v4597_v58 }
 0xa53   : > { %v2757_v4 = vpop.xlane.xlu1 %2756 }
 0xa54   : > { %v2788_v41 = vmul.f32 0.0078125, %v2757_v4 }
 0xa55   : > { %v2759_v0 = vpop.xlane.xlu0 %2758 }
 0xa56   : > { %v6438_v40 = vsub.f32 %v6374_v43, %v2788_v41  ;;  %v2789_v25 = vmul.f32 0.0078125, %v2759_v0 }
 0xa57   : > { %v2761_v18 = vpop.xlane.xlu1 %2760 }
 0xa58   : > { %v6441_v5 = vsub.f32 %v6378_v59, %v2789_v25  ;;  %v2790_v1 = vmul.f32 0.0078125, %v2761_v18  ;;  %v2820_v60 = vmul.f32 %v6438_v40, %v6438_v40  ;;  %v4602_v25 = vld [vmem:[#allocation10 + $0xb4] ss:$8 sps:$4 sm:$0xff]  }
 0xa59   : > { %v2763_v3 = vpop.xlane.xlu0 %2762  ;;  %3100 = vmatprep.subr.bf16.mxu0 %v4602_v25 }
 0xa5a   : > { %v6446_v49 = vsub.f32 %v6382_v21, %v2790_v1  ;;  %v2791_v62 = vmul.f32 0.0078125, %v2763_v3  ;;  %2836 = vadd.xlane.f32.xlu1 %v2820_v60  ;;  %v2821_v23 = vmul.f32 %v6441_v5, %v6441_v5 }
 0xa5b   : > { %v2765_v43 = vpop.xlane.xlu1 %2764 }
 0xa5c   : > { %v6451_v17 = vsub.f32 %v6386_v20, %v2791_v62  ;;  %v2792_v42 = vmul.f32 0.0078125, %v2765_v43  ;;  %2838 = vadd.xlane.f32.xlu0 %v2821_v23  ;;  %v2822_v59 = vmul.f32 %v6446_v49, %v6446_v49 }
 0xa5d   : > { %v2767_v44 = vpop.xlane.xlu0 %2766 }
 0xa5e   : > { %v6456_v56 = vsub.f32 %v6390_v19, %v2792_v42  ;;  %v2793_v21 = vmul.f32 0.0078125, %v2767_v44  ;;  %2840 = vadd.xlane.f32.xlu1 %v2822_v59  ;;  %v2823_v38 = vmul.f32 %v6451_v17, %v6451_v17  ;;  %v4605_v42 = vld [vmem:[#allocation10 + $0xc4] ss:$8 sps:$4 sm:$0xff]   ;;  %v4603_v59 = vld [vmem:[#allocation10 + $0xc0] ss:$8 sps:$4 sm:$0xff]  }
 0xa5f   : > { %v2769_v7 = vpop.xlane.xlu1 %2768 }
 0xa60   : > { %v6461_v30 = vsub.f32 %v6394_v32, %v2793_v21  ;;  %v2794_v20 = vmul.f32 0.0078125, %v2769_v7  ;;  %2842 = vadd.xlane.f32.xlu0 %v2823_v38  ;;  %v2824_v33 = vmul.f32 %v6456_v56, %v6456_v56  ;;  %v4608_v21 = vld [vmem:[#allocation10 + $0xd4] ss:$8 sps:$4 sm:$0xff]   ;;  %v4606_v38 = vld [vmem:[#allocation10 + $0xd0] ss:$8 sps:$4 sm:$0xff]  }
 0xa61   : > { %v2771_v12 = vpop.xlane.xlu0 %2770  ;;  %v4611_v7 = vld [vmem:[#allocation10 + $0xe4] ss:$8 sps:$4 sm:$0xff]  }
 0xa62   : > { %v6466_v51 = vsub.f32 %v6398_v27, %v2794_v20  ;;  %v2795_v19 = vmul.f32 0.0078125, %v2771_v12  ;;  %2844 = vadd.xlane.f32.xlu1 %v2824_v33  ;;  %v2825_v46 = vmul.f32 %v6461_v30, %v6461_v30  ;;  %v4609_v20 = vld [vmem:[#allocation10 + $0xe0] ss:$8 sps:$4 sm:$0xff]   ;;  %v4612_v33 = vld [vmem:[#allocation10 + $0xf0] ss:$8 sps:$4 sm:$0xff]  }
 0xa63   : > { %v2773_v24 = vpop.xlane.xlu1 %2772  ;;  %v4615_v12 = vld [vmem:[#allocation11 + $0xc0] sm:$0xff]  }
 0xa64   : > { %v6471_v11 = vsub.f32 %v6402_v34, %v2795_v19  ;;  %v2796_v32 = vmul.f32 0.0078125, %v2773_v24  ;;  %2846 = vadd.xlane.f32.xlu0 %v2825_v46  ;;  %v2826_v6 = vmul.f32 %v6466_v51, %v6466_v51  ;;  %v4616_v19 = vld [vmem:[#allocation11 + $0x80] sm:$0xff]   ;;  %v4617_v46 = vld [vmem:[#allocation11 + $0xc8] sm:$0xff]   ;;  %4217 = vmatprep.subr.bf16.mxu1 %v4615_v12 }
 0xa65   : > { %v2775_v2 = vpop.xlane.xlu0 %2774  ;;  %4218 = vmatpush3.bf16.msra.mxu1 %v4616_v19  ;;  %v4618_v24 = vld [vmem:[#allocation11 + $0x88] sm:$0xff]   ;;  %v6528_v12 = vld [vmem:[%s6969_s7 + $0x1] ss:$0 sm:$0xff] }
 0xa66   : > { %v6476_v36 = vsub.f32 %v6406_v13, %v2796_v32  ;;  %v2797_v27 = vmul.f32 0.0078125, %v2775_v2  ;;  %2848 = vadd.xlane.f32.xlu1 %v2826_v6  ;;  %v2827_v39 = vmul.f32 %v6471_v11, %v6471_v11  ;;  %4219 = vmatprep.subr.bf16.mxu1 %v4617_v46  ;;  %v4619_v32 = vld [vmem:[#allocation11 + $0xd0] sm:$0xff]   ;;  %v4621_v2 = vld [vmem:[#allocation11 + $0xd8] sm:$0xff]  }
 0xa67   : > { %v2777_v9 = vpop.xlane.xlu1 %2776  ;;  %v4620_v6 = vld [vmem:[#allocation11 + $0x90] sm:$0xff]  }
 0xa68   : > { %v6481_v8 = vsub.f32 %v6410_v57, %v2797_v27  ;;  %v2798_v34 = vmul.f32 0.0078125, %v2777_v9  ;;  %2850 = vadd.xlane.f32.xlu0 %v2827_v39  ;;  %v2828_v61 = vmul.f32 %v6476_v36, %v6476_v36  ;;  %v4622_v27 = vld [vmem:[#allocation11 + $0x98] sm:$0xff]   ;;  %v4623_v39 = vld [vmem:[#allocation11 + $0xe0] sm:$0xff]  }
 0xa69   : > { %v2779_v55 = vpop.xlane.xlu0 %2778  ;;  %4220 = vmatpush3.bf16.msra.mxu1 %v4618_v24  ;;  %v4624_v9 = vld [vmem:[#allocation11 + $0xa0] sm:$0xff]  }
 0xa6a   : > { %v6486_v29 = vsub.f32 %v6414_v31, %v2798_v34  ;;  %v2799_v13 = vmul.f32 0.0078125, %v2779_v55  ;;  %2852 = vadd.xlane.f32.xlu1 %v2828_v61  ;;  %v2829_v50 = vmul.f32 %v6481_v8, %v6481_v8  ;;  %4221 = vmatprep.subr.bf16.mxu1 %v4619_v32  ;;  %v4625_v34 = vld [vmem:[#allocation11 + $0xe8] sm:$0xff]  }
 0xa6b   : > { %v2781_v26 = vpop.xlane.xlu1 %2780 }
 0xa6c   : > { %v6491_v57 = vsub.f32 %v6418_v16, %v2799_v13  ;;  %v2800_v52 = vmul.f32 0.0078125, %v2781_v26  ;;  %2854 = vadd.xlane.f32.xlu0 %v2829_v50  ;;  %v2830_v35 = vmul.f32 %v6486_v29, %v6486_v29  ;;  %v4600_v16 = vld [vmem:[#allocation10 + $0xb0] ss:$8 sps:$4 sm:$0xff]  }
 0xa6d   : > { %v2783_v4 = vpop.xlane.xlu0 %2782  ;;  %3101 = vmatpush1.bf16.msra.mxu0 %v4600_v16  ;;  %4222 = vmatpush3.bf16.msra.mxu1 %v4620_v6 }
 0xa6e   : > { %v6496_v31 = vsub.f32 %v6422_v37, %v2800_v52  ;;  %v2801_v41 = vmul.f32 0.0078125, %v2783_v4  ;;  %2856 = vadd.xlane.f32.xlu1 %v2830_v35  ;;  %v2831_v0 = vmul.f32 %v6491_v57, %v6491_v57  ;;  %3102 = vmatprep.subr.bf16.mxu0 %v4605_v42 }
 0xa6f   : > { %v2785_v18 = vpop.xlane.xlu1 %2784  ;;  %4223 = vmatprep.subr.bf16.mxu1 %v4621_v2 }
 0xa70   : > { %v6501_v1 = vsub.f32 %v6426_v28, %v2801_v41  ;;  %v2802_v60 = vmul.f32 0.0078125, %v2785_v18  ;;  %2858 = vadd.xlane.f32.xlu0 %v2831_v0  ;;  %v2832_v3 = vmul.f32 %v6496_v31, %v6496_v31 }
 0xa71   : > { %v2787_v62 = vpop.xlane.xlu0 %2786  ;;  %3103 = vmatpush1.bf16.msra.mxu0 %v4603_v59  ;;  %4224 = vmatpush3.bf16.msra.mxu1 %v4622_v27  ;;  %v6520_v59 = vld [vmem:[%s6968_s6 + $0x1] ss:$0 sm:$0xff] }
 0xa72   : > { %v6506_v37 = vsub.f32 %v6430_v10, %v2802_v60  ;;  %v2803_v23 = vmul.f32 0.0078125, %v2787_v62  ;;  %2860 = vadd.xlane.f32.xlu1 %v2832_v3  ;;  %v2833_v43 = vmul.f32 %v6501_v1, %v6501_v1  ;;  %3104 = vmatprep.subr.bf16.mxu0 %v4608_v21 }
 0xa73   : > { %4225 = vmatprep.subr.bf16.mxu1 %v4623_v39 }
 0xa74   : > { %v6511_v28 = vsub.f32 %v6434_v22, %v2803_v23  ;;  %2862 = vadd.xlane.f32.xlu0 %v2833_v43  ;;  %v2834_v44 = vmul.f32 %v6506_v37, %v6506_v37  ;;  %v4614_v22 = vld [vmem:[#allocation10 + $0xf4] ss:$8 sps:$4 sm:$0xff]  }
 0xa75   : > { %3105 = vmatpush1.bf16.msra.mxu0 %v4606_v38  ;;  %4226 = vmatpush3.bf16.msra.mxu1 %v4624_v9 }
 0xa76   : > { %2864 = vadd.xlane.f32.xlu1 %v2834_v44  ;;  %v2835_v10 = vmul.f32 %v6511_v28, %v6511_v28  ;;  %3106 = vmatprep.subr.bf16.mxu0 %v4611_v7 }
 0xa77   : > { %4227 = vmatprep.subr.bf16.mxu1 %v4625_v34 }
 0xa78   : > { %2866 = vadd.xlane.f32.xlu0 %v2835_v10 }
 0xa79   : > { %3107 = vmatpush1.bf16.msra.mxu0 %v4609_v20 }
 0xa7a   : > { %3108 = vmatprep.subr.bf16.mxu0 %v4614_v22 }
 0xa7d   : > { %3109 = vmatpush1.bf16.msra.mxu0 %v4612_v33 }
 0xae7   : > { %v2837_v61 = vpop.xlane.xlu1 %2836 }
 0xae8   : > { %v2868_v55 = vmul.f32 0.0078125, %v2837_v61 }
 0xae9   : > { %v2839_v13 = vpop.xlane.xlu0 %2838 }
 0xaea   : > { %v2884_v50 = vadd.f32 1e-05, %v2868_v55  ;;  %v2869_v14 = vmul.f32 0.0078125, %v2839_v13 }
 0xaeb   : > { %v2841_v26 = vpop.xlane.xlu1 %2840 }
 0xaec   : > { %4759 = vrsqrt.f32 %v2884_v50  ;;  %v2885_v58 = vadd.f32 1e-05, %v2869_v14  ;;  %v2870_v52 = vmul.f32 0.0078125, %v2841_v26 }
 0xaed   : > { %v2843_v35 = vpop.xlane.xlu0 %2842 }
 0xaee   : > { %4761 = vrsqrt.f32 %v2885_v58  ;;  %v2886_v4 = vadd.f32 1e-05, %v2870_v52  ;;  %v2871_v41 = vmul.f32 0.0078125, %v2843_v35 }
 0xaef   : > { %v2845_v0 = vpop.xlane.xlu1 %2844 }
 0xaf0   : > { %4763 = vrsqrt.f32 %v2886_v4  ;;  %v2887_v25 = vadd.f32 1e-05, %v2871_v41  ;;  %v2872_v18 = vmul.f32 0.0078125, %v2845_v0 }
 0xaf1   : > { %v2847_v16 = vpop.xlane.xlu0 %2846 }
 0xaf2   : > { %4765 = vrsqrt.f32 %v2887_v25  ;;  %v2873_v60 = vmul.f32 0.0078125, %v2847_v16  ;;  %v2888_v3 = vadd.f32 1e-05, %v2872_v18 }
 0xaf3   : > { %v2849_v23 = vpop.xlane.xlu1 %2848 }
 0xaf4   : > { %v2889_v62 = vadd.f32 1e-05, %v2873_v60  ;;  %v2874_v38 = vmul.f32 0.0078125, %v2849_v23 }
 0xaf5   : > { %v2851_v43 = vpop.xlane.xlu0 %2850 }
 0xaf6   : > { %v4760_v42 = vpop.eup %4759  ;;  %4767 = vrsqrt.f32 %v2889_v62  ;;  %v2875_v44 = vmul.f32 0.0078125, %v2851_v43  ;;  %v2890_v32 = vadd.f32 1e-05, %v2874_v38 }
 0xaf7   : > { %v2916_v10 = vmul.f32 %v4760_v42, %v6438_v40  ;;  %4769 = vrsqrt.f32 %v2888_v3  ;;  %v2853_v40 = vpop.xlane.xlu1 %2852 }
 0xaf8   : > { %v4762_v21 = vpop.eup %4761  ;;  %v2891_v33 = vadd.f32 1e-05, %v2875_v44  ;;  %v2876_v55 = vmul.f32 0.0078125, %v2853_v40 }
 0xaf9   : > { %v2938_v7 = vmul.f32 %v6520_v59, %v2916_v10  ;;  %v2917_v20 = vmul.f32 %v4762_v21, %v6441_v5  ;;  %v2855_v46 = vpop.xlane.xlu0 %2854 }
 0xafa   : > { %v4764_v22 = vpop.eup %4763  ;;  %4771 = vrsqrt.f32 %v2891_v33  ;;  %v2877_v39 = vmul.f32 0.0078125, %v2855_v46  ;;  %v2892_v58 = vadd.f32 1e-05, %v2876_v55 }
 0xafb   : > { %v2939_v19 = vmul.f32 %v6520_v59, %v2917_v20  ;;  %v6532_v6 = vadd.f32 %v6528_v12, %v2938_v7  ;;  %v2918_v5 = vmul.f32 %v4764_v22, %v6446_v49  ;;  %4773 = vrsqrt.f32 %v2890_v32  ;;  %v2857_v52 = vpop.xlane.xlu1 %2856 }
 0xafc   : > { %v4766_v24 = vpop.eup %4765  ;;  %v2893_v14 = vadd.f32 1e-05, %v2877_v39  ;;  %v2878_v16 = vmul.f32 0.0078125, %v2857_v52 }
 0xafd   : > { %v6535_v2 = vadd.f32 %v6528_v12, %v2939_v19  ;;  %v2919_v27 = vmul.f32 %v4766_v24, %v6451_v17  ;;  %v2940_v13 = vmul.f32 %v6520_v59, %v2918_v5  ;;  %v2859_v49 = vpop.xlane.xlu0 %2858 }
 0xafe   : > { %4775 = vrsqrt.f32 %v2893_v14  ;;  %v2879_v41 = vmul.f32 0.0078125, %v2859_v49  ;;  %v2894_v43 = vadd.f32 1e-05, %v2878_v16 }
 0xaff   : > { %v2976_v9 = vpack.c.bf16 %v6535_v2, %v6532_v6  ;;  %v2941_v34 = vmul.f32 %v6520_v59, %v2919_v27  ;;  %v6549_v35 = vadd.f32 %v6528_v12, %v2940_v13  ;;  %4777 = vrsqrt.f32 %v2892_v58  ;;  %v2861_v42 = vpop.xlane.xlu1 %2860 }
 0xb00   : > { %v4768_v61 = vpop.eup %4767  ;;  %v2895_v3 = vadd.f32 1e-05, %v2879_v41  ;;  %v2880_v22 = vmul.f32 0.0078125, %v2861_v42 }
 0xb01   : > { %3127 = vmatmul.mubr.bf16.vlgmr.msra.gmra.mrb[64].mxu0 %v2976_v9  ;;  %v4770_v50 = vpop.eup %4769  ;;  %v6545_v17 = vadd.f32 %v6528_v12, %v2941_v34  ;;  %v2921_v26 = vmul.f32 %v4768_v61, %v6461_v30  ;;  %v2863_v62 = vpop.xlane.xlu0 %2862 }
 0xb02   : > { %3136 = vmatprep.mubr.bf16.mxu0 %v7059_v15  ;;  %v2920_v4 = vmul.f32 %v4770_v50, %v6456_v56  ;;  %4779 = vrsqrt.f32 %v2895_v3  ;;  %v2881_v21 = vmul.f32 0.0078125, %v2863_v62  ;;  %v2896_v32 = vadd.f32 1e-05, %v2880_v22  ;;  %v4627_v22 = vld [vmem:[#allocation11 + $0xf0] sm:$0xff]  }
 0xb03   : > { %v2977_v0 = vpack.c.bf16 %v6545_v17, %v6549_v35  ;;  %v2943_v25 = vmul.f32 %v6520_v59, %v2921_v26  ;;  %4781 = vrsqrt.f32 %v2894_v43  ;;  %v2865_v40 = vpop.xlane.xlu1 %2864 }
 0xb04   : > { %v4772_v18 = vpop.eup %4771  ;;  %v2942_v30 = vmul.f32 %v6520_v59, %v2920_v4  ;;  %v2897_v19 = vadd.f32 1e-05, %v2881_v21  ;;  %v2882_v55 = vmul.f32 0.0078125, %v2865_v40 }
 0xb05   : > { %v4774_v60 = vpop.eup %4773  ;;  %v6558_v56 = vadd.f32 %v6528_v12, %v2943_v25  ;;  %v2923_v23 = vmul.f32 %v4772_v18, %v6471_v11  ;;  %v2867_v46 = vpop.xlane.xlu0 %2866 }
 0xb06   : > { %v6562_v44 = vadd.f32 %v6528_v12, %v2942_v30  ;;  %v2922_v10 = vmul.f32 %v4774_v60, %v6466_v51  ;;  %4783 = vrsqrt.f32 %v2897_v19  ;;  %v2883_v39 = vmul.f32 0.0078125, %v2867_v46 }
 0xb07   : > { %v2945_v7 = vmul.f32 %v6520_v59, %v2923_v23  ;;  %4785 = vrsqrt.f32 %v2896_v32  ;;  %v2898_v49 = vadd.f32 1e-05, %v2882_v55  ;;  %v7071_v46 = vsub.s32 1, %v5926_v45 }
 0xb08   : > { %v2978_v38 = vpack.c.bf16 %v6558_v56, %v6562_v44  ;;  %v4776_v20 = vpop.eup %4775  ;;  %v2944_v11 = vmul.f32 %v6520_v59, %v2922_v10  ;;  %v2899_v50 = vadd.f32 1e-05, %v2883_v39 }
 0xb09   : > { %3137 = vmatmul.mubr.bf16.gmra.mrb[68].mxu0 %v2977_v0  ;;  %v4778_v33 = vpop.eup %4777  ;;  %v6571_v51 = vadd.f32 %v6528_v12, %v2945_v7  ;;  %v2925_v24 = vmul.f32 %v4776_v20, %v6481_v8 }
 0xb0a   : > { %3146 = vmatprep.mubr.bf16.mxu0 %v7059_v15  ;;  %v6575_v5 = vadd.f32 %v6528_v12, %v2944_v11  ;;  %v2924_v27 = vmul.f32 %v4778_v33, %v6476_v36  ;;  %4787 = vrsqrt.f32 %v2899_v50  ;;  %v4628_v11 = vld [vmem:[#allocation11 + $0xb0] sm:$0xff]   ;;  %v4629_v33 = vld [vmem:[#allocation11 + $0xf8] sm:$0xff]  }
 0xb0b   : > { %v2947_v34 = vmul.f32 %v6520_v59, %v2925_v24  ;;  %4789 = vrsqrt.f32 %v2898_v49 }
 0xb0c   : > { %v2979_v9 = vpack.c.bf16 %v6571_v51, %v6575_v5  ;;  %v4780_v61 = vpop.eup %4779  ;;  %v2946_v8 = vmul.f32 %v6520_v59, %v2924_v27 }
 0xb0d   : > { %v4782_v13 = vpop.eup %4781  ;;  %v6584_v14 = vadd.f32 %v6528_v12, %v2947_v34  ;;  %v2927_v36 = vmul.f32 %v4780_v61, %v6491_v57 }
 0xb0e   : > { %v6588_v26 = vadd.f32 %v6528_v12, %v2946_v8  ;;  %v2926_v58 = vmul.f32 %v4782_v13, %v6486_v29 }
 0xb0f   : > { %v2949_v4 = vmul.f32 %v6520_v59, %v2927_v36 }
 0xb10   : > { %v2980_v52 = vpack.c.bf16 %v6584_v14, %v6588_v26  ;;  %v4784_v41 = vpop.eup %4783  ;;  %v2948_v0 = vmul.f32 %v6520_v59, %v2926_v58 }
 0xb11   : > { %3147 = vmatmul.mubr.bf16.gmra.mrb[72].mxu0 %v2978_v38  ;;  %v4786_v25 = vpop.eup %4785  ;;  %v6597_v57 = vadd.f32 %v6528_v12, %v2949_v4  ;;  %v2929_v18 = vmul.f32 %v4784_v41, %v6501_v1 }
 0xb12   : > { %3156 = vmatprep.mubr.bf16.mxu0 %v7059_v15  ;;  %v6601_v29 = vadd.f32 %v6528_v12, %v2948_v0  ;;  %v2928_v16 = vmul.f32 %v4786_v25, %v6496_v31 }
 0xb13   : > { %v2951_v60 = vmul.f32 %v6520_v59, %v2929_v18 }
 0xb14   : > { %v2981_v30 = vpack.c.bf16 %v6597_v57, %v6601_v29  ;;  %v4788_v3 = vpop.eup %4787  ;;  %v2950_v62 = vmul.f32 %v6520_v59, %v2928_v16 }
 0xb15   : > { %v4790_v23 = vpop.eup %4789  ;;  %v6610_v43 = vadd.f32 %v6528_v12, %v2951_v60  ;;  %v2931_v1 = vmul.f32 %v4788_v3, %v6511_v28 }
 0xb16   : > { %v6614_v42 = vadd.f32 %v6528_v12, %v2950_v62  ;;  %v2930_v31 = vmul.f32 %v4790_v23, %v6506_v37  ;;  %v4626_v37 = vld [vmem:[#allocation11 + $0xa8] sm:$0xff]  }
 0xb17   : > { %v2953_v21 = vmul.f32 %v6520_v59, %v2931_v1  ;;  %4228 = vmatpush3.bf16.msra.mxu1 %v4626_v37 }
 0xb18   : > { %v2982_v10 = vpack.c.bf16 %v6610_v43, %v6614_v42  ;;  %v2952_v38 = vmul.f32 %v6520_v59, %v2930_v31  ;;  %4229 = vmatprep.subr.bf16.mxu1 %v4627_v22  ;;  %v4630_v59 = vld [vmem:[#allocation11 + $0xb8] sm:$0xff]  }
 0xb19   : > { %3157 = vmatmul.mubr.bf16.gmra.mrb[76].mxu0 %v2979_v9  ;;  %v6623_v7 = vadd.f32 %v6528_v12, %v2953_v21 }
 0xb1a   : > { %3166 = vmatprep.mubr.bf16.mxu0 %v7059_v15  ;;  %v6626_v28 = vadd.f32 %v6528_v12, %v2952_v38  ;;  %v7070_v12 = vsub.s32 0, %v5926_v45 }
 0xb1b   : > { %4230 = vmatpush3.bf16.msra.mxu1 %v4628_v11 }
 0xb1c   : > { %v2983_v20 = vpack.c.bf16 %v6623_v7, %v6626_v28  ;;  %4231 = vmatprep.subr.bf16.mxu1 %v4629_v33 }
 0xb1f   : > { %4232 = vmatpush3.bf16.msra.mxu1 %v4630_v59 }
 0xb21   : > { %3167 = vmatmul.mubr.bf16.gmra.mrb[80].mxu0 %v2980_v52 }
 0xb22   : > { %3176 = vmatprep.mubr.bf16.mxu0 %v7059_v15 }
 0xb29   : > { %3177 = vmatmul.mubr.bf16.gmra.mrb[84].mxu0 %v2981_v30 }
 0xb2a   : > { %3186 = vmatprep.mubr.bf16.mxu0 %v7059_v15 }
 0xb31   : > { %3187 = vmatmul.mubr.bf16.gmra.mrb[88].mxu0 %v2982_v10 }
 0xb32   : > { %3196 = vmatprep.mubr.bf16.mxu0 %v7059_v15  ;;  %v4045_v15 = vld [vmem:[%s6971_s9 + $0x2] sm:$0x3] }
 0xb33   : > { %v6635_v19 = vrot.slane %v4045_v15, %v7070_v12  ;;  %v6639_v24 = vrot.slane %v4045_v15, %v7071_v46 }
 0xb39   : > { %3197 = vmatmul.mubr.bf16.gmra.mrb[92].mxu0 %v2983_v20 }
 0xbd4   : > { %v3128_v32 = vpop.f32.mrb[64].mxu0 }
 0xbd5   : > { %v3129_v40 = vadd.f32 %v3128_v32, %v6635_v19  ;;  %v3130_v27 = vpop.f32.mrb[65].mxu0 }
 0xbd6   : > { %v3131_v39 = vadd.f32 %v3130_v27, %v6639_v24  ;;  %v3132_v9 = vpop.f32.mrb[66].mxu0 }
 0xbd7   : > { %v3133_v34 = vadd.f32 %v3132_v9, %v6635_v19  ;;  %v3134_v61 = vpop.f32.mrb[67].mxu0  ;;  %v3207_v8 = vmax.f32 %v3129_v40, 0.0 }
 0xbd8   : > { %v3135_v55 = vadd.f32 %v3134_v61, %v6639_v24  ;;  %v3208_v50 = vmax.f32 %v3131_v39, 0.0 }
 0xbd9   : > { %v3209_v13 = vmax.f32 %v3133_v34, 0.0 }
 0xbda   : > { %v3210_v36 = vmax.f32 %v3135_v55, 0.0 }
 0xbdb   : > { %v3239_v49 = vpack.c.bf16 %v3209_v13, %v3207_v8 }
 0xbdc   : > { %v3240_v45 = vpack.c.bf16 %v3210_v36, %v3208_v50  ;;  %v3138_v58 = vpop.f32.mrb[68].mxu0 }
 0xbdd   : > { %v3139_v52 = vadd.f32 %v3138_v58, %v6635_v19  ;;  %v3140_v4 = vpop.f32.mrb[69].mxu0 }
 0xbde   : > { %v3141_v41 = vadd.f32 %v3140_v4, %v6639_v24  ;;  %v3142_v0 = vpop.f32.mrb[70].mxu0  ;;  %3424 = vmatprep.mubr.bf16.mxu1 %v3240_v45 }
 0xbdf   : > { %v3143_v25 = vadd.f32 %v3142_v0, %v6635_v19  ;;  %v3144_v18 = vpop.f32.mrb[71].mxu0  ;;  %3425 = vmatmul.mubr.bf16.vlgmr.msra.gmra.mrb[64].mxu1 %v3239_v49  ;;  %v3211_v30 = vmax.f32 %v3139_v52, 0.0 }
 0xbe0   : > { %v3145_v16 = vadd.f32 %v3144_v18, %v6639_v24  ;;  %v3212_v3 = vmax.f32 %v3141_v41, 0.0 }
 0xbe1   : > { %v3213_v60 = vmax.f32 %v3143_v25, 0.0 }
 0xbe2   : > { %v3214_v62 = vmax.f32 %v3145_v16, 0.0 }
 0xbe3   : > { %v3241_v23 = vpack.c.bf16 %v3213_v60, %v3211_v30 }
 0xbe4   : > { %v3242_v1 = vpack.c.bf16 %v3214_v62, %v3212_v3  ;;  %v3148_v31 = vpop.f32.mrb[72].mxu0 }
 0xbe5   : > { %v3149_v10 = vadd.f32 %v3148_v31, %v6635_v19  ;;  %v3150_v21 = vpop.f32.mrb[73].mxu0 }
 0xbe6   : > { %v3151_v38 = vadd.f32 %v3150_v21, %v6639_v24  ;;  %v3152_v20 = vpop.f32.mrb[74].mxu0  ;;  %3432 = vmatprep.mubr.bf16.mxu1 %v3242_v1 }
 0xbe7   : > { %v3153_v37 = vadd.f32 %v3152_v20, %v6635_v19  ;;  %v3154_v22 = vpop.f32.mrb[75].mxu0  ;;  %3433 = vmatmul.mubr.bf16.gmra.mrb[68].mxu1 %v3241_v23  ;;  %v3215_v33 = vmax.f32 %v3149_v10, 0.0 }
 0xbe8   : > { %v3155_v11 = vadd.f32 %v3154_v22, %v6639_v24  ;;  %v3216_v15 = vmax.f32 %v3151_v38, 0.0 }
 0xbe9   : > { %v3217_v59 = vmax.f32 %v3153_v37, 0.0 }
 0xbea   : > { %v3218_v12 = vmax.f32 %v3155_v11, 0.0 }
 0xbeb   : > { %v3243_v46 = vpack.c.bf16 %v3217_v59, %v3215_v33 }
 0xbec   : > { %v3244_v32 = vpack.c.bf16 %v3218_v12, %v3216_v15  ;;  %v3158_v40 = vpop.f32.mrb[76].mxu0 }
 0xbed   : > { %v3159_v27 = vadd.f32 %v3158_v40, %v6635_v19  ;;  %v3160_v39 = vpop.f32.mrb[77].mxu0 }
 0xbee   : > { %v3161_v9 = vadd.f32 %v3160_v39, %v6639_v24  ;;  %v3162_v34 = vpop.f32.mrb[78].mxu0  ;;  %3440 = vmatprep.mubr.bf16.mxu1 %v3244_v32 }
 0xbef   : > { %v3163_v61 = vadd.f32 %v3162_v34, %v6635_v19  ;;  %v3164_v55 = vpop.f32.mrb[79].mxu0  ;;  %3441 = vmatmul.mubr.bf16.gmra.mrb[72].mxu1 %v3243_v46  ;;  %v3219_v13 = vmax.f32 %v3159_v27, 0.0 }
 0xbf0   : > { %v3165_v8 = vadd.f32 %v3164_v55, %v6639_v24  ;;  %v3220_v36 = vmax.f32 %v3161_v9, 0.0 }
 0xbf1   : > { %v3221_v50 = vmax.f32 %v3163_v61, 0.0 }
 0xbf2   : > { %v3222_v49 = vmax.f32 %v3165_v8, 0.0 }
 0xbf3   : > { %v3245_v45 = vpack.c.bf16 %v3221_v50, %v3219_v13 }
 0xbf4   : > { %v3246_v58 = vpack.c.bf16 %v3222_v49, %v3220_v36  ;;  %v3168_v52 = vpop.f32.mrb[80].mxu0 }
 0xbf5   : > { %v3169_v4 = vadd.f32 %v3168_v52, %v6635_v19  ;;  %v3170_v41 = vpop.f32.mrb[81].mxu0 }
 0xbf6   : > { %v3171_v0 = vadd.f32 %v3170_v41, %v6639_v24  ;;  %v3172_v25 = vpop.f32.mrb[82].mxu0  ;;  %3448 = vmatprep.mubr.bf16.mxu1 %v3246_v58 }
 0xbf7   : > { %v3173_v18 = vadd.f32 %v3172_v25, %v6635_v19  ;;  %v3174_v16 = vpop.f32.mrb[83].mxu0  ;;  %3449 = vmatmul.mubr.bf16.gmra.mrb[76].mxu1 %v3245_v45  ;;  %v3223_v60 = vmax.f32 %v3169_v4, 0.0 }
 0xbf8   : > { %v3175_v30 = vadd.f32 %v3174_v16, %v6639_v24  ;;  %v3224_v62 = vmax.f32 %v3171_v0, 0.0 }
 0xbf9   : > { %v3225_v3 = vmax.f32 %v3173_v18, 0.0 }
 0xbfa   : > { %v3226_v23 = vmax.f32 %v3175_v30, 0.0 }
 0xbfb   : > { %v3247_v1 = vpack.c.bf16 %v3225_v3, %v3223_v60 }
 0xbfc   : > { %v3248_v31 = vpack.c.bf16 %v3226_v23, %v3224_v62  ;;  %v3178_v10 = vpop.f32.mrb[84].mxu0 }
 0xbfd   : > { %v3179_v21 = vadd.f32 %v3178_v10, %v6635_v19  ;;  %v3180_v38 = vpop.f32.mrb[85].mxu0 }
 0xbfe   : > { %v3181_v20 = vadd.f32 %v3180_v38, %v6639_v24  ;;  %v3182_v37 = vpop.f32.mrb[86].mxu0  ;;  %3456 = vmatprep.mubr.bf16.mxu1 %v3248_v31  ;;  %v6676_v38 = vld [vmem:[%s6973_s11 + $0x1] ss:$0 sm:$0xff] }
 0xbff   : > { %v3183_v22 = vadd.f32 %v3182_v37, %v6635_v19  ;;  %v3184_v11 = vpop.f32.mrb[87].mxu0  ;;  %3457 = vmatmul.mubr.bf16.gmra.mrb[80].mxu1 %v3247_v1  ;;  %v3227_v59 = vmax.f32 %v3179_v21, 0.0 }
 0xc00   : > { %v3185_v33 = vadd.f32 %v3184_v11, %v6639_v24  ;;  %v3228_v12 = vmax.f32 %v3181_v20, 0.0 }
 0xc01   : > { %v3229_v15 = vmax.f32 %v3183_v22, 0.0 }
 0xc02   : > { %v3230_v46 = vmax.f32 %v3185_v33, 0.0 }
 0xc03   : > { %v3249_v32 = vpack.c.bf16 %v3229_v15, %v3227_v59 }
 0xc04   : > { %v3250_v40 = vpack.c.bf16 %v3230_v46, %v3228_v12  ;;  %v3188_v27 = vpop.f32.mrb[88].mxu0 }
 0xc05   : > { %v3189_v39 = vadd.f32 %v3188_v27, %v6635_v19  ;;  %v3190_v9 = vpop.f32.mrb[89].mxu0 }
 0xc06   : > { %v3191_v34 = vadd.f32 %v3190_v9, %v6639_v24  ;;  %v3192_v61 = vpop.f32.mrb[90].mxu0  ;;  %3464 = vmatprep.mubr.bf16.mxu1 %v3250_v40 }
 0xc07   : > { %v3193_v55 = vadd.f32 %v3192_v61, %v6635_v19  ;;  %v3194_v8 = vpop.f32.mrb[91].mxu0  ;;  %3465 = vmatmul.mubr.bf16.gmra.mrb[84].mxu1 %v3249_v32  ;;  %v3231_v50 = vmax.f32 %v3189_v39, 0.0 }
 0xc08   : > { %v3195_v13 = vadd.f32 %v3194_v8, %v6639_v24  ;;  %v3232_v49 = vmax.f32 %v3191_v34, 0.0 }
 0xc09   : > { %v3233_v36 = vmax.f32 %v3193_v55, 0.0 }
 0xc0a   : > { %v3234_v45 = vmax.f32 %v3195_v13, 0.0 }
 0xc0b   : > { %v3251_v58 = vpack.c.bf16 %v3233_v36, %v3231_v50 }
 0xc0c   : > { %v3252_v52 = vpack.c.bf16 %v3234_v45, %v3232_v49  ;;  %v3198_v4 = vpop.f32.mrb[92].mxu0 }
 0xc0d   : > { %v3199_v41 = vadd.f32 %v3198_v4, %v6635_v19  ;;  %v3200_v0 = vpop.f32.mrb[93].mxu0 }
 0xc0e   : > { %v3201_v25 = vadd.f32 %v3200_v0, %v6639_v24  ;;  %v3202_v18 = vpop.f32.mrb[94].mxu0  ;;  %3472 = vmatprep.mubr.bf16.mxu1 %v3252_v52 }
 0xc0f   : > { %v3203_v16 = vadd.f32 %v3202_v18, %v6635_v19  ;;  %v3204_v30 = vpop.f32.mrb[95].mxu0  ;;  %3473 = vmatmul.mubr.bf16.gmra.mrb[88].mxu1 %v3251_v58  ;;  %v3235_v3 = vmax.f32 %v3199_v41, 0.0  ;;  %v4825_v58 = vld [vmem:[%s5402_s13 + $0x78] sm:$0xff]  ;;  %v7072_v18 = vld [vmem:[#allocation27_spill] sm:$0xff]  ;;  %s3813_s13 = scalar_lea.sflag [#allocation4], %s561_s27 }
 0xc10   : > { %v3205_v60 = vadd.f32 %v3204_v30, %v6639_v24  ;;  %v3236_v23 = vmax.f32 %v3201_v25, 0.0  ;;  %v3775_v52 = vsel %vm3745_vm0, %v4825_v58, 0.0 }
 0xc11   : > { %v3237_v62 = vmax.f32 %v3203_v16, 0.0  ;;  %v3776_v16 = vadd.f32 %v3775_v52, %v7072_v18 }
 0xc12   : > { %v3238_v1 = vmax.f32 %v3205_v60, 0.0 }
 0xc13   : > { %v3253_v31 = vpack.c.bf16 %v3237_v62, %v3235_v3 }
 0xc14   : > { %v3254_v10 = vpack.c.bf16 %v3238_v1, %v3236_v23 }
 0xc16   : > { %3480 = vmatprep.mubr.bf16.mxu1 %v3254_v10 }
 0xc17   : > { %3481 = vmatmul.mubr.bf16.gmra.mrb[92].mxu1 %v3253_v31 }
 0xcb2   : > { %v4233_v21 = vpop.f32.mrb[64].mxu1 }
 0xcb3   : > { %v4234_v20 = vpop.f32.mrb[65].mxu1 }
 0xcb4   : > { %v4235_v19 = vadd.f32 %v4234_v20, %v4233_v21  ;;  %v4236_v37 = vpop.f32.mrb[66].mxu1 }
 0xcb5   : > { %v4237_v22 = vpop.f32.mrb[67].mxu1 }
 0xcb6   : > { %v3427_v24 = vadd.f32 %v4235_v19, %v6676_v38  ;;  %v4238_v11 = vadd.f32 %v4237_v22, %v4236_v37 }
 0xcb8   : > { %v3430_v33 = vadd.f32 %v4238_v11, %v6676_v38  ;;  %v6681_v59 = vadd.f32 %v3427_v24, %v6532_v6 }
 0xcba   : > { %3509 = vadd.xlane.f32.xlu1 %v6681_v59  ;;  %v4239_v15 = vpop.f32.mrb[68].mxu1  ;;  %v6685_v12 = vadd.f32 %v3430_v33, %v6535_v2 }
 0xcbb   : > { %v4240_v46 = vpop.f32.mrb[69].mxu1 }
 0xcbc   : > { %v4241_v32 = vadd.f32 %v4240_v46, %v4239_v15  ;;  %3511 = vadd.xlane.f32.xlu0 %v6685_v12  ;;  %v4242_v40 = vpop.f32.mrb[70].mxu1 }
 0xcbd   : > { %v4243_v27 = vpop.f32.mrb[71].mxu1 }
 0xcbe   : > { %v3435_v39 = vadd.f32 %v4241_v32, %v6676_v38  ;;  %v4244_v9 = vadd.f32 %v4243_v27, %v4242_v40 }
 0xcc0   : > { %v3438_v34 = vadd.f32 %v4244_v9, %v6676_v38  ;;  %v6691_v6 = vadd.f32 %v3435_v39, %v6549_v35 }
 0xcc2   : > { %3513 = vadd.xlane.f32.xlu1 %v6691_v6  ;;  %v4245_v61 = vpop.f32.mrb[72].mxu1  ;;  %v6695_v2 = vadd.f32 %v3438_v34, %v6545_v17 }
 0xcc3   : > { %v4246_v55 = vpop.f32.mrb[73].mxu1 }
 0xcc4   : > { %v4247_v8 = vadd.f32 %v4246_v55, %v4245_v61  ;;  %3515 = vadd.xlane.f32.xlu0 %v6695_v2  ;;  %v4248_v13 = vpop.f32.mrb[74].mxu1 }
 0xcc5   : > { %v4249_v50 = vpop.f32.mrb[75].mxu1 }
 0xcc6   : > { %v3443_v36 = vadd.f32 %v4247_v8, %v6676_v38  ;;  %v4250_v49 = vadd.f32 %v4249_v50, %v4248_v13 }
 0xcc8   : > { %v3446_v45 = vadd.f32 %v4250_v49, %v6676_v38  ;;  %v6701_v35 = vadd.f32 %v3443_v36, %v6562_v44 }
 0xcca   : > { %3517 = vadd.xlane.f32.xlu1 %v6701_v35  ;;  %v4251_v17 = vpop.f32.mrb[76].mxu1  ;;  %v6707_v4 = vadd.f32 %v3446_v45, %v6558_v56 }
 0xccb   : > { %v4252_v41 = vpop.f32.mrb[77].mxu1 }
 0xccc   : > { %v4253_v0 = vadd.f32 %v4252_v41, %v4251_v17  ;;  %3519 = vadd.xlane.f32.xlu0 %v6707_v4  ;;  %v4254_v25 = vpop.f32.mrb[78].mxu1 }
 0xccd   : > { %v4255_v30 = vpop.f32.mrb[79].mxu1 }
 0xcce   : > { %v3451_v44 = vadd.f32 %v4253_v0, %v6676_v38  ;;  %v4256_v60 = vadd.f32 %v4255_v30, %v4254_v25 }
 0xcd0   : > { %v3454_v3 = vadd.f32 %v4256_v60, %v6676_v38  ;;  %v6714_v62 = vadd.f32 %v3451_v44, %v6575_v5 }
 0xcd2   : > { %3521 = vadd.xlane.f32.xlu1 %v6714_v62  ;;  %v4257_v56 = vpop.f32.mrb[80].mxu1  ;;  %v6718_v23 = vadd.f32 %v3454_v3, %v6571_v51 }
 0xcd3   : > { %v4258_v1 = vpop.f32.mrb[81].mxu1 }
 0xcd4   : > { %v4259_v31 = vadd.f32 %v4258_v1, %v4257_v56  ;;  %3523 = vadd.xlane.f32.xlu0 %v6718_v23  ;;  %v4260_v10 = vpop.f32.mrb[82].mxu1 }
 0xcd5   : > { %v4261_v21 = vpop.f32.mrb[83].mxu1 }
 0xcd6   : > { %v3459_v20 = vadd.f32 %v4259_v31, %v6676_v38  ;;  %v4262_v19 = vadd.f32 %v4261_v21, %v4260_v10 }
 0xcd8   : > { %v3462_v37 = vadd.f32 %v4262_v19, %v6676_v38  ;;  %v6724_v5 = vadd.f32 %v3459_v20, %v6588_v26 }
 0xcda   : > { %3525 = vadd.xlane.f32.xlu1 %v6724_v5  ;;  %v4263_v22 = vpop.f32.mrb[84].mxu1  ;;  %v6728_v51 = vadd.f32 %v3462_v37, %v6584_v14 }
 0xcdb   : > { %v4264_v24 = vpop.f32.mrb[85].mxu1 }
 0xcdc   : > { %v4265_v11 = vadd.f32 %v4264_v24, %v4263_v22  ;;  %3527 = vadd.xlane.f32.xlu0 %v6728_v51  ;;  %v4266_v33 = vpop.f32.mrb[86].mxu1 }
 0xcdd   : > { %v4267_v15 = vpop.f32.mrb[87].mxu1 }
 0xcde   : > { %v3467_v46 = vadd.f32 %v4265_v11, %v6676_v38  ;;  %v4268_v32 = vadd.f32 %v4267_v15, %v4266_v33 }
 0xce0   : > { %v3470_v40 = vadd.f32 %v4268_v32, %v6676_v38  ;;  %v6734_v26 = vadd.f32 %v3467_v46, %v6601_v29 }
 0xce2   : > { %3529 = vadd.xlane.f32.xlu1 %v6734_v26  ;;  %v4269_v27 = vpop.f32.mrb[88].mxu1  ;;  %v6738_v14 = vadd.f32 %v3470_v40, %v6597_v57 }
 0xce3   : > { %v4270_v39 = vpop.f32.mrb[89].mxu1 }
 0xce4   : > { %v4271_v9 = vadd.f32 %v4270_v39, %v4269_v27  ;;  %3531 = vadd.xlane.f32.xlu0 %v6738_v14  ;;  %v4272_v34 = vpop.f32.mrb[90].mxu1 }
 0xce5   : > { %v4273_v61 = vpop.f32.mrb[91].mxu1 }
 0xce6   : > { %v3475_v55 = vadd.f32 %v4271_v9, %v6676_v38  ;;  %v4274_v8 = vadd.f32 %v4273_v61, %v4272_v34 }
 0xce8   : > { %v3478_v13 = vadd.f32 %v4274_v8, %v6676_v38  ;;  %v6744_v29 = vadd.f32 %v3475_v55, %v6614_v42 }
 0xcea   : > { %3533 = vadd.xlane.f32.xlu1 %v6744_v29  ;;  %v4275_v50 = vpop.f32.mrb[92].mxu1  ;;  %v6748_v57 = vadd.f32 %v3478_v13, %v6610_v43 }
 0xceb   : > { %v4276_v36 = vpop.f32.mrb[93].mxu1 }
 0xcec   : > { %v4277_v49 = vadd.f32 %v4276_v36, %v4275_v50  ;;  %3535 = vadd.xlane.f32.xlu0 %v6748_v57  ;;  %v4278_v45 = vpop.f32.mrb[94].mxu1 }
 0xced   : > { %v4279_v58 = vpop.f32.mrb[95].mxu1 }
 0xcee   : > { %v3483_v52 = vadd.f32 %v4277_v49, %v6676_v38  ;;  %v4280_v17 = vadd.f32 %v4279_v58, %v4278_v45 }
 0xcf0   : > { %v3486_v41 = vadd.f32 %v4280_v17, %v6676_v38  ;;  %v6754_v42 = vadd.f32 %v3483_v52, %v6626_v28 }
 0xcf2   : > { %3537 = vadd.xlane.f32.xlu1 %v6754_v42  ;;  %v6758_v0 = vadd.f32 %v3486_v41, %v6623_v7 }
 0xcf4   : > { %3539 = vadd.xlane.f32.xlu0 %v6758_v0 }
 0xcf6   : > { %3777 = vadd.xlane.f32.xlu1 %v3776_v16 }
 0xd47   : > { %v3510_v43 = vpop.xlane.xlu1 %3509 }
 0xd48   : > { %v3541_v25 = vmul.f32 0.0078125, %v3510_v43 }
 0xd49   : > { %v3512_v18 = vpop.xlane.xlu0 %3511 }
 0xd4a   : > { %v6762_v30 = vsub.f32 %v6681_v59, %v3541_v25  ;;  %v3542_v44 = vmul.f32 0.0078125, %v3512_v18 }
 0xd4c   : > { %v6765_v38 = vsub.f32 %v6685_v12, %v3542_v44  ;;  %v3573_v28 = vmul.f32 %v6762_v30, %v6762_v30 }
 0xd4e   : > { %3589 = vadd.xlane.f32.xlu0 %v3573_v28  ;;  %v3574_v7 = vmul.f32 %v6765_v38, %v6765_v38 }
 0xd4f   : > { %v3514_v60 = vpop.xlane.xlu1 %3513 }
 0xd50   : > { %v3543_v3 = vmul.f32 0.0078125, %v3514_v60  ;;  %3591 = vadd.xlane.f32.xlu1 %v3574_v7 }
 0xd51   : > { %v3516_v16 = vpop.xlane.xlu0 %3515 }
 0xd52   : > { %v6772_v56 = vsub.f32 %v6691_v6, %v3543_v3  ;;  %v3544_v59 = vmul.f32 0.0078125, %v3516_v16 }
 0xd54   : > { %v6775_v1 = vsub.f32 %v6695_v2, %v3544_v59  ;;  %v3575_v12 = vmul.f32 %v6772_v56, %v6772_v56 }
 0xd56   : > { %3593 = vadd.xlane.f32.xlu0 %v3575_v12  ;;  %v3576_v31 = vmul.f32 %v6775_v1, %v6775_v1 }
 0xd57   : > { %v3518_v10 = vpop.xlane.xlu1 %3517 }
 0xd58   : > { %v3545_v21 = vmul.f32 0.0078125, %v3518_v10  ;;  %3595 = vadd.xlane.f32.xlu1 %v3576_v31 }
 0xd59   : > { %v3520_v20 = vpop.xlane.xlu0 %3519 }
 0xd5a   : > { %v6782_v19 = vsub.f32 %v6701_v35, %v3545_v21  ;;  %v3546_v6 = vmul.f32 0.0078125, %v3520_v20 }
 0xd5c   : > { %v6785_v37 = vsub.f32 %v6707_v4, %v3546_v6  ;;  %v3577_v2 = vmul.f32 %v6782_v19, %v6782_v19 }
 0xd5e   : > { %3597 = vadd.xlane.f32.xlu0 %v3577_v2  ;;  %v3578_v22 = vmul.f32 %v6785_v37, %v6785_v37 }
 0xd5f   : > { %v3522_v24 = vpop.xlane.xlu1 %3521 }
 0xd60   : > { %v3547_v11 = vmul.f32 0.0078125, %v3522_v24  ;;  %3599 = vadd.xlane.f32.xlu1 %v3578_v22 }
 0xd61   : > { %v3524_v33 = vpop.xlane.xlu0 %3523 }
 0xd62   : > { %v6792_v15 = vsub.f32 %v6714_v62, %v3547_v11  ;;  %v3548_v35 = vmul.f32 0.0078125, %v3524_v33 }
 0xd64   : > { %v6795_v46 = vsub.f32 %v6718_v23, %v3548_v35  ;;  %v3579_v4 = vmul.f32 %v6792_v15, %v6792_v15 }
 0xd66   : > { %3601 = vadd.xlane.f32.xlu0 %v3579_v4  ;;  %v3580_v32 = vmul.f32 %v6795_v46, %v6795_v46 }
 0xd67   : > { %v3526_v40 = vpop.xlane.xlu1 %3525 }
 0xd68   : > { %v3549_v27 = vmul.f32 0.0078125, %v3526_v40  ;;  %3603 = vadd.xlane.f32.xlu1 %v3580_v32 }
 0xd69   : > { %v3528_v39 = vpop.xlane.xlu0 %3527 }
 0xd6a   : > { %v6802_v9 = vsub.f32 %v6724_v5, %v3549_v27  ;;  %v3550_v62 = vmul.f32 0.0078125, %v3528_v39 }
 0xd6c   : > { %v6805_v34 = vsub.f32 %v6728_v51, %v3550_v62  ;;  %v3581_v23 = vmul.f32 %v6802_v9, %v6802_v9 }
 0xd6e   : > { %3605 = vadd.xlane.f32.xlu0 %v3581_v23  ;;  %v3582_v61 = vmul.f32 %v6805_v34, %v6805_v34 }
 0xd6f   : > { %v3530_v55 = vpop.xlane.xlu1 %3529 }
 0xd70   : > { %v3551_v8 = vmul.f32 0.0078125, %v3530_v55  ;;  %3607 = vadd.xlane.f32.xlu1 %v3582_v61 }
 0xd71   : > { %v3532_v13 = vpop.xlane.xlu0 %3531 }
 0xd72   : > { %v6812_v50 = vsub.f32 %v6734_v26, %v3551_v8  ;;  %v3552_v5 = vmul.f32 0.0078125, %v3532_v13 }
 0xd74   : > { %v6815_v36 = vsub.f32 %v6738_v14, %v3552_v5  ;;  %v3583_v51 = vmul.f32 %v6812_v50, %v6812_v50 }
 0xd76   : > { %3609 = vadd.xlane.f32.xlu0 %v3583_v51  ;;  %v3584_v49 = vmul.f32 %v6815_v36, %v6815_v36 }
 0xd77   : > { %v3534_v45 = vpop.xlane.xlu1 %3533 }
 0xd78   : > { %v3553_v58 = vmul.f32 0.0078125, %v3534_v45  ;;  %3611 = vadd.xlane.f32.xlu1 %v3584_v49 }
 0xd79   : > { %v3536_v52 = vpop.xlane.xlu0 %3535 }
 0xd7a   : > { %v6822_v17 = vsub.f32 %v6744_v29, %v3553_v58  ;;  %v3554_v26 = vmul.f32 0.0078125, %v3536_v52 }
 0xd7c   : > { %v6825_v41 = vsub.f32 %v6748_v57, %v3554_v26  ;;  %v3585_v14 = vmul.f32 %v6822_v17, %v6822_v17 }
 0xd7e   : > { %3613 = vadd.xlane.f32.xlu0 %v3585_v14  ;;  %v3586_v43 = vmul.f32 %v6825_v41, %v6825_v41 }
 0xd7f   : > { %v3538_v25 = vpop.xlane.xlu1 %3537 }
 0xd80   : > { %v3555_v18 = vmul.f32 0.0078125, %v3538_v25  ;;  %3615 = vadd.xlane.f32.xlu1 %v3586_v43  ;;  %v6847_v25 = vld [vmem:[%s6974_s12 + $0x1] ss:$0 sm:$0xff] }
 0xd81   : > { %v3540_v44 = vpop.xlane.xlu0 %3539 }
 0xd82   : > { %v6832_v28 = vsub.f32 %v6754_v42, %v3555_v18  ;;  %v3556_v29 = vmul.f32 0.0078125, %v3540_v44 }
 0xd83   : > { %v3778_v7 = vpop.xlane.xlu1 %3777 }
 0xd84   : > { %v6835_v60 = vsub.f32 %v6758_v0, %v3556_v29  ;;  %v3587_v57 = vmul.f32 %v6832_v28, %v6832_v28  ;;  %v3779_v3 = vrot.slane %v3778_v7, 4 }
 0xd86   : > { %3617 = vadd.xlane.f32.xlu0 %v3587_v57  ;;  %v3588_v16 = vmul.f32 %v6835_v60, %v6835_v60  ;;  %v3780_v59 = vadd.f32 %v3779_v3, %v3778_v7 }
 0xd88   : > { %3619 = vadd.xlane.f32.xlu1 %v3588_v16  ;;  %v3781_v12 = vrot.slane %v3780_v59, 2 }
 0xd8a   : > { %v3782_v31 = vadd.f32 %v3781_v12, %v3780_v59 }
 0xd8c   : > { %v3783_v10 = vrot.slane %v3782_v31, 1 }
 0xd8e   : > { %v3784_v42 = vadd.f32 %v3783_v10, %v3782_v31 }
 0xd90   : > { %4409 = vpush %v3784_v42 }
 0xdc1   : > { %s4410_s29 = spop %4409 }
 0xdc2   : > { %s3786_s24 = smax.f32 %s5085_s18, %s4410_s29 }
 0xddb   : > { %v3590_v20 = vpop.xlane.xlu0 %3589 }
 0xddc   : > { %v3621_v0 = vmul.f32 0.0078125, %v3590_v20 }
 0xddd   : > { %v3592_v21 = vpop.xlane.xlu1 %3591 }
 0xdde   : > { %v3622_v6 = vmul.f32 0.0078125, %v3592_v21  ;;  %v3637_v11 = vadd.f32 1e-05, %v3621_v0 }
 0xde0   : > { %v3638_v22 = vadd.f32 1e-05, %v3622_v6 }
 0xde2   : > { %4791 = vrsqrt.f32 %v3638_v22 }
 0xde3   : > { %v3594_v2 = vpop.xlane.xlu0 %3593  ;;  %4793 = vrsqrt.f32 %v3637_v11 }
 0xde4   : > { %v3623_v24 = vmul.f32 0.0078125, %v3594_v2 }
 0xde5   : > { %v3596_v33 = vpop.xlane.xlu1 %3595 }
 0xde6   : > { %v3639_v35 = vadd.f32 1e-05, %v3623_v24  ;;  %v3624_v4 = vmul.f32 0.0078125, %v3596_v33 }
 0xde8   : > { %4795 = vrsqrt.f32 %v3639_v35  ;;  %v3640_v32 = vadd.f32 1e-05, %v3624_v4 }
 0xdea   : > { %4797 = vrsqrt.f32 %v3640_v32 }
 0xdeb   : > { %v3598_v40 = vpop.xlane.xlu0 %3597 }
 0xdec   : > { %v3625_v27 = vmul.f32 0.0078125, %v3598_v40  ;;  %v4792_v55 = vpop.eup %4791 }
 0xded   : > { %v3600_v39 = vpop.xlane.xlu1 %3599  ;;  %v4794_v8 = vpop.eup %4793  ;;  %v3670_v49 = vmul.f32 %v4792_v55, %v6765_v38 }
 0xdee   : > { %v3641_v62 = vadd.f32 1e-05, %v3625_v27  ;;  %v3626_v23 = vmul.f32 0.0078125, %v3600_v39  ;;  %v3669_v26 = vmul.f32 %v4794_v8, %v6762_v30 }
 0xdef   : > { %v3692_v44 = vmul.f32 %v6847_v25, %v3670_v49 }
 0xdf0   : > { %4799 = vrsqrt.f32 %v3641_v62  ;;  %v3642_v61 = vadd.f32 1e-05, %v3626_v23  ;;  %v3691_v38 = vmul.f32 %v6847_v25, %v3669_v26 }
 0xdf2   : > { %v4796_v5 = vpop.eup %4795  ;;  %4801 = vrsqrt.f32 %v3642_v61 }
 0xdf3   : > { %v3602_v13 = vpop.xlane.xlu0 %3601  ;;  %v3671_v14 = vmul.f32 %v4796_v5, %v6772_v56  ;;  %v6856_v56 = vld [vmem:[%s7060_s25 + $0x1] ss:$0 sm:$0xff] }
 0xdf4   : > { %v3627_v51 = vmul.f32 0.0078125, %v3602_v13  ;;  %v4798_v43 = vpop.eup %4797  ;;  %v3714_v16 = vadd.f32 %v6856_v56, %v3692_v44  ;;  %v3713_v21 = vadd.f32 %v6856_v56, %v3691_v38 }
 0xdf5   : > { %v3604_v45 = vpop.xlane.xlu1 %3603  ;;  %v3693_v7 = vmul.f32 %v6847_v25, %v3671_v14  ;;  %v3672_v30 = vmul.f32 %v4798_v43, %v6775_v1 }
 0xdf6   : > { %v3643_v58 = vadd.f32 1e-05, %v3627_v51  ;;  %v3628_v52 = vmul.f32 0.0078125, %v3604_v45  ;;  %v3730_v0 = vmul.f32 %v3714_v16, %v5454_v54 }
 0xdf7   : > { %v3715_v20 = vadd.f32 %v6856_v56, %v3693_v7  ;;  %v3694_v1 = vmul.f32 %v6847_v25, %v3672_v30  ;;  %v7074_v7 = vld [vmem:[#allocation30_spill] sm:$0xff] }
 0xdf8   : > { %4803 = vrsqrt.f32 %v3643_v58  ;;  %v3644_v18 = vadd.f32 1e-05, %v3628_v52 }
 0xdf9   : > { %v3731_v11 = vmul.f32 %v3715_v20, %v5444_v47  ;;  %v3716_v33 = vadd.f32 %v6856_v56, %v3694_v1 }
 0xdfa   : > { %v4800_v29 = vpop.eup %4799  ;;  %4805 = vrsqrt.f32 %v3644_v18 }
 0xdfb   : > { %v3606_v57 = vpop.xlane.xlu0 %3605  ;;  %v3673_v59 = vmul.f32 %v4800_v29, %v6782_v19  ;;  %v3729_v19 = vmul.f32 %v3713_v21, %v5446_v48  ;;  %v3732_v48 = vmul.f32 %v3716_v33, %v5452_v53 }
 0xdfc   : > { %v3629_v3 = vmul.f32 0.0078125, %v3606_v57  ;;  %v4802_v31 = vpop.eup %4801 }
 0xdfd   : > { %v3608_v12 = vpop.xlane.xlu1 %3607  ;;  %v3695_v2 = vmul.f32 %v6847_v25, %v3673_v59  ;;  %v3674_v22 = vmul.f32 %v4802_v31, %v6785_v37  ;;  %v3787_v27 = vadd.f32 %v3730_v0, %v3729_v19 }
 0xdfe   : > { %v3645_v10 = vadd.f32 1e-05, %v3629_v3  ;;  %v3630_v42 = vmul.f32 0.0078125, %v3608_v12 }
 0xdff   : > { %v3717_v54 = vadd.f32 %v6856_v56, %v3695_v2  ;;  %v3696_v39 = vmul.f32 %v6847_v25, %v3674_v22  ;;  %v3788_v61 = vadd.f32 %v3787_v27, %v3731_v11  ;;  %v7077_v27 = vld [vmem:[#allocation31_spill] sm:$0xff] }
 0xe00   : > { %4807 = vrsqrt.f32 %v3645_v10  ;;  %v3646_v6 = vadd.f32 1e-05, %v3630_v42  ;;  %v7075_v10 = vld [vmem:[#allocation29_spill] sm:$0xff] }
 0xe01   : > { %v3733_v8 = vmul.f32 %v3717_v54, %v5474_v63  ;;  %v3718_v13 = vadd.f32 %v6856_v56, %v3696_v39  ;;  %v3789_v51 = vadd.f32 %v3788_v61, %v3732_v48 }
 0xe02   : > { %v4804_v24 = vpop.eup %4803  ;;  %4809 = vrsqrt.f32 %v3646_v6  ;;  %v7076_v6 = vld [vmem:[#allocation32_spill] sm:$0xff] }
 0xe03   : > { %v3675_v35 = vmul.f32 %v4804_v24, %v6792_v15  ;;  %v3610_v4 = vpop.xlane.xlu0 %3609  ;;  %v3790_v14 = vadd.f32 %v3789_v51, %v3733_v8  ;;  %v7079_v8 = vld [vmem:[#allocation33_spill] sm:$0xff] }
 0xe04   : > { %v4806_v32 = vpop.eup %4805  ;;  %v3631_v40 = vmul.f32 0.0078125, %v3610_v4 }
 0xe05   : > { %v3612_v62 = vpop.xlane.xlu1 %3611  ;;  %v3697_v47 = vmul.f32 %v6847_v25, %v3675_v35  ;;  %v3676_v55 = vmul.f32 %v4806_v32, %v6795_v46  ;;  %v7073_v46 = vld [vmem:[#allocation28_spill] sm:$0xff] }
 0xe06   : > { %v3647_v37 = vadd.f32 1e-05, %v3631_v40  ;;  %v3632_v23 = vmul.f32 0.0078125, %v3612_v62  ;;  %v3734_v43 = vmul.f32 %v3718_v13, %v7073_v46  ;;  %v7078_v62 = vld [vmem:[#allocation34_spill] sm:$0xff]  ;;  %v7081_v46 = vld [vmem:[#allocation35_spill] sm:$0xff] }
 0xe07   : > { %v3719_v49 = vadd.f32 %v6856_v56, %v3697_v47  ;;  %v3698_v45 = vmul.f32 %v6847_v25, %v3676_v55 }
 0xe08   : > { %4811 = vrsqrt.f32 %v3647_v37  ;;  %v3648_v15 = vadd.f32 1e-05, %v3632_v23 }
 0xe09   : > { %v3735_v30 = vmul.f32 %v3719_v49, %v7074_v7  ;;  %v3720_v57 = vadd.f32 %v6856_v56, %v3698_v45  ;;  %v7080_v49 = vld [vmem:[#allocation36_spill] sm:$0xff] }
 0xe0a   : > { %v4808_v5 = vpop.eup %4807  ;;  %4813 = vrsqrt.f32 %v3648_v15 }
 0xe0b   : > { %v3677_v58 = vmul.f32 %v4808_v5, %v6802_v9  ;;  %v3614_v53 = vpop.xlane.xlu0 %3613  ;;  %v3791_v9 = vadd.f32 %v3790_v14, %v3734_v43  ;;  %v3736_v42 = vmul.f32 %v3720_v57, %v7075_v10  ;;  %v7084_v57 = vld [vmem:[#allocation37_spill] sm:$0xff] }
 0xe0c   : > { %v4810_v52 = vpop.eup %4809  ;;  %v3633_v26 = vmul.f32 0.0078125, %v3614_v53 }
 0xe0d   : > { %v3699_v18 = vmul.f32 %v6847_v25, %v3677_v58  ;;  %v3678_v63 = vmul.f32 %v4810_v52, %v6805_v34  ;;  %v3616_v44 = vpop.xlane.xlu1 %3615  ;;  %v3792_v31 = vadd.f32 %v3791_v9, %v3735_v30  ;;  %v3808_v9 = vstv %s3786_s24 }
 0xe0e   : > { %v3649_v29 = vadd.f32 1e-05, %v3633_v26  ;;  %v3634_v38 = vmul.f32 0.0078125, %v3616_v44 }
 0xe0f   : > { %v3721_v16 = vadd.f32 %v6856_v56, %v3699_v18  ;;  %v3700_v59 = vmul.f32 %v6847_v25, %v3678_v63  ;;  %v3793_v35 = vadd.f32 %v3792_v31, %v3736_v42 }
 0xe10   : > { %4815 = vrsqrt.f32 %v3649_v29  ;;  %v3650_v3 = vadd.f32 1e-05, %v3634_v38  ;;  %v7083_v38 = vld [vmem:[#allocation38_spill] sm:$0xff] }
 0xe11   : > { %v3737_v0 = vmul.f32 %v3721_v16, %v7076_v6  ;;  %v3722_v2 = vadd.f32 %v6856_v56, %v3700_v59 }
 0xe12   : > { %v4812_v12 = vpop.eup %4811  ;;  %4817 = vrsqrt.f32 %v3650_v3 }
 0xe13   : > { %v3679_v34 = vmul.f32 %v4812_v12, %v6812_v50  ;;  %v3618_v21 = vpop.xlane.xlu0 %3617  ;;  %v3794_v40 = vadd.f32 %v3793_v35, %v3737_v0  ;;  %v3738_v54 = vmul.f32 %v3722_v2, %v7077_v27 }
 0xe14   : > { %v4814_v20 = vpop.eup %4813  ;;  %v3635_v1 = vmul.f32 0.0078125, %v3618_v21 }
 0xe15   : > { %v3701_v22 = vmul.f32 %v6847_v25, %v3679_v34  ;;  %v3680_v24 = vmul.f32 %v4814_v20, %v6815_v36  ;;  %v3620_v19 = vpop.xlane.xlu1 %3619  ;;  %v3795_v48 = vadd.f32 %v3794_v40, %v3738_v54 }
 0xe16   : > { %v3651_v11 = vadd.f32 1e-05, %v3635_v1  ;;  %v3636_v33 = vmul.f32 0.0078125, %v3620_v19 }
 0xe17   : > { %v3723_v4 = vadd.f32 %v6856_v56, %v3701_v22  ;;  %v3702_v32 = vmul.f32 %v6847_v25, %v3680_v24 }
 0xe18   : > { %4819 = vrsqrt.f32 %v3651_v11  ;;  %v3652_v50 = vadd.f32 1e-05, %v3636_v33 }
 0xe19   : > { %v3739_v37 = vmul.f32 %v3723_v4, %v7078_v62  ;;  %v3724_v23 = vadd.f32 %v6856_v56, %v3702_v32 }
 0xe1a   : > { %v4816_v39 = vpop.eup %4815  ;;  %4821 = vrsqrt.f32 %v3652_v50 }
 0xe1b   : > { %v3681_v36 = vmul.f32 %v4816_v39, %v6822_v17  ;;  %v3796_v15 = vadd.f32 %v3795_v48, %v3739_v37  ;;  %v3740_v13 = vmul.f32 %v3724_v23, %v7079_v8  ;;  %4823 = vrcp.f32 %v3808_v9 }
 0xe1c   : > { %v4818_v61 = vpop.eup %4817 }
 0xe1d   : > { %v3703_v47 = vmul.f32 %v6847_v25, %v3681_v36  ;;  %v3682_v55 = vmul.f32 %v4818_v61, %v6825_v41  ;;  %v3797_v52 = vadd.f32 %v3796_v15, %v3740_v13 }
 0xe1f   : > { %v3725_v5 = vadd.f32 %v6856_v56, %v3703_v47  ;;  %v3704_v51 = vmul.f32 %v6847_v25, %v3682_v55 }
 0xe21   : > { %v3741_v45 = vmul.f32 %v3725_v5, %v7080_v49  ;;  %v3726_v58 = vadd.f32 %v6856_v56, %v3704_v51 }
 0xe22   : > { %v4820_v53 = vpop.eup %4819 }
 0xe23   : > { %v3683_v17 = vmul.f32 %v4820_v53, %v6832_v28  ;;  %v3798_v14 = vadd.f32 %v3797_v52, %v3741_v45  ;;  %v3742_v43 = vmul.f32 %v3726_v58, %v7081_v46 }
 0xe24   : > { %v4822_v26 = vpop.eup %4821 }
 0xe25   : > { %v3705_v41 = vmul.f32 %v6847_v25, %v3683_v17  ;;  %v3684_v18 = vmul.f32 %v4822_v26, %v6835_v60  ;;  %v3799_v29 = vadd.f32 %v3798_v14, %v3742_v43 }
 0xe27   : > { %v3727_v63 = vadd.f32 %v6856_v56, %v3705_v41  ;;  %v3706_v44 = vmul.f32 %v6847_v25, %v3684_v18 }
 0xe29   : > { %v3743_v7 = vmul.f32 %v3727_v63, %v7083_v38  ;;  %v3728_v28 = vadd.f32 %v6856_v56, %v3706_v44  ;;  %v4824_v56 = vpop.eup %4823 }
 0xe2b   : > { %v3800_v30 = vadd.f32 %v3799_v29, %v3743_v7  ;;  %v3744_v3 = vmul.f32 %v3728_v28, %v7084_v57 }
 0xe2d   : > { %v3801_v16 = vadd.f32 %v3800_v30, %v3744_v3 }
 0xe2f   : > { %v3802_v60 = vrot.slane %v3801_v16, 4 }
 0xe31   : > { %v3803_v59 = vadd.f32 %v3802_v60, %v3801_v16 }
 0xe33   : > { %v3804_v25 = vrot.slane %v3803_v59, 2 }
 0xe35   : > { %v3805_v12 = vadd.f32 %v3804_v25, %v3803_v59 }
 0xe37   : > { %v3806_v31 = vrot.slane %v3805_v12, 1 }
 0xe39   : > { %v3807_v10 = vadd.f32 %v3806_v31, %v3805_v12 }
 0xe3b   : > { %v3810_v42 = vmul.f32 %v4824_v56, %v3807_v10 }
 0xe3d   : > { %3811 = vst [vmem:[%s562_s20] sm:$0x1] %v3810_v42 }
 0xe3e   : > { %5007 = shalt.err (!%p5004_p2)
}
 0xe3f   : > { %s5008_s21 = scalar_lea.hbm %s6920_s14, 16  ;;  %s5012_s24 = scalar_lea.hbm %s7087_s19, 32 }
 0xe40   : > { %p5009_p3 = scmp.ne.s32.totalorder %s6920_s14, %s5008_s21  ;;  %p5013_p7 = scmp.lt.u32.totalorder %s6920_s14, %s7087_s19 }
 0xe41   : > { %p5014_p8 = scmp.lt.u32.totalorder %s5012_s24, %s5008_s21  ;;  %p5016_p13 = scmp.lt.u32.totalorder %s5008_s21, %s6920_s14 }
 0xe42   : > { %p5010_p4 = pnand %p5009_p3, %p7088_p1 }
 0xe43   : > { %p5015_p11 = por %p5014_p8, %p5013_p7 }
 0xe44   : > { %p5011_p12 = pneg %p5010_p4 }
 0xe45   : > { %p5017_p6 = por %p5016_p13, %p5015_p11 }
 0xe47   : > { %p5018_p9 = pnand %p5017_p6, %p5011_p12 }
 0xe49   : > { %5021 = shalt.err (!%p5018_p9)
}
 0xe4a   : > { %4435 = dma.vmem_to_hbm [thread:$0]  (%p7088_p1), %s6922_s22, 16, %s6920_s14, %s3813_s13  }
 0xe4b PF: > { %s7089_s20 = sld [smem:[#allocation22_spill]]  ;;  %s7090_s3 = sld [smem:[#allocation19_spill]] }
 0xe4c   : > { %s7091_s5 = sld [smem:[#allocation26_spill]] }
 0xe51   : > { %p4472_p5 = scmp.ge.s32.totalorder %s7089_s20, 2  ;;  %s3837_s15 = sand.u32 1, %s7090_s3  }
 0xe52   : > { %p7092_p0 = scmp.ne.s32.totalorder %s7091_s5, 0  ;;  %s3838_s30 = scalar_lea.sflag [#allocation4], %s3837_s15 }
 0xe54   : > { %p4457_p10 = pnand %p4472_p5, %p7092_p0 }
 0xe56   : > { %5055 = dma.done.wait (!%p4457_p10), %s3838_s30, 16  }
 0xe57   : > { %5057 = vsyncadd (!%p4457_p10), %s3838_s30, 4294967280  ;;  %s7093_s16 = sld [smem:[#allocation23_spill]]  ;;  %s7094_s29 = sld [smem:[#allocation20_spill]] }
 0xe58   : > { %s7095_s30 = sld [smem:[#allocation21_spill]]  ;;  %s7096_s15 = sld [smem:[#allocation24_spill]] }
 0xe5d   : > { %p28_p2 = scmp.ge.s32.totalorder %s7093_s16, 4  }
 0xe5f   :  { %30 = sbr.rel (!%p28_p2) target bundleno = 12 (0xc), region = 151 }
 0xe66   :  { %3842 = vsyncpa [#allocation3], 1 }
 0xe67   :  { %3844 = vsyncpa [#allocation3 + $0x1], 1 }
 0xe68   :  { %3845 = vsyncpa [#allocation6], 1 }
 0xe69   :  { %3846 = vsyncpa [#allocation9], 1 }
 0xe6a   :  { %3847 = vsyncpa [#allocation12], 1 }
 0xe6b   :  { %3848 = vsyncpa [#allocation4], 1 }
 0xe6c   :  { %3850 = vsyncpa [#allocation4 + $0x1], 1 }

</bundles_post_ra>
